<compile_context>
chip_gen: v5e
topology: v5e:2x2
jax: 0.10.0
libtpu: 0.0.40
codegen_flags: <defaults>
</compile_context>

<pallas_src>
import functools
import math

import jax
import jax.numpy as jnp
from jax import lax
from jax.experimental import pallas as pl
from jax.experimental.pallas import tpu as pltpu


# ----- hyper-parameters implied by the PyTorch module -------------------------------
D_H = 100          # d_model: object = Linear(512, 100), so D_h == 100 on the 512 path
N_HEAD = 10        # nn.TransformerEncoderLayer(d_model=D_h, nhead=10)
N_LAYERS = 8
DIM_FF = 2048      # PyTorch TransformerEncoderLayer default dim_feedforward
LN_EPS = 1e-5
OBJ_IN = 512
MAX_LEN = 110
_VMEM_LIMIT = 48 * 1024 * 1024   # > default 32 MiB scoped, < v7x 64 MiB physical


# ----- small in-kernel math helpers --------------------------------------------------
def _gelu(x):
    # TODO(synk): PyTorch nn.GELU default is the exact erf form; tanh approximation is
    # used so everything stays on VPU/EUP (max abs diff ~1e-3).
    c = 0.7978845608028654  # sqrt(2/pi)
    return 0.5 * x * (1.0 + jnp.tanh(c * (x + 0.044715 * x * x * x)))


def _sigmoid(x):
    return 1.0 / (1.0 + jnp.exp(-x))


def _layernorm(y, gamma, beta, eps):
    mu = jnp.mean(y, axis=-1, keepdims=True)
    var = jnp.mean((y - mu) * (y - mu), axis=-1, keepdims=True)
    return (y - mu) * lax.rsqrt(var + eps) * gamma + beta


# ----- generic row-tiled linear (+ activation) kernel (used for the `object` layer) --
def _linear_kernel(x_ref, w_ref, b_ref, o_ref, *, act):
    x = x_ref[...].astype(jnp.float32)
    y = jnp.dot(x, w_ref[...].astype(jnp.float32),
                preferred_element_type=jnp.float32) + b_ref[...].astype(jnp.float32)
    if act == "relu":
        y = jnp.maximum(y, 0.0)
    elif act == "gelu":
        y = _gelu(y)
    elif act == "sigmoid":
        y = _sigmoid(y)
    o_ref[...] = y.astype(o_ref.dtype)


def linear(x, w, b, act="none", row_block=256):
    n, d_in = x.shape
    d_out = w.shape[1]
    tn = n if n <= row_block else row_block      # toy shapes: whole problem in one block
    return pl.pallas_call(
        functools.partial(_linear_kernel, act=act),
        out_shape=jax.ShapeDtypeStruct((n, d_out), x.dtype),
        grid_spec=pltpu.PrefetchScalarGridSpec(
            num_scalar_prefetch=0,
            grid=(pl.cdiv(n, tn),),
            in_specs=[
                pl.BlockSpec((tn, d_in), lambda i: (i, 0)),
                pl.BlockSpec((d_in, d_out), lambda i: (0, 0)),
                pl.BlockSpec((1, d_out), lambda i: (0, 0)),
            ],
            out_specs=pl.BlockSpec((tn, d_out), lambda i: (i, 0)),
        ),
        compiler_params=pltpu.CompilerParams(
            dimension_semantics=("parallel",),
            vmem_limit_bytes=_VMEM_LIMIT,
        ),
    )(x, w, b)


# ----- positional-encoding add kernel -------------------------------------------------
def _posenc_kernel(x_ref, pe_ref, o_ref):
    # x: (B, S, D), pe: (S, D) broadcast over batch (leading dim)
    o_ref[...] = x_ref[...] + pe_ref[...][None, :, :].astype(x_ref.dtype)


def posenc_add(x_bsd, pe_sd):
    return pl.pallas_call(
        _posenc_kernel,
        out_shape=jax.ShapeDtypeStruct(x_bsd.shape, x_bsd.dtype),
    )(x_bsd, pe_sd)


# ----- fused attention block: MHA + out-proj + residual + LayerNorm1 ------------------
def _attn_block_kernel(x_ref, wqkv_ref, bqkv_ref, wo_ref, bo_ref, g_ref, beta_ref,
                       o_ref, *, num_heads, head_dim, eps):
    x = x_ref[0].astype(jnp.float32)                         # (S, D)
    d = num_heads * head_dim
    qkv = jnp.dot(x, wqkv_ref[...].astype(jnp.float32),
                  preferred_element_type=jnp.float32)
    qkv = qkv + bqkv_ref[...].astype(jnp.float32)            # (S, 3D)
    q = qkv[:, 0:d]
    k = qkv[:, d:2 * d]
    v = qkv[:, 2 * d:3 * d]

    wo = wo_ref[...].astype(jnp.float32)                     # (D, D)
    scale = 1.0 / math.sqrt(head_dim)
    attn_proj = jnp.zeros((x.shape[0], d), dtype=jnp.float32)
    for h in range(num_heads):                               # static unroll (10 heads)
        lo = h * head_dim
        hi = lo + head_dim
        qh = q[:, lo:hi] * scale                             # (S, hd)
        kh = k[:, lo:hi]
        vh = v[:, lo:hi]
        s = lax.dot_general(qh, kh, (((1,), (1,)), ((), ())),
                            preferred_element_type=jnp.float32)   # (S, S)
        m = jnp.max(s, axis=-1, keepdims=True)
        e = jnp.exp(s - m)
        a = e * pl.reciprocal(jnp.sum(e, axis=-1, keepdims=True), approx=True)
        oh = jnp.dot(a, vh, preferred_element_type=jnp.float32)   # (S, hd)
        # concat(heads) @ Wo  ==  sum_h head_h @ Wo[h*hd:(h+1)*hd, :]
        attn_proj = attn_proj + jnp.dot(oh, wo[lo:hi, :],
                                        preferred_element_type=jnp.float32)
    sa = attn_proj + bo_ref[...].astype(jnp.float32)

    out = _layernorm(x + sa, g_ref[...].astype(jnp.float32),
                     beta_ref[...].astype(jnp.float32), eps)
    o_ref[0] = out.astype(o_ref.dtype)


def attn_block(x_bsd, wqkv, bqkv, wo, bo, ln_g, ln_b, *, num_heads):
    B, S, D = x_bsd.shape
    kern = functools.partial(_attn_block_kernel, num_heads=num_heads,
                             head_dim=D // num_heads, eps=LN_EPS)
    return pl.pallas_call(
        kern,
        out_shape=jax.ShapeDtypeStruct((B, S, D), x_bsd.dtype),
        grid_spec=pltpu.PrefetchScalarGridSpec(
            num_scalar_prefetch=0,
            grid=(B,),
            in_specs=[
                pl.BlockSpec((1, S, D), lambda b: (b, 0, 0)),
                pl.BlockSpec((D, 3 * D), lambda b: (0, 0)),
                pl.BlockSpec((1, 3 * D), lambda b: (0, 0)),
                pl.BlockSpec((D, D), lambda b: (0, 0)),
                pl.BlockSpec((1, D), lambda b: (0, 0)),
                pl.BlockSpec((1, D), lambda b: (0, 0)),
                pl.BlockSpec((1, D), lambda b: (0, 0)),
            ],
            out_specs=pl.BlockSpec((1, S, D), lambda b: (b, 0, 0)),
        ),
        compiler_params=pltpu.CompilerParams(
            dimension_semantics=("parallel",),
            vmem_limit_bytes=_VMEM_LIMIT,
        ),
    )(x_bsd, wqkv, bqkv, wo, bo, ln_g, ln_b)


# ----- fused FFN block: linear1 + relu + linear2 + residual + LayerNorm2 --------------
def _ffn_block_kernel(x_ref, w1_ref, b1_ref, w2_ref, b2_ref, g_ref, beta_ref,
                      o_ref, *, eps):
    x = x_ref[0].astype(jnp.float32)                         # (S, D)
    h = jnp.dot(x, w1_ref[...].astype(jnp.float32),
                preferred_element_type=jnp.float32) + b1_ref[...].astype(jnp.float32)
    h = jnp.maximum(h, 0.0)                                  # relu (PyTorch default)
    f = jnp.dot(h, w2_ref[...].astype(jnp.float32),
                preferred_element_type=jnp.float32) + b2_ref[...].astype(jnp.float32)
    out = _layernorm(x + f, g_ref[...].astype(jnp.float32),
                     beta_ref[...].astype(jnp.float32), eps)
    o_ref[0] = out.astype(o_ref.dtype)


def ffn_block(x_bsd, w1, b1, w2, b2, ln_g, ln_b):
    B, S, D = x_bsd.shape
    F = w1.shape[1]
    return pl.pallas_call(
        functools.partial(_ffn_block_kernel, eps=LN_EPS),
        out_shape=jax.ShapeDtypeStruct((B, S, D), x_bsd.dtype),
        grid_spec=pltpu.PrefetchScalarGridSpec(
            num_scalar_prefetch=0,
            grid=(B,),
            in_specs=[
                pl.BlockSpec((1, S, D), lambda b: (b, 0, 0)),
                pl.BlockSpec((D, F), lambda b: (0, 0)),
                pl.BlockSpec((1, F), lambda b: (0, 0)),
                pl.BlockSpec((F, D), lambda b: (0, 0)),
                pl.BlockSpec((1, D), lambda b: (0, 0)),
                pl.BlockSpec((1, D), lambda b: (0, 0)),
                pl.BlockSpec((1, D), lambda b: (0, 0)),
            ],
            out_specs=pl.BlockSpec((1, S, D), lambda b: (b, 0, 0)),
        ),
        compiler_params=pltpu.CompilerParams(
            dimension_semantics=("parallel",),
            vmem_limit_bytes=_VMEM_LIMIT,
        ),
    )(x_bsd, w1, b1, w2, b2, ln_g, ln_b)


# ----- fused output head: gelu -> fc1+gelu -> fc2+gelu -> fc3+sigmoid -----------------
def _head_kernel(x_ref, w1_ref, b1_ref, w2_ref, b2_ref, w3_ref, b3_ref, o_ref):
    h = _gelu(x_ref[...].astype(jnp.float32))                # gelu on encoder output
    h = _gelu(jnp.dot(h, w1_ref[...].astype(jnp.float32),
                      preferred_element_type=jnp.float32) + b1_ref[...].astype(jnp.float32))
    h = _gelu(jnp.dot(h, w2_ref[...].astype(jnp.float32),
                      preferred_element_type=jnp.float32) + b2_ref[...].astype(jnp.float32))
    p = _sigmoid(jnp.dot(h, w3_ref[...].astype(jnp.float32),
                         preferred_element_type=jnp.float32) + b3_ref[...].astype(jnp.float32))
    o_ref[...] = p.astype(o_ref.dtype)
    # TODO(synk): nn.Dropout layers around fc1/fc2/fc3 are identity in eval mode;
    # torch-RNG-matching dropout is not reproduced.


def head(x, fc1_w, fc1_b, fc2_w, fc2_b, fc3_w, fc3_b):
    n = x.shape[0]
    return pl.pallas_call(
        _head_kernel,
        out_shape=jax.ShapeDtypeStruct((n, 1), x.dtype),
    )(x, fc1_w, fc1_b, fc2_w, fc2_b, fc3_w, fc3_b)


# ----- parameters ---------------------------------------------------------------------
def positional_encoding_table(d_model, max_len=MAX_LEN):
    position = jnp.arange(max_len, dtype=jnp.float32)[:, None]
    div_term = jnp.exp(jnp.arange(0, d_model, 2, dtype=jnp.float32)
                       * (-math.log(10000.0) / d_model))
    pe = jnp.zeros((max_len, d_model), dtype=jnp.float32)
    pe = pe.at[:, 0::2].set(jnp.sin(position * div_term))
    pe = pe.at[:, 1::2].set(jnp.cos(position * div_term))
    return pe


def init_params(key, d_model=D_H, n_layers=N_LAYERS, dim_ff=DIM_FF, obj_in=OBJ_IN):
    ks = jax.random.split(key, 8)
    s = 0.02

    def dense(k, din, dout):
        return {"w": s * jax.random.normal(k, (din, dout), jnp.float32),
                "b": jnp.zeros((1, dout), jnp.float32)}

    layers = {   # stacked along a leading layer axis -> run under lax.scan
        "wqkv": s * jax.random.normal(ks[0], (n_layers, d_model, 3 * d_model), jnp.float32),
        "bqkv": jnp.zeros((n_layers, 1, 3 * d_model), jnp.float32),
        "wo":   s * jax.random.normal(ks[1], (n_layers, d_model, d_model), jnp.float32),
        "bo":   jnp.zeros((n_layers, 1, d_model), jnp.float32),
        "w1":   s * jax.random.normal(ks[2], (n_layers, d_model, dim_ff), jnp.float32),
        "b1":   jnp.zeros((n_layers, 1, dim_ff), jnp.float32),
        "w2":   s * jax.random.normal(ks[3], (n_layers, dim_ff, d_model), jnp.float32),
        "b2":   jnp.zeros((n_layers, 1, d_model), jnp.float32),
        "ln1_g": jnp.ones((n_layers, 1, d_model), jnp.float32),
        "ln1_b": jnp.zeros((n_layers, 1, d_model), jnp.float32),
        "ln2_g": jnp.ones((n_layers, 1, d_model), jnp.float32),
        "ln2_b": jnp.zeros((n_layers, 1, d_model), jnp.float32),
    }
    return {
        "pe": positional_encoding_table(d_model),
        "object": dense(ks[4], obj_in, d_model),
        "fc1": dense(ks[5], d_model, 64),
        "fc2": dense(ks[6], 64, 16),
        "fc3": dense(ks[7], 16, 1),
        "layers": layers,
    }


# ----- full forward pass --------------------------------------------------------------
def visual_discriminator_forward(params, visual_fusion):
    S, B, d_in = visual_fusion.shape
    x = visual_fusion
    if d_in == OBJ_IN:                                   # self.object (Linear 512->100)
        x = linear(x.reshape(S * B, d_in),
                   params["object"]["w"], params["object"]["b"]).reshape(S, B, -1)
    D = x.shape[-1]

    # single layout change: keep D lane-dense, grid attention/FFN over batch
    xb = jnp.transpose(x, (1, 0, 2))                     # (B, S, D)
    xb = posenc_add(xb, params["pe"][:S])                # PositionalEncoding (+dropout=id)

    def layer_step(carry, lp):                           # one TransformerEncoderLayer
        y = attn_block(carry, lp["wqkv"], lp["bqkv"], lp["wo"], lp["bo"],
                       lp["ln1_g"], lp["ln1_b"], num_heads=N_HEAD)
        y = ffn_block(y, lp["w1"], lp["b1"], lp["w2"], lp["b2"],
                      lp["ln2_g"], lp["ln2_b"])
        return y, None

    xb, _ = lax.scan(layer_step, xb, params["layers"])   # 8 layers, kernels compiled once

    p = head(xb.reshape(B * S, D),
             params["fc1"]["w"], params["fc1"]["b"],
             params["fc2"]["w"], params["fc2"]["b"],
             params["fc3"]["w"], params["fc3"]["b"])     # (B*S, 1)
    return jnp.transpose(p.reshape(B, S, 1), (1, 0, 2))  # (S, B, 1) like the PyTorch module


# ----- demo ---------------------------------------------------------------------------
if __name__ == "__main__":
    seq_len, batch = 8, 2
    key = jax.random.PRNGKey(0)
    k_in, k_p = jax.random.split(key)

    # last dim 512 exercises the `object` Linear(512 -> 100) path of the forward
    visual_fusion = jax.random.normal(k_in, (seq_len, batch, OBJ_IN), dtype=jnp.float32)
    params = init_params(k_p)

    fwd = jax.jit(visual_discriminator_forward)
    prob = fwd(params, visual_fusion)
    jax.block_until_ready(prob)

    assert prob.shape == (seq_len, batch, 1)
    assert bool(jnp.all(jnp.isfinite(prob)))
    assert bool(jnp.all((prob >= 0.0) & (prob <= 1.0)))

    print("KERNEL_OK")
</pallas_src>

<mosaic_0001>
module attributes {stable_mosaic.version = 11 : i64} {
  func.func @_linear_kernel(%arg0: i32, %arg1: memref<16x512xf32, #tpu.memory_space<vmem>>, %arg2: memref<512x100xf32, #tpu.memory_space<vmem>>, %arg3: memref<1x100xf32, #tpu.memory_space<vmem>>, %arg4: memref<16x100xf32, #tpu.memory_space<vmem>>) attributes {dimension_semantics = [#tpu.dimension_semantics<parallel>], iteration_bounds = array<i64: 1>, scalar_prefetch = 0 : i64, scratch_operands = 0 : i64, tpu.core_type = #tpu.core_type<tc>, window_params = [{transform_indices = @transform_0, window_bounds = array<i64: 16, 512>}, {pipeline_mode = #tpu.pipeline_mode<synchronous>, transform_indices = @transform_1, window_bounds = array<i64: 512, 100>}, {pipeline_mode = #tpu.pipeline_mode<synchronous>, transform_indices = @transform_2, window_bounds = array<i64: 1, 100>}, {transform_indices = @transform_3, window_bounds = array<i64: 16, 100>}]} {
    %c0 = arith.constant 0 : index
    %c0_0 = arith.constant 0 : index
    %0 = vector.load %arg1[%c0, %c0_0] : memref<16x512xf32, #tpu.memory_space<vmem>>, vector<16x512xf32>
    %c0_1 = arith.constant 0 : index
    %c0_2 = arith.constant 0 : index
    %1 = vector.load %arg2[%c0_1, %c0_2] : memref<512x100xf32, #tpu.memory_space<vmem>>, vector<512x100xf32>
    %cst = arith.constant dense<0.000000e+00> : vector<16x100xf32>
    %2 = tpu.matmul %0, %1, %cst {dimension_numbers = #tpu.dot_dimension_numbers<[1], [0], [0], [1], [0, 0, 1, 1], [], []>} : vector<16x512xf32>, vector<512x100xf32>, vector<16x100xf32> -> vector<16x100xf32>
    %c0_3 = arith.constant 0 : index
    %c0_4 = arith.constant 0 : index
    %3 = vector.load %arg3[%c0_3, %c0_4] : memref<1x100xf32, #tpu.memory_space<vmem>>, vector<1x100xf32>
    %4 = vector.broadcast %3 : vector<1x100xf32> to vector<16x100xf32>
    %5 = arith.addf %2, %4 : vector<16x100xf32>
    %c0_5 = arith.constant 0 : index
    %c0_6 = arith.constant 0 : index
    %6 = vector.load %arg4[%c0_5, %c0_6] : memref<16x100xf32, #tpu.memory_space<vmem>>, vector<16x100xf32>
    tpu.vector_store %arg4[%c0_5, %c0_6], %5 {strides = array<i32>} : memref<16x100xf32, #tpu.memory_space<vmem>>, vector<16x100xf32>,
    return
  }
  func.func @transform_0(%arg0: i32) -> (i32, i32) {
    %c0_i32 = arith.constant 0 : i32
    %c0_i32_0 = arith.constant 0 : i32
    return %arg0, %c0_i32 : i32, i32
  }
  func.func @transform_1(%arg0: i32) -> (i32, i32) {
    %c0_i32 = arith.constant 0 : i32
    %c0_i32_0 = arith.constant 0 : i32
    %c0_i32_1 = arith.constant 0 : i32
    return %c0_i32, %c0_i32_0 : i32, i32
  }
  func.func @transform_2(%arg0: i32) -> (i32, i32) {
    %c0_i32 = arith.constant 0 : i32
    %c0_i32_0 = arith.constant 0 : i32
    %c0_i32_1 = arith.constant 0 : i32
    return %c0_i32, %c0_i32_0 : i32, i32
  }
  func.func @transform_3(%arg0: i32) -> (i32, i32) {
    %c0_i32 = arith.constant 0 : i32
    %c0_i32_0 = arith.constant 0 : i32
    return %arg0, %c0_i32 : i32, i32
  }
}

module attributes {stable_mosaic.version = 11 : i64} {
  func.func @_posenc_kernel(%arg0: memref<2x8x100xf32, #tpu.memory_space<vmem>>, %arg1: memref<8x100xf32, #tpu.memory_space<vmem>>, %arg2: memref<2x8x100xf32, #tpu.memory_space<vmem>>) attributes {dimension_semantics = [], scalar_prefetch = 0 : i64, scratch_operands = 0 : i64, tpu.core_type = #tpu.core_type<tc>} {
    %c0 = arith.constant 0 : index
    %c0_0 = arith.constant 0 : index
    %c0_1 = arith.constant 0 : index
    %0 = vector.load %arg0[%c0, %c0_0, %c0_1] : memref<2x8x100xf32, #tpu.memory_space<vmem>>, vector<2x8x100xf32>
    %c0_2 = arith.constant 0 : index
    %c0_3 = arith.constant 0 : index
    %1 = vector.load %arg1[%c0_2, %c0_3] : memref<8x100xf32, #tpu.memory_space<vmem>>, vector<8x100xf32>
    %2 = vector.shape_cast %1 : vector<8x100xf32> to vector<1x8x100xf32>
    %3 = vector.broadcast %2 : vector<1x8x100xf32> to vector<2x8x100xf32>
    %4 = arith.addf %0, %3 : vector<2x8x100xf32>
    %c0_4 = arith.constant 0 : index
    %c0_5 = arith.constant 0 : index
    %c0_6 = arith.constant 0 : index
    %5 = vector.load %arg2[%c0_4, %c0_5, %c0_6] : memref<2x8x100xf32, #tpu.memory_space<vmem>>, vector<2x8x100xf32>
    tpu.vector_store %arg2[%c0_4, %c0_5, %c0_6], %4 {strides = array<i32>} : memref<2x8x100xf32, #tpu.memory_space<vmem>>, vector<2x8x100xf32>,
    return
  }
}

module attributes {stable_mosaic.version = 11 : i64} {
  func.func @_attn_block_kernel(%arg0: i32, %arg1: memref<1x8x100xf32, #tpu.memory_space<vmem>>, %arg2: memref<100x300xf32, #tpu.memory_space<vmem>>, %arg3: memref<1x300xf32, #tpu.memory_space<vmem>>, %arg4: memref<100x100xf32, #tpu.memory_space<vmem>>, %arg5: memref<1x100xf32, #tpu.memory_space<vmem>>, %arg6: memref<1x100xf32, #tpu.memory_space<vmem>>, %arg7: memref<1x100xf32, #tpu.memory_space<vmem>>, %arg8: memref<1x8x100xf32, #tpu.memory_space<vmem>>) attributes {dimension_semantics = [#tpu.dimension_semantics<parallel>], iteration_bounds = array<i64: 2>, scalar_prefetch = 0 : i64, scratch_operands = 0 : i64, tpu.core_type = #tpu.core_type<tc>, window_params = [{transform_indices = @transform_0, window_bounds = array<i64: 1, 8, 100>}, {pipeline_mode = #tpu.pipeline_mode<synchronous>, transform_indices = @transform_1, window_bounds = array<i64: 100, 300>}, {pipeline_mode = #tpu.pipeline_mode<synchronous>, transform_indices = @transform_2, window_bounds = array<i64: 1, 300>}, {pipeline_mode = #tpu.pipeline_mode<synchronous>, transform_indices = @transform_3, window_bounds = array<i64: 100, 100>}, {pipeline_mode = #tpu.pipeline_mode<synchronous>, transform_indices = @transform_4, window_bounds = array<i64: 1, 100>}, {pipeline_mode = #tpu.pipeline_mode<synchronous>, transform_indices = @transform_5, window_bounds = array<i64: 1, 100>}, {pipeline_mode = #tpu.pipeline_mode<synchronous>, transform_indices = @transform_6, window_bounds = array<i64: 1, 100>}, {transform_indices = @transform_7, window_bounds = array<i64: 1, 8, 100>}]} {
    %c0 = arith.constant 0 : index
    %c0_0 = arith.constant 0 : index
    %c0_1 = arith.constant 0 : index
    %0 = vector.load %arg1[%c0, %c0_0, %c0_1] : memref<1x8x100xf32, #tpu.memory_space<vmem>>, vector<1x8x100xf32>
    %1 = vector.shape_cast %0 : vector<1x8x100xf32> to vector<8x100xf32>
    %c0_2 = arith.constant 0 : index
    %c0_3 = arith.constant 0 : index
    %2 = vector.load %arg2[%c0_2, %c0_3] : memref<100x300xf32, #tpu.memory_space<vmem>>, vector<100x300xf32>
    %cst = arith.constant dense<0.000000e+00> : vector<8x300xf32>
    %3 = tpu.matmul %1, %2, %cst {dimension_numbers = #tpu.dot_dimension_numbers<[1], [0], [0], [1], [0, 0, 1, 1], [], []>} : vector<8x100xf32>, vector<100x300xf32>, vector<8x300xf32> -> vector<8x300xf32>
    %c0_4 = arith.constant 0 : index
    %c0_5 = arith.constant 0 : index
    %4 = vector.load %arg3[%c0_4, %c0_5] : memref<1x300xf32, #tpu.memory_space<vmem>>, vector<1x300xf32>
    %5 = vector.broadcast %4 : vector<1x300xf32> to vector<8x300xf32>
    %6 = arith.addf %3, %5 : vector<8x300xf32>
    %7 = vector.extract_strided_slice %6 {offsets = [0, 0], sizes = [8, 100], strides = [1, 1]} : vector<8x300xf32> to vector<8x100xf32>
    %8 = vector.extract_strided_slice %6 {offsets = [0, 100], sizes = [8, 100], strides = [1, 1]} : vector<8x300xf32> to vector<8x100xf32>
    %9 = vector.extract_strided_slice %6 {offsets = [0, 200], sizes = [8, 100], strides = [1, 1]} : vector<8x300xf32> to vector<8x100xf32>
    %c0_6 = arith.constant 0 : index
    %c0_7 = arith.constant 0 : index
    %10 = vector.load %arg4[%c0_6, %c0_7] : memref<100x100xf32, #tpu.memory_space<vmem>>, vector<100x100xf32>
    %cst_8 = arith.constant 0.000000e+00 : f32
    %11 = vector.broadcast %cst_8 : f32 to vector<8x100xf32>
    %12 = vector.extract_strided_slice %7 {offsets = [0, 0], sizes = [8, 10], strides = [1, 1]} : vector<8x100xf32> to vector<8x10xf32>
    %cst_9 = arith.constant 0.316227764 : f32
    %13 = vector.broadcast %cst_9 : f32 to vector<8x10xf32>
    %14 = arith.mulf %12, %13 : vector<8x10xf32>
    %15 = vector.extract_strided_slice %8 {offsets = [0, 0], sizes = [8, 10], strides = [1, 1]} : vector<8x100xf32> to vector<8x10xf32>
    %16 = vector.extract_strided_slice %9 {offsets = [0, 0], sizes = [8, 10], strides = [1, 1]} : vector<8x100xf32> to vector<8x10xf32>
    %cst_10 = arith.constant dense<0.000000e+00> : vector<8x8xf32>
    %17 = tpu.matmul %14, %15, %cst_10 {dimension_numbers = #tpu.dot_dimension_numbers<[1], [1], [0], [0], [0, 0, 1, 0], [], []>} : vector<8x10xf32>, vector<8x10xf32>, vector<8x8xf32> -> vector<8x8xf32>
    %cst_11 = arith.constant dense<0xFF800000> : vector<8xf32>
    %18 = vector.multi_reduction <maximumf>, %17, %cst_11 [1] : vector<8x8xf32> to vector<8xf32>
    %19 = vector.shape_cast %18 : vector<8xf32> to vector<8x1xf32>
    %20 = vector.broadcast %19 : vector<8x1xf32> to vector<8x8xf32>
    %21 = arith.subf %17, %20 : vector<8x8xf32>
    %22 = math.exp %21 : vector<8x8xf32>
    %cst_12 = arith.constant dense<0.000000e+00> : vector<8xf32>
    %23 = vector.multi_reduction <add>, %22, %cst_12 [1] : vector<8x8xf32> to vector<8xf32>
    %24 = vector.shape_cast %23 : vector<8xf32> to vector<8x1xf32>
    %25 = tpu.reciprocal %24 {approx = true} : vector<8x1xf32> -> vector<8x1xf32>
    %26 = vector.broadcast %25 : vector<8x1xf32> to vector<8x8xf32>
    %27 = arith.mulf %22, %26 : vector<8x8xf32>
    %cst_13 = arith.constant dense<0.000000e+00> : vector<8x10xf32>
    %28 = tpu.matmul %27, %16, %cst_13 {dimension_numbers = #tpu.dot_dimension_numbers<[1], [0], [0], [1], [0, 0, 1, 1], [], []>} : vector<8x8xf32>, vector<8x10xf32>, vector<8x10xf32> -> vector<8x10xf32>
    %29 = vector.extract_strided_slice %10 {offsets = [0, 0], sizes = [10, 100], strides = [1, 1]} : vector<100x100xf32> to vector<10x100xf32>
    %cst_14 = arith.constant dense<0.000000e+00> : vector<8x100xf32>
    %30 = tpu.matmul %28, %29, %cst_14 {dimension_numbers = #tpu.dot_dimension_numbers<[1], [0], [0], [1], [0, 0, 1, 1], [], []>} : vector<8x10xf32>, vector<10x100xf32>, vector<8x100xf32> -> vector<8x100xf32>
    %31 = arith.addf %11, %30 : vector<8x100xf32>
    %32 = vector.extract_strided_slice %7 {offsets = [0, 10], sizes = [8, 10], strides = [1, 1]} : vector<8x100xf32> to vector<8x10xf32>
    %cst_15 = arith.constant 0.316227764 : f32
    %33 = vector.broadcast %cst_15 : f32 to vector<8x10xf32>
    %34 = arith.mulf %32, %33 : vector<8x10xf32>
    %35 = vector.extract_strided_slice %8 {offsets = [0, 10], sizes = [8, 10], strides = [1, 1]} : vector<8x100xf32> to vector<8x10xf32>
    %36 = vector.extract_strided_slice %9 {offsets = [0, 10], sizes = [8, 10], strides = [1, 1]} : vector<8x100xf32> to vector<8x10xf32>
    %cst_16 = arith.constant dense<0.000000e+00> : vector<8x8xf32>
    %37 = tpu.matmul %34, %35, %cst_16 {dimension_numbers = #tpu.dot_dimension_numbers<[1], [1], [0], [0], [0, 0, 1, 0], [], []>} : vector<8x10xf32>, vector<8x10xf32>, vector<8x8xf32> -> vector<8x8xf32>
    %cst_17 = arith.constant dense<0xFF800000> : vector<8xf32>
    %38 = vector.multi_reduction <maximumf>, %37, %cst_17 [1] : vector<8x8xf32> to vector<8xf32>
    %39 = vector.shape_cast %38 : vector<8xf32> to vector<8x1xf32>
    %40 = vector.broadcast %39 : vector<8x1xf32> to vector<8x8xf32>
    %41 = arith.subf %37, %40 : vector<8x8xf32>
    %42 = math.exp %41 : vector<8x8xf32>
    %cst_18 = arith.constant dense<0.000000e+00> : vector<8xf32>
    %43 = vector.multi_reduction <add>, %42, %cst_18 [1] : vector<8x8xf32> to vector<8xf32>
    %44 = vector.shape_cast %43 : vector<8xf32> to vector<8x1xf32>
    %45 = tpu.reciprocal %44 {approx = true} : vector<8x1xf32> -> vector<8x1xf32>
    %46 = vector.broadcast %45 : vector<8x1xf32> to vector<8x8xf32>
    %47 = arith.mulf %42, %46 : vector<8x8xf32>
    %cst_19 = arith.constant dense<0.000000e+00> : vector<8x10xf32>
    %48 = tpu.matmul %47, %36, %cst_19 {dimension_numbers = #tpu.dot_dimension_numbers<[1], [0], [0], [1], [0, 0, 1, 1], [], []>} : vector<8x8xf32>, vector<8x10xf32>, vector<8x10xf32> -> vector<8x10xf32>
    %49 = vector.extract_strided_slice %10 {offsets = [10, 0], sizes = [10, 100], strides = [1, 1]} : vector<100x100xf32> to vector<10x100xf32>
    %cst_20 = arith.constant dense<0.000000e+00> : vector<8x100xf32>
    %50 = tpu.matmul %48, %49, %cst_20 {dimension_numbers = #tpu.dot_dimension_numbers<[1], [0], [0], [1], [0, 0, 1, 1], [], []>} : vector<8x10xf32>, vector<10x100xf32>, vector<8x100xf32> -> vector<8x100xf32>
    %51 = arith.addf %31, %50 : vector<8x100xf32>
    %52 = vector.extract_strided_slice %7 {offsets = [0, 20], sizes = [8, 10], strides = [1, 1]} : vector<8x100xf32> to vector<8x10xf32>
    %cst_21 = arith.constant 0.316227764 : f32
    %53 = vector.broadcast %cst_21 : f32 to vector<8x10xf32>
    %54 = arith.mulf %52, %53 : vector<8x10xf32>
    %55 = vector.extract_strided_slice %8 {offsets = [0, 20], sizes = [8, 10], strides = [1, 1]} : vector<8x100xf32> to vector<8x10xf32>
    %56 = vector.extract_strided_slice %9 {offsets = [0, 20], sizes = [8, 10], strides = [1, 1]} : vector<8x100xf32> to vector<8x10xf32>
    %cst_22 = arith.constant dense<0.000000e+00> : vector<8x8xf32>
    %57 = tpu.matmul %54, %55, %cst_22 {dimension_numbers = #tpu.dot_dimension_numbers<[1], [1], [0], [0], [0, 0, 1, 0], [], []>} : vector<8x10xf32>, vector<8x10xf32>, vector<8x8xf32> -> vector<8x8xf32>
    %cst_23 = arith.constant dense<0xFF800000> : vector<8xf32>
    %58 = vector.multi_reduction <maximumf>, %57, %cst_23 [1] : vector<8x8xf32> to vector<8xf32>
    %59 = vector.shape_cast %58 : vector<8xf32> to vector<8x1xf32>
    %60 = vector.broadcast %59 : vector<8x1xf32> to vector<8x8xf32>
    %61 = arith.subf %57, %60 : vector<8x8xf32>
    %62 = math.exp %61 : vector<8x8xf32>
    %cst_24 = arith.constant dense<0.000000e+00> : vector<8xf32>
    %63 = vector.multi_reduction <add>, %62, %cst_24 [1] : vector<8x8xf32> to vector<8xf32>
    %64 = vector.shape_cast %63 : vector<8xf32> to vector<8x1xf32>
    %65 = tpu.reciprocal %64 {approx = true} : vector<8x1xf32> -> vector<8x1xf32>
    %66 = vector.broadcast %65 : vector<8x1xf32> to vector<8x8xf32>
    %67 = arith.mulf %62, %66 : vector<8x8xf32>
    %cst_25 = arith.constant dense<0.000000e+00> : vector<8x10xf32>
    %68 = tpu.matmul %67, %56, %cst_25 {dimension_numbers = #tpu.dot_dimension_numbers<[1], [0], [0], [1], [0, 0, 1, 1], [], []>} : vector<8x8xf32>, vector<8x10xf32>, vector<8x10xf32> -> vector<8x10xf32>
    %69 = vector.extract_strided_slice %10 {offsets = [20, 0], sizes = [10, 100], strides = [1, 1]} : vector<100x100xf32> to vector<10x100xf32>
    %cst_26 = arith.constant dense<0.000000e+00> : vector<8x100xf32>
    %70 = tpu.matmul %68, %69, %cst_26 {dimension_numbers = #tpu.dot_dimension_numbers<[1], [0], [0], [1], [0, 0, 1, 1], [], []>} : vector<8x10xf32>, vector<10x100xf32>, vector<8x100xf32> -> vector<8x100xf32>
    %71 = arith.addf %51, %70 : vector<8x100xf32>
    %72 = vector.extract_strided_slice %7 {offsets = [0, 30], sizes = [8, 10], strides = [1, 1]} : vector<8x100xf32> to vector<8x10xf32>
    %cst_27 = arith.constant 0.316227764 : f32
    %73 = vector.broadcast %cst_27 : f32 to vector<8x10xf32>
    %74 = arith.mulf %72, %73 : vector<8x10xf32>
    %75 = vector.extract_strided_slice %8 {offsets = [0, 30], sizes = [8, 10], strides = [1, 1]} : vector<8x100xf32> to vector<8x10xf32>
    %76 = vector.extract_strided_slice %9 {offsets = [0, 30], sizes = [8, 10], strides = [1, 1]} : vector<8x100xf32> to vector<8x10xf32>
    %cst_28 = arith.constant dense<0.000000e+00> : vector<8x8xf32>
    %77 = tpu.matmul %74, %75, %cst_28 {dimension_numbers = #tpu.dot_dimension_numbers<[1], [1], [0], [0], [0, 0, 1, 0], [], []>} : vector<8x10xf32>, vector<8x10xf32>, vector<8x8xf32> -> vector<8x8xf32>
    %cst_29 = arith.constant dense<0xFF800000> : vector<8xf32>
    %78 = vector.multi_reduction <maximumf>, %77, %cst_29 [1] : vector<8x8xf32> to vector<8xf32>
    %79 = vector.shape_cast %78 : vector<8xf32> to vector<8x1xf32>
    %80 = vector.broadcast %79 : vector<8x1xf32> to vector<8x8xf32>
    %81 = arith.subf %77, %80 : vector<8x8xf32>
    %82 = math.exp %81 : vector<8x8xf32>
    %cst_30 = arith.constant dense<0.000000e+00> : vector<8xf32>
    %83 = vector.multi_reduction <add>, %82, %cst_30 [1] : vector<8x8xf32> to vector<8xf32>
    %84 = vector.shape_cast %83 : vector<8xf32> to vector<8x1xf32>
    %85 = tpu.reciprocal %84 {approx = true} : vector<8x1xf32> -> vector<8x1xf32>
    %86 = vector.broadcast %85 : vector<8x1xf32> to vector<8x8xf32>
    %87 = arith.mulf %82, %86 : vector<8x8xf32>
    %cst_31 = arith.constant dense<0.000000e+00> : vector<8x10xf32>
    %88 = tpu.matmul %87, %76, %cst_31 {dimension_numbers = #tpu.dot_dimension_numbers<[1], [0], [0], [1], [0, 0, 1, 1], [], []>} : vector<8x8xf32>, vector<8x10xf32>, vector<8x10xf32> -> vector<8x10xf32>
    %89 = vector.extract_strided_slice %10 {offsets = [30, 0], sizes = [10, 100], strides = [1, 1]} : vector<100x100xf32> to vector<10x100xf32>
    %cst_32 = arith.constant dense<0.000000e+00> : vector<8x100xf32>
    %90 = tpu.matmul %88, %89, %cst_32 {dimension_numbers = #tpu.dot_dimension_numbers<[1], [0], [0], [1], [0, 0, 1, 1], [], []>} : vector<8x10xf32>, vector<10x100xf32>, vector<8x100xf32> -> vector<8x100xf32>
    %91 = arith.addf %71, %90 : vector<8x100xf32>
    %92 = vector.extract_strided_slice %7 {offsets = [0, 40], sizes = [8, 10], strides = [1, 1]} : vector<8x100xf32> to vector<8x10xf32>
    %cst_33 = arith.constant 0.316227764 : f32
    %93 = vector.broadcast %cst_33 : f32 to vector<8x10xf32>
    %94 = arith.mulf %92, %93 : vector<8x10xf32>
    %95 = vector.extract_strided_slice %8 {offsets = [0, 40], sizes = [8, 10], strides = [1, 1]} : vector<8x100xf32> to vector<8x10xf32>
    %96 = vector.extract_strided_slice %9 {offsets = [0, 40], sizes = [8, 10], strides = [1, 1]} : vector<8x100xf32> to vector<8x10xf32>
    %cst_34 = arith.constant dense<0.000000e+00> : vector<8x8xf32>
    %97 = tpu.matmul %94, %95, %cst_34 {dimension_numbers = #tpu.dot_dimension_numbers<[1], [1], [0], [0], [0, 0, 1, 0], [], []>} : vector<8x10xf32>, vector<8x10xf32>, vector<8x8xf32> -> vector<8x8xf32>
    %cst_35 = arith.constant dense<0xFF800000> : vector<8xf32>
    %98 = vector.multi_reduction <maximumf>, %97, %cst_35 [1] : vector<8x8xf32> to vector<8xf32>
    %99 = vector.shape_cast %98 : vector<8xf32> to vector<8x1xf32>
    %100 = vector.broadcast %99 : vector<8x1xf32> to vector<8x8xf32>
    %101 = arith.subf %97, %100 : vector<8x8xf32>
    %102 = math.exp %101 : vector<8x8xf32>
    %cst_36 = arith.constant dense<0.000000e+00> : vector<8xf32>
    %103 = vector.multi_reduction <add>, %102, %cst_36 [1] : vector<8x8xf32> to vector<8xf32>
    %104 = vector.shape_cast %103 : vector<8xf32> to vector<8x1xf32>
    %105 = tpu.reciprocal %104 {approx = true} : vector<8x1xf32> -> vector<8x1xf32>
    %106 = vector.broadcast %105 : vector<8x1xf32> to vector<8x8xf32>
    %107 = arith.mulf %102, %106 : vector<8x8xf32>
    %cst_37 = arith.constant dense<0.000000e+00> : vector<8x10xf32>
    %108 = tpu.matmul %107, %96, %cst_37 {dimension_numbers = #tpu.dot_dimension_numbers<[1], [0], [0], [1], [0, 0, 1, 1], [], []>} : vector<8x8xf32>, vector<8x10xf32>, vector<8x10xf32> -> vector<8x10xf32>
    %109 = vector.extract_strided_slice %10 {offsets = [40, 0], sizes = [10, 100], strides = [1, 1]} : vector<100x100xf32> to vector<10x100xf32>
    %cst_38 = arith.constant dense<0.000000e+00> : vector<8x100xf32>
    %110 = tpu.matmul %108, %109, %cst_38 {dimension_numbers = #tpu.dot_dimension_numbers<[1], [0], [0], [1], [0, 0, 1, 1], [], []>} : vector<8x10xf32>, vector<10x100xf32>, vector<8x100xf32> -> vector<8x100xf32>
    %111 = arith.addf %91, %110 : vector<8x100xf32>
    %112 = vector.extract_strided_slice %7 {offsets = [0, 50], sizes = [8, 10], strides = [1, 1]} : vector<8x100xf32> to vector<8x10xf32>
    %cst_39 = arith.constant 0.316227764 : f32
    %113 = vector.broadcast %cst_39 : f32 to vector<8x10xf32>
    %114 = arith.mulf %112, %113 : vector<8x10xf32>
    %115 = vector.extract_strided_slice %8 {offsets = [0, 50], sizes = [8, 10], strides = [1, 1]} : vector<8x100xf32> to vector<8x10xf32>
    %116 = vector.extract_strided_slice %9 {offsets = [0, 50], sizes = [8, 10], strides = [1, 1]} : vector<8x100xf32> to vector<8x10xf32>
    %cst_40 = arith.constant dense<0.000000e+00> : vector<8x8xf32>
    %117 = tpu.matmul %114, %115, %cst_40 {dimension_numbers = #tpu.dot_dimension_numbers<[1], [1], [0], [0], [0, 0, 1, 0], [], []>} : vector<8x10xf32>, vector<8x10xf32>, vector<8x8xf32> -> vector<8x8xf32>
    %cst_41 = arith.constant dense<0xFF800000> : vector<8xf32>
    %118 = vector.multi_reduction <maximumf>, %117, %cst_41 [1] : vector<8x8xf32> to vector<8xf32>
    %119 = vector.shape_cast %118 : vector<8xf32> to vector<8x1xf32>
    %120 = vector.broadcast %119 : vector<8x1xf32> to vector<8x8xf32>
    %121 = arith.subf %117, %120 : vector<8x8xf32>
    %122 = math.exp %121 : vector<8x8xf32>
    %cst_42 = arith.constant dense<0.000000e+00> : vector<8xf32>
    %123 = vector.multi_reduction <add>, %122, %cst_42 [1] : vector<8x8xf32> to vector<8xf32>
    %124 = vector.shape_cast %123 : vector<8xf32> to vector<8x1xf32>
    %125 = tpu.reciprocal %124 {approx = true} : vector<8x1xf32> -> vector<8x1xf32>
    %126 = vector.broadcast %125 : vector<8x1xf32> to vector<8x8xf32>
    %127 = arith.mulf %122, %126 : vector<8x8xf32>
    %cst_43 = arith.constant dense<0.000000e+00> : vector<8x10xf32>
    %128 = tpu.matmul %127, %116, %cst_43 {dimension_numbers = #tpu.dot_dimension_numbers<[1], [0], [0], [1], [0, 0, 1, 1], [], []>} : vector<8x8xf32>, vector<8x10xf32>, vector<8x10xf32> -> vector<8x10xf32>
    %129 = vector.extract_strided_slice %10 {offsets = [50, 0], sizes = [10, 100], strides = [1, 1]} : vector<100x100xf32> to vector<10x100xf32>
    %cst_44 = arith.constant dense<0.000000e+00> : vector<8x100xf32>
    %130 = tpu.matmul %128, %129, %cst_44 {dimension_numbers = #tpu.dot_dimension_numbers<[1], [0], [0], [1], [0, 0, 1, 1], [], []>} : vector<8x10xf32>, vector<10x100xf32>, vector<8x100xf32> -> vector<8x100xf32>
    %131 = arith.addf %111, %130 : vector<8x100xf32>
    %132 = vector.extract_strided_slice %7 {offsets = [0, 60], sizes = [8, 10], strides = [1, 1]} : vector<8x100xf32> to vector<8x10xf32>
    %cst_45 = arith.constant 0.316227764 : f32
    %133 = vector.broadcast %cst_45 : f32 to vector<8x10xf32>
    %134 = arith.mulf %132, %133 : vector<8x10xf32>
    %135 = vector.extract_strided_slice %8 {offsets = [0, 60], sizes = [8, 10], strides = [1, 1]} : vector<8x100xf32> to vector<8x10xf32>
    %136 = vector.extract_strided_slice %9 {offsets = [0, 60], sizes = [8, 10], strides = [1, 1]} : vector<8x100xf32> to vector<8x10xf32>
    %cst_46 = arith.constant dense<0.000000e+00> : vector<8x8xf32>
    %137 = tpu.matmul %134, %135, %cst_46 {dimension_numbers = #tpu.dot_dimension_numbers<[1], [1], [0], [0], [0, 0, 1, 0], [], []>} : vector<8x10xf32>, vector<8x10xf32>, vector<8x8xf32> -> vector<8x8xf32>
    %cst_47 = arith.constant dense<0xFF800000> : vector<8xf32>
    %138 = vector.multi_reduction <maximumf>, %137, %cst_47 [1] : vector<8x8xf32> to vector<8xf32>
    %139 = vector.shape_cast %138 : vector<8xf32> to vector<8x1xf32>
    %140 = vector.broadcast %139 : vector<8x1xf32> to vector<8x8xf32>
    %141 = arith.subf %137, %140 : vector<8x8xf32>
    %142 = math.exp %141 : vector<8x8xf32>
    %cst_48 = arith.constant dense<0.000000e+00> : vector<8xf32>
    %143 = vector.multi_reduction <add>, %142, %cst_48 [1] : vector<8x8xf32> to vector<8xf32>
    %144 = vector.shape_cast %143 : vector<8xf32> to vector<8x1xf32>
    %145 = tpu.reciprocal %144 {approx = true} : vector<8x1xf32> -> vector<8x1xf32>
    %146 = vector.broadcast %145 : vector<8x1xf32> to vector<8x8xf32>
    %147 = arith.mulf %142, %146 : vector<8x8xf32>
    %cst_49 = arith.constant dense<0.000000e+00> : vector<8x10xf32>
    %148 = tpu.matmul %147, %136, %cst_49 {dimension_numbers = #tpu.dot_dimension_numbers<[1], [0], [0], [1], [0, 0, 1, 1], [], []>} : vector<8x8xf32>, vector<8x10xf32>, vector<8x10xf32> -> vector<8x10xf32>
    %149 = vector.extract_strided_slice %10 {offsets = [60, 0], sizes = [10, 100], strides = [1, 1]} : vector<100x100xf32> to vector<10x100xf32>
    %cst_50 = arith.constant dense<0.000000e+00> : vector<8x100xf32>
    %150 = tpu.matmul %148, %149, %cst_50 {dimension_numbers = #tpu.dot_dimension_numbers<[1], [0], [0], [1], [0, 0, 1, 1], [], []>} : vector<8x10xf32>, vector<10x100xf32>, vector<8x100xf32> -> vector<8x100xf32>
    %151 = arith.addf %131, %150 : vector<8x100xf32>
    %152 = vector.extract_strided_slice %7 {offsets = [0, 70], sizes = [8, 10], strides = [1, 1]} : vector<8x100xf32> to vector<8x10xf32>
    %cst_51 = arith.constant 0.316227764 : f32
    %153 = vector.broadcast %cst_51 : f32 to vector<8x10xf32>
    %154 = arith.mulf %152, %153 : vector<8x10xf32>
    %155 = vector.extract_strided_slice %8 {offsets = [0, 70], sizes = [8, 10], strides = [1, 1]} : vector<8x100xf32> to vector<8x10xf32>
    %156 = vector.extract_strided_slice %9 {offsets = [0, 70], sizes = [8, 10], strides = [1, 1]} : vector<8x100xf32> to vector<8x10xf32>
    %cst_52 = arith.constant dense<0.000000e+00> : vector<8x8xf32>
    %157 = tpu.matmul %154, %155, %cst_52 {dimension_numbers = #tpu.dot_dimension_numbers<[1], [1], [0], [0], [0, 0, 1, 0], [], []>} : vector<8x10xf32>, vector<8x10xf32>, vector<8x8xf32> -> vector<8x8xf32>
    %cst_53 = arith.constant dense<0xFF800000> : vector<8xf32>
    %158 = vector.multi_reduction <maximumf>, %157, %cst_53 [1] : vector<8x8xf32> to vector<8xf32>
    %159 = vector.shape_cast %158 : vector<8xf32> to vector<8x1xf32>
    %160 = vector.broadcast %159 : vector<8x1xf32> to vector<8x8xf32>
    %161 = arith.subf %157, %160 : vector<8x8xf32>
    %162 = math.exp %161 : vector<8x8xf32>
    %cst_54 = arith.constant dense<0.000000e+00> : vector<8xf32>
    %163 = vector.multi_reduction <add>, %162, %cst_54 [1] : vector<8x8xf32> to vector<8xf32>
    %164 = vector.shape_cast %163 : vector<8xf32> to vector<8x1xf32>
    %165 = tpu.reciprocal %164 {approx = true} : vector<8x1xf32> -> vector<8x1xf32>
    %166 = vector.broadcast %165 : vector<8x1xf32> to vector<8x8xf32>
    %167 = arith.mulf %162, %166 : vector<8x8xf32>
    %cst_55 = arith.constant dense<0.000000e+00> : vector<8x10xf32>
    %168 = tpu.matmul %167, %156, %cst_55 {dimension_numbers = #tpu.dot_dimension_numbers<[1], [0], [0], [1], [0, 0, 1, 1], [], []>} : vector<8x8xf32>, vector<8x10xf32>, vector<8x10xf32> -> vector<8x10xf32>
    %169 = vector.extract_strided_slice %10 {offsets = [70, 0], sizes = [10, 100], strides = [1, 1]} : vector<100x100xf32> to vector<10x100xf32>
    %cst_56 = arith.constant dense<0.000000e+00> : vector<8x100xf32>
    %170 = tpu.matmul %168, %169, %cst_56 {dimension_numbers = #tpu.dot_dimension_numbers<[1], [0], [0], [1], [0, 0, 1, 1], [], []>} : vector<8x10xf32>, vector<10x100xf32>, vector<8x100xf32> -> vector<8x100xf32>
    %171 = arith.addf %151, %170 : vector<8x100xf32>
    %172 = vector.extract_strided_slice %7 {offsets = [0, 80], sizes = [8, 10], strides = [1, 1]} : vector<8x100xf32> to vector<8x10xf32>
    %cst_57 = arith.constant 0.316227764 : f32
    %173 = vector.broadcast %cst_57 : f32 to vector<8x10xf32>
    %174 = arith.mulf %172, %173 : vector<8x10xf32>
    %175 = vector.extract_strided_slice %8 {offsets = [0, 80], sizes = [8, 10], strides = [1, 1]} : vector<8x100xf32> to vector<8x10xf32>
    %176 = vector.extract_strided_slice %9 {offsets = [0, 80], sizes = [8, 10], strides = [1, 1]} : vector<8x100xf32> to vector<8x10xf32>
    %cst_58 = arith.constant dense<0.000000e+00> : vector<8x8xf32>
    %177 = tpu.matmul %174, %175, %cst_58 {dimension_numbers = #tpu.dot_dimension_numbers<[1], [1], [0], [0], [0, 0, 1, 0], [], []>} : vector<8x10xf32>, vector<8x10xf32>, vector<8x8xf32> -> vector<8x8xf32>
    %cst_59 = arith.constant dense<0xFF800000> : vector<8xf32>
    %178 = vector.multi_reduction <maximumf>, %177, %cst_59 [1] : vector<8x8xf32> to vector<8xf32>
    %179 = vector.shape_cast %178 : vector<8xf32> to vector<8x1xf32>
    %180 = vector.broadcast %179 : vector<8x1xf32> to vector<8x8xf32>
    %181 = arith.subf %177, %180 : vector<8x8xf32>
    %182 = math.exp %181 : vector<8x8xf32>
    %cst_60 = arith.constant dense<0.000000e+00> : vector<8xf32>
    %183 = vector.multi_reduction <add>, %182, %cst_60 [1] : vector<8x8xf32> to vector<8xf32>
    %184 = vector.shape_cast %183 : vector<8xf32> to vector<8x1xf32>
    %185 = tpu.reciprocal %184 {approx = true} : vector<8x1xf32> -> vector<8x1xf32>
    %186 = vector.broadcast %185 : vector<8x1xf32> to vector<8x8xf32>
    %187 = arith.mulf %182, %186 : vector<8x8xf32>
    %cst_61 = arith.constant dense<0.000000e+00> : vector<8x10xf32>
    %188 = tpu.matmul %187, %176, %cst_61 {dimension_numbers = #tpu.dot_dimension_numbers<[1], [0], [0], [1], [0, 0, 1, 1], [], []>} : vector<8x8xf32>, vector<8x10xf32>, vector<8x10xf32> -> vector<8x10xf32>
    %189 = vector.extract_strided_slice %10 {offsets = [80, 0], sizes = [10, 100], strides = [1, 1]} : vector<100x100xf32> to vector<10x100xf32>
    %cst_62 = arith.constant dense<0.000000e+00> : vector<8x100xf32>
    %190 = tpu.matmul %188, %189, %cst_62 {dimension_numbers = #tpu.dot_dimension_numbers<[1], [0], [0], [1], [0, 0, 1, 1], [], []>} : vector<8x10xf32>, vector<10x100xf32>, vector<8x100xf32> -> vector<8x100xf32>
    %191 = arith.addf %171, %190 : vector<8x100xf32>
    %192 = vector.extract_strided_slice %7 {offsets = [0, 90], sizes = [8, 10], strides = [1, 1]} : vector<8x100xf32> to vector<8x10xf32>
    %cst_63 = arith.constant 0.316227764 : f32
    %193 = vector.broadcast %cst_63 : f32 to vector<8x10xf32>
    %194 = arith.mulf %192, %193 : vector<8x10xf32>
    %195 = vector.extract_strided_slice %8 {offsets = [0, 90], sizes = [8, 10], strides = [1, 1]} : vector<8x100xf32> to vector<8x10xf32>
    %196 = vector.extract_strided_slice %9 {offsets = [0, 90], sizes = [8, 10], strides = [1, 1]} : vector<8x100xf32> to vector<8x10xf32>
    %cst_64 = arith.constant dense<0.000000e+00> : vector<8x8xf32>
    %197 = tpu.matmul %194, %195, %cst_64 {dimension_numbers = #tpu.dot_dimension_numbers<[1], [1], [0], [0], [0, 0, 1, 0], [], []>} : vector<8x10xf32>, vector<8x10xf32>, vector<8x8xf32> -> vector<8x8xf32>
    %cst_65 = arith.constant dense<0xFF800000> : vector<8xf32>
    %198 = vector.multi_reduction <maximumf>, %197, %cst_65 [1] : vector<8x8xf32> to vector<8xf32>
    %199 = vector.shape_cast %198 : vector<8xf32> to vector<8x1xf32>
    %200 = vector.broadcast %199 : vector<8x1xf32> to vector<8x8xf32>
    %201 = arith.subf %197, %200 : vector<8x8xf32>
    %202 = math.exp %201 : vector<8x8xf32>
    %cst_66 = arith.constant dense<0.000000e+00> : vector<8xf32>
    %203 = vector.multi_reduction <add>, %202, %cst_66 [1] : vector<8x8xf32> to vector<8xf32>
    %204 = vector.shape_cast %203 : vector<8xf32> to vector<8x1xf32>
    %205 = tpu.reciprocal %204 {approx = true} : vector<8x1xf32> -> vector<8x1xf32>
    %206 = vector.broadcast %205 : vector<8x1xf32> to vector<8x8xf32>
    %207 = arith.mulf %202, %206 : vector<8x8xf32>
    %cst_67 = arith.constant dense<0.000000e+00> : vector<8x10xf32>
    %208 = tpu.matmul %207, %196, %cst_67 {dimension_numbers = #tpu.dot_dimension_numbers<[1], [0], [0], [1], [0, 0, 1, 1], [], []>} : vector<8x8xf32>, vector<8x10xf32>, vector<8x10xf32> -> vector<8x10xf32>
    %209 = vector.extract_strided_slice %10 {offsets = [90, 0], sizes = [10, 100], strides = [1, 1]} : vector<100x100xf32> to vector<10x100xf32>
    %cst_68 = arith.constant dense<0.000000e+00> : vector<8x100xf32>
    %210 = tpu.matmul %208, %209, %cst_68 {dimension_numbers = #tpu.dot_dimension_numbers<[1], [0], [0], [1], [0, 0, 1, 1], [], []>} : vector<8x10xf32>, vector<10x100xf32>, vector<8x100xf32> -> vector<8x100xf32>
    %211 = arith.addf %191, %210 : vector<8x100xf32>
    %c0_69 = arith.constant 0 : index
    %c0_70 = arith.constant 0 : index
    %212 = vector.load %arg5[%c0_69, %c0_70] : memref<1x100xf32, #tpu.memory_space<vmem>>, vector<1x100xf32>
    %213 = vector.broadcast %212 : vector<1x100xf32> to vector<8x100xf32>
    %214 = arith.addf %211, %213 : vector<8x100xf32>
    %215 = arith.addf %1, %214 : vector<8x100xf32>
    %c0_71 = arith.constant 0 : index
    %c0_72 = arith.constant 0 : index
    %216 = vector.load %arg6[%c0_71, %c0_72] : memref<1x100xf32, #tpu.memory_space<vmem>>, vector<1x100xf32>
    %c0_73 = arith.constant 0 : index
    %c0_74 = arith.constant 0 : index
    %217 = vector.load %arg7[%c0_73, %c0_74] : memref<1x100xf32, #tpu.memory_space<vmem>>, vector<1x100xf32>
    %cst_75 = arith.constant dense<0.000000e+00> : vector<8xf32>
    %218 = vector.multi_reduction <add>, %215, %cst_75 [1] : vector<8x100xf32> to vector<8xf32>
    %219 = vector.shape_cast %218 : vector<8xf32> to vector<8x1xf32>
    %cst_76 = arith.constant 1.000000e+02 : f32
    %220 = vector.broadcast %cst_76 : f32 to vector<8x1xf32>
    %221 = arith.divf %219, %220 : vector<8x1xf32>
    %222 = vector.broadcast %221 : vector<8x1xf32> to vector<8x100xf32>
    %223 = arith.subf %215, %222 : vector<8x100xf32>
    %224 = vector.broadcast %221 : vector<8x1xf32> to vector<8x100xf32>
    %225 = arith.subf %215, %224 : vector<8x100xf32>
    %226 = arith.mulf %223, %225 : vector<8x100xf32>
    %cst_77 = arith.constant dense<0.000000e+00> : vector<8xf32>
    %227 = vector.multi_reduction <add>, %226, %cst_77 [1] : vector<8x100xf32> to vector<8xf32>
    %228 = vector.shape_cast %227 : vector<8xf32> to vector<8x1xf32>
    %cst_78 = arith.constant 1.000000e+02 : f32
    %229 = vector.broadcast %cst_78 : f32 to vector<8x1xf32>
    %230 = arith.divf %228, %229 : vector<8x1xf32>
    %231 = vector.broadcast %221 : vector<8x1xf32> to vector<8x100xf32>
    %232 = arith.subf %215, %231 : vector<8x100xf32>
    %cst_79 = arith.constant 9.99999974E-6 : f32
    %233 = vector.broadcast %cst_79 : f32 to vector<8x1xf32>
    %234 = arith.addf %230, %233 : vector<8x1xf32>
    %235 = math.rsqrt %234 : vector<8x1xf32>
    %236 = vector.broadcast %235 : vector<8x1xf32> to vector<8x100xf32>
    %237 = arith.mulf %232, %236 : vector<8x100xf32>
    %238 = vector.broadcast %216 : vector<1x100xf32> to vector<8x100xf32>
    %239 = arith.mulf %237, %238 : vector<8x100xf32>
    %240 = vector.broadcast %217 : vector<1x100xf32> to vector<8x100xf32>
    %241 = arith.addf %239, %240 : vector<8x100xf32>
    %c0_80 = arith.constant 0 : index
    %c0_81 = arith.constant 0 : index
    %c0_82 = arith.constant 0 : index
    %242 = vector.load %arg8[%c0_80, %c0_81, %c0_82] : memref<1x8x100xf32, #tpu.memory_space<vmem>>, vector<1x8x100xf32>
    %243 = vector.shape_cast %242 : vector<1x8x100xf32> to vector<8x100xf32>
    %244 = vector.shape_cast %241 : vector<8x100xf32> to vector<1x8x100xf32>
    tpu.vector_store %arg8[%c0_80, %c0_81, %c0_82], %244 {strides = array<i32>} : memref<1x8x100xf32, #tpu.memory_space<vmem>>, vector<1x8x100xf32>,
    return
  }
  func.func @transform_0(%arg0: i32) -> (i32, i32, i32) {
    %c0_i32 = arith.constant 0 : i32
    %c0_i32_0 = arith.constant 0 : i32
    %c0_i32_1 = arith.constant 0 : i32
    return %arg0, %c0_i32, %c0_i32_0 : i32, i32, i32
  }
  func.func @transform_1(%arg0: i32) -> (i32, i32) {
    %c0_i32 = arith.constant 0 : i32
    %c0_i32_0 = arith.constant 0 : i32
    %c0_i32_1 = arith.constant 0 : i32
    return %c0_i32, %c0_i32_0 : i32, i32
  }
  func.func @transform_2(%arg0: i32) -> (i32, i32) {
    %c0_i32 = arith.constant 0 : i32
    %c0_i32_0 = arith.constant 0 : i32
    %c0_i32_1 = arith.constant 0 : i32
    return %c0_i32, %c0_i32_0 : i32, i32
  }
  func.func @transform_3(%arg0: i32) -> (i32, i32) {
    %c0_i32 = arith.constant 0 : i32
    %c0_i32_0 = arith.constant 0 : i32
    %c0_i32_1 = arith.constant 0 : i32
    return %c0_i32, %c0_i32_0 : i32, i32
  }
  func.func @transform_4(%arg0: i32) -> (i32, i32) {
    %c0_i32 = arith.constant 0 : i32
    %c0_i32_0 = arith.constant 0 : i32
    %c0_i32_1 = arith.constant 0 : i32
    return %c0_i32, %c0_i32_0 : i32, i32
  }
  func.func @transform_5(%arg0: i32) -> (i32, i32) {
    %c0_i32 = arith.constant 0 : i32
    %c0_i32_0 = arith.constant 0 : i32
    %c0_i32_1 = arith.constant 0 : i32
    return %c0_i32, %c0_i32_0 : i32, i32
  }
  func.func @transform_6(%arg0: i32) -> (i32, i32) {
    %c0_i32 = arith.constant 0 : i32
    %c0_i32_0 = arith.constant 0 : i32
    %c0_i32_1 = arith.constant 0 : i32
    return %c0_i32, %c0_i32_0 : i32, i32
  }
  func.func @transform_7(%arg0: i32) -> (i32, i32, i32) {
    %c0_i32 = arith.constant 0 : i32
    %c0_i32_0 = arith.constant 0 : i32
    %c0_i32_1 = arith.constant 0 : i32
    return %arg0, %c0_i32, %c0_i32_0 : i32, i32, i32
  }
}

module attributes {stable_mosaic.version = 11 : i64} {
  func.func @_ffn_block_kernel(%arg0: i32, %arg1: memref<1x8x100xf32, #tpu.memory_space<vmem>>, %arg2: memref<100x2048xf32, #tpu.memory_space<vmem>>, %arg3: memref<1x2048xf32, #tpu.memory_space<vmem>>, %arg4: memref<2048x100xf32, #tpu.memory_space<vmem>>, %arg5: memref<1x100xf32, #tpu.memory_space<vmem>>, %arg6: memref<1x100xf32, #tpu.memory_space<vmem>>, %arg7: memref<1x100xf32, #tpu.memory_space<vmem>>, %arg8: memref<1x8x100xf32, #tpu.memory_space<vmem>>) attributes {dimension_semantics = [#tpu.dimension_semantics<parallel>], iteration_bounds = array<i64: 2>, scalar_prefetch = 0 : i64, scratch_operands = 0 : i64, tpu.core_type = #tpu.core_type<tc>, window_params = [{transform_indices = @transform_0, window_bounds = array<i64: 1, 8, 100>}, {pipeline_mode = #tpu.pipeline_mode<synchronous>, transform_indices = @transform_1, window_bounds = array<i64: 100, 2048>}, {pipeline_mode = #tpu.pipeline_mode<synchronous>, transform_indices = @transform_2, window_bounds = array<i64: 1, 2048>}, {pipeline_mode = #tpu.pipeline_mode<synchronous>, transform_indices = @transform_3, window_bounds = array<i64: 2048, 100>}, {pipeline_mode = #tpu.pipeline_mode<synchronous>, transform_indices = @transform_4, window_bounds = array<i64: 1, 100>}, {pipeline_mode = #tpu.pipeline_mode<synchronous>, transform_indices = @transform_5, window_bounds = array<i64: 1, 100>}, {pipeline_mode = #tpu.pipeline_mode<synchronous>, transform_indices = @transform_6, window_bounds = array<i64: 1, 100>}, {transform_indices = @transform_7, window_bounds = array<i64: 1, 8, 100>}]} {
    %c0 = arith.constant 0 : index
    %c0_0 = arith.constant 0 : index
    %c0_1 = arith.constant 0 : index
    %0 = vector.load %arg1[%c0, %c0_0, %c0_1] : memref<1x8x100xf32, #tpu.memory_space<vmem>>, vector<1x8x100xf32>
    %1 = vector.shape_cast %0 : vector<1x8x100xf32> to vector<8x100xf32>
    %c0_2 = arith.constant 0 : index
    %c0_3 = arith.constant 0 : index
    %2 = vector.load %arg2[%c0_2, %c0_3] : memref<100x2048xf32, #tpu.memory_space<vmem>>, vector<100x2048xf32>
    %cst = arith.constant dense<0.000000e+00> : vector<8x2048xf32>
    %3 = tpu.matmul %1, %2, %cst {dimension_numbers = #tpu.dot_dimension_numbers<[1], [0], [0], [1], [0, 0, 1, 1], [], []>} : vector<8x100xf32>, vector<100x2048xf32>, vector<8x2048xf32> -> vector<8x2048xf32>
    %c0_4 = arith.constant 0 : index
    %c0_5 = arith.constant 0 : index
    %4 = vector.load %arg3[%c0_4, %c0_5] : memref<1x2048xf32, #tpu.memory_space<vmem>>, vector<1x2048xf32>
    %5 = vector.broadcast %4 : vector<1x2048xf32> to vector<8x2048xf32>
    %6 = arith.addf %3, %5 : vector<8x2048xf32>
    %cst_6 = arith.constant 0.000000e+00 : f32
    %7 = vector.broadcast %cst_6 : f32 to vector<8x2048xf32>
    %8 = arith.maximumf %6, %7 : vector<8x2048xf32>
    %c0_7 = arith.constant 0 : index
    %c0_8 = arith.constant 0 : index
    %9 = vector.load %arg4[%c0_7, %c0_8] : memref<2048x100xf32, #tpu.memory_space<vmem>>, vector<2048x100xf32>
    %cst_9 = arith.constant dense<0.000000e+00> : vector<8x100xf32>
    %10 = tpu.matmul %8, %9, %cst_9 {dimension_numbers = #tpu.dot_dimension_numbers<[1], [0], [0], [1], [0, 0, 1, 1], [], []>} : vector<8x2048xf32>, vector<2048x100xf32>, vector<8x100xf32> -> vector<8x100xf32>
    %c0_10 = arith.constant 0 : index
    %c0_11 = arith.constant 0 : index
    %11 = vector.load %arg5[%c0_10, %c0_11] : memref<1x100xf32, #tpu.memory_space<vmem>>, vector<1x100xf32>
    %12 = vector.broadcast %11 : vector<1x100xf32> to vector<8x100xf32>
    %13 = arith.addf %10, %12 : vector<8x100xf32>
    %14 = arith.addf %1, %13 : vector<8x100xf32>
    %c0_12 = arith.constant 0 : index
    %c0_13 = arith.constant 0 : index
    %15 = vector.load %arg6[%c0_12, %c0_13] : memref<1x100xf32, #tpu.memory_space<vmem>>, vector<1x100xf32>
    %c0_14 = arith.constant 0 : index
    %c0_15 = arith.constant 0 : index
    %16 = vector.load %arg7[%c0_14, %c0_15] : memref<1x100xf32, #tpu.memory_space<vmem>>, vector<1x100xf32>
    %cst_16 = arith.constant dense<0.000000e+00> : vector<8xf32>
    %17 = vector.multi_reduction <add>, %14, %cst_16 [1] : vector<8x100xf32> to vector<8xf32>
    %18 = vector.shape_cast %17 : vector<8xf32> to vector<8x1xf32>
    %cst_17 = arith.constant 1.000000e+02 : f32
    %19 = vector.broadcast %cst_17 : f32 to vector<8x1xf32>
    %20 = arith.divf %18, %19 : vector<8x1xf32>
    %21 = vector.broadcast %20 : vector<8x1xf32> to vector<8x100xf32>
    %22 = arith.subf %14, %21 : vector<8x100xf32>
    %23 = vector.broadcast %20 : vector<8x1xf32> to vector<8x100xf32>
    %24 = arith.subf %14, %23 : vector<8x100xf32>
    %25 = arith.mulf %22, %24 : vector<8x100xf32>
    %cst_18 = arith.constant dense<0.000000e+00> : vector<8xf32>
    %26 = vector.multi_reduction <add>, %25, %cst_18 [1] : vector<8x100xf32> to vector<8xf32>
    %27 = vector.shape_cast %26 : vector<8xf32> to vector<8x1xf32>
    %cst_19 = arith.constant 1.000000e+02 : f32
    %28 = vector.broadcast %cst_19 : f32 to vector<8x1xf32>
    %29 = arith.divf %27, %28 : vector<8x1xf32>
    %30 = vector.broadcast %20 : vector<8x1xf32> to vector<8x100xf32>
    %31 = arith.subf %14, %30 : vector<8x100xf32>
    %cst_20 = arith.constant 9.99999974E-6 : f32
    %32 = vector.broadcast %cst_20 : f32 to vector<8x1xf32>
    %33 = arith.addf %29, %32 : vector<8x1xf32>
    %34 = math.rsqrt %33 : vector<8x1xf32>
    %35 = vector.broadcast %34 : vector<8x1xf32> to vector<8x100xf32>
    %36 = arith.mulf %31, %35 : vector<8x100xf32>
    %37 = vector.broadcast %15 : vector<1x100xf32> to vector<8x100xf32>
    %38 = arith.mulf %36, %37 : vector<8x100xf32>
    %39 = vector.broadcast %16 : vector<1x100xf32> to vector<8x100xf32>
    %40 = arith.addf %38, %39 : vector<8x100xf32>
    %c0_21 = arith.constant 0 : index
    %c0_22 = arith.constant 0 : index
    %c0_23 = arith.constant 0 : index
    %41 = vector.load %arg8[%c0_21, %c0_22, %c0_23] : memref<1x8x100xf32, #tpu.memory_space<vmem>>, vector<1x8x100xf32>
    %42 = vector.shape_cast %41 : vector<1x8x100xf32> to vector<8x100xf32>
    %43 = vector.shape_cast %40 : vector<8x100xf32> to vector<1x8x100xf32>
    tpu.vector_store %arg8[%c0_21, %c0_22, %c0_23], %43 {strides = array<i32>} : memref<1x8x100xf32, #tpu.memory_space<vmem>>, vector<1x8x100xf32>,
    return
  }
  func.func @transform_0(%arg0: i32) -> (i32, i32, i32) {
    %c0_i32 = arith.constant 0 : i32
    %c0_i32_0 = arith.constant 0 : i32
    %c0_i32_1 = arith.constant 0 : i32
    return %arg0, %c0_i32, %c0_i32_0 : i32, i32, i32
  }
  func.func @transform_1(%arg0: i32) -> (i32, i32) {
    %c0_i32 = arith.constant 0 : i32
    %c0_i32_0 = arith.constant 0 : i32
    %c0_i32_1 = arith.constant 0 : i32
    return %c0_i32, %c0_i32_0 : i32, i32
  }
  func.func @transform_2(%arg0: i32) -> (i32, i32) {
    %c0_i32 = arith.constant 0 : i32
    %c0_i32_0 = arith.constant 0 : i32
    %c0_i32_1 = arith.constant 0 : i32
    return %c0_i32, %c0_i32_0 : i32, i32
  }
  func.func @transform_3(%arg0: i32) -> (i32, i32) {
    %c0_i32 = arith.constant 0 : i32
    %c0_i32_0 = arith.constant 0 : i32
    %c0_i32_1 = arith.constant 0 : i32
    return %c0_i32, %c0_i32_0 : i32, i32
  }
  func.func @transform_4(%arg0: i32) -> (i32, i32) {
    %c0_i32 = arith.constant 0 : i32
    %c0_i32_0 = arith.constant 0 : i32
    %c0_i32_1 = arith.constant 0 : i32
    return %c0_i32, %c0_i32_0 : i32, i32
  }
  func.func @transform_5(%arg0: i32) -> (i32, i32) {
    %c0_i32 = arith.constant 0 : i32
    %c0_i32_0 = arith.constant 0 : i32
    %c0_i32_1 = arith.constant 0 : i32
    return %c0_i32, %c0_i32_0 : i32, i32
  }
  func.func @transform_6(%arg0: i32) -> (i32, i32) {
    %c0_i32 = arith.constant 0 : i32
    %c0_i32_0 = arith.constant 0 : i32
    %c0_i32_1 = arith.constant 0 : i32
    return %c0_i32, %c0_i32_0 : i32, i32
  }
  func.func @transform_7(%arg0: i32) -> (i32, i32, i32) {
    %c0_i32 = arith.constant 0 : i32
    %c0_i32_0 = arith.constant 0 : i32
    %c0_i32_1 = arith.constant 0 : i32
    return %arg0, %c0_i32, %c0_i32_0 : i32, i32, i32
  }
}

module attributes {stable_mosaic.version = 11 : i64} {
  func.func @_head_kernel(%arg0: memref<16x100xf32, #tpu.memory_space<vmem>>, %arg1: memref<100x64xf32, #tpu.memory_space<vmem>>, %arg2: memref<1x64xf32, #tpu.memory_space<vmem>>, %arg3: memref<64x16xf32, #tpu.memory_space<vmem>>, %arg4: memref<1x16xf32, #tpu.memory_space<vmem>>, %arg5: memref<16x1xf32, #tpu.memory_space<vmem>>, %arg6: memref<1x1xf32, #tpu.memory_space<vmem>>, %arg7: memref<16x1xf32, #tpu.memory_space<vmem>>) attributes {dimension_semantics = [], scalar_prefetch = 0 : i64, scratch_operands = 0 : i64, tpu.core_type = #tpu.core_type<tc>} {
    %c0 = arith.constant 0 : index
    %c0_0 = arith.constant 0 : index
    %0 = vector.load %arg0[%c0, %c0_0] : memref<16x100xf32, #tpu.memory_space<vmem>>, vector<16x100xf32>
    %cst = arith.constant 5.000000e-01 : f32
    %1 = vector.broadcast %cst : f32 to vector<16x100xf32>
    %2 = arith.mulf %1, %0 : vector<16x100xf32>
    %cst_1 = arith.constant 4.471500e-02 : f32
    %3 = vector.broadcast %cst_1 : f32 to vector<16x100xf32>
    %4 = arith.mulf %3, %0 : vector<16x100xf32>
    %5 = arith.mulf %4, %0 : vector<16x100xf32>
    %6 = arith.mulf %5, %0 : vector<16x100xf32>
    %7 = arith.addf %0, %6 : vector<16x100xf32>
    %cst_2 = arith.constant 0.797884583 : f32
    %8 = vector.broadcast %cst_2 : f32 to vector<16x100xf32>
    %9 = arith.mulf %8, %7 : vector<16x100xf32>
    %10 = math.tanh %9 : vector<16x100xf32>
    %cst_3 = arith.constant 1.000000e+00 : f32
    %11 = vector.broadcast %cst_3 : f32 to vector<16x100xf32>
    %12 = arith.addf %11, %10 : vector<16x100xf32>
    %13 = arith.mulf %2, %12 : vector<16x100xf32>
    %c0_4 = arith.constant 0 : index
    %c0_5 = arith.constant 0 : index
    %14 = vector.load %arg1[%c0_4, %c0_5] : memref<100x64xf32, #tpu.memory_space<vmem>>, vector<100x64xf32>
    %cst_6 = arith.constant dense<0.000000e+00> : vector<16x64xf32>
    %15 = tpu.matmul %13, %14, %cst_6 {dimension_numbers = #tpu.dot_dimension_numbers<[1], [0], [0], [1], [0, 0, 1, 1], [], []>} : vector<16x100xf32>, vector<100x64xf32>, vector<16x64xf32> -> vector<16x64xf32>
    %c0_7 = arith.constant 0 : index
    %c0_8 = arith.constant 0 : index
    %16 = vector.load %arg2[%c0_7, %c0_8] : memref<1x64xf32, #tpu.memory_space<vmem>>, vector<1x64xf32>
    %17 = vector.broadcast %16 : vector<1x64xf32> to vector<16x64xf32>
    %18 = arith.addf %15, %17 : vector<16x64xf32>
    %cst_9 = arith.constant 5.000000e-01 : f32
    %19 = vector.broadcast %cst_9 : f32 to vector<16x64xf32>
    %20 = arith.mulf %19, %18 : vector<16x64xf32>
    %cst_10 = arith.constant 4.471500e-02 : f32
    %21 = vector.broadcast %cst_10 : f32 to vector<16x64xf32>
    %22 = arith.mulf %21, %18 : vector<16x64xf32>
    %23 = arith.mulf %22, %18 : vector<16x64xf32>
    %24 = arith.mulf %23, %18 : vector<16x64xf32>
    %25 = arith.addf %18, %24 : vector<16x64xf32>
    %cst_11 = arith.constant 0.797884583 : f32
    %26 = vector.broadcast %cst_11 : f32 to vector<16x64xf32>
    %27 = arith.mulf %26, %25 : vector<16x64xf32>
    %28 = math.tanh %27 : vector<16x64xf32>
    %cst_12 = arith.constant 1.000000e+00 : f32
    %29 = vector.broadcast %cst_12 : f32 to vector<16x64xf32>
    %30 = arith.addf %29, %28 : vector<16x64xf32>
    %31 = arith.mulf %20, %30 : vector<16x64xf32>
    %c0_13 = arith.constant 0 : index
    %c0_14 = arith.constant 0 : index
    %32 = vector.load %arg3[%c0_13, %c0_14] : memref<64x16xf32, #tpu.memory_space<vmem>>, vector<64x16xf32>
    %cst_15 = arith.constant dense<0.000000e+00> : vector<16x16xf32>
    %33 = tpu.matmul %31, %32, %cst_15 {dimension_numbers = #tpu.dot_dimension_numbers<[1], [0], [0], [1], [0, 0, 1, 1], [], []>} : vector<16x64xf32>, vector<64x16xf32>, vector<16x16xf32> -> vector<16x16xf32>
    %c0_16 = arith.constant 0 : index
    %c0_17 = arith.constant 0 : index
    %34 = vector.load %arg4[%c0_16, %c0_17] : memref<1x16xf32, #tpu.memory_space<vmem>>, vector<1x16xf32>
    %35 = vector.broadcast %34 : vector<1x16xf32> to vector<16x16xf32>
    %36 = arith.addf %33, %35 : vector<16x16xf32>
    %cst_18 = arith.constant 5.000000e-01 : f32
    %37 = vector.broadcast %cst_18 : f32 to vector<16x16xf32>
    %38 = arith.mulf %37, %36 : vector<16x16xf32>
    %cst_19 = arith.constant 4.471500e-02 : f32
    %39 = vector.broadcast %cst_19 : f32 to vector<16x16xf32>
    %40 = arith.mulf %39, %36 : vector<16x16xf32>
    %41 = arith.mulf %40, %36 : vector<16x16xf32>
    %42 = arith.mulf %41, %36 : vector<16x16xf32>
    %43 = arith.addf %36, %42 : vector<16x16xf32>
    %cst_20 = arith.constant 0.797884583 : f32
    %44 = vector.broadcast %cst_20 : f32 to vector<16x16xf32>
    %45 = arith.mulf %44, %43 : vector<16x16xf32>
    %46 = math.tanh %45 : vector<16x16xf32>
    %cst_21 = arith.constant 1.000000e+00 : f32
    %47 = vector.broadcast %cst_21 : f32 to vector<16x16xf32>
    %48 = arith.addf %47, %46 : vector<16x16xf32>
    %49 = arith.mulf %38, %48 : vector<16x16xf32>
    %c0_22 = arith.constant 0 : index
    %c0_23 = arith.constant 0 : index
    %50 = vector.load %arg5[%c0_22, %c0_23] : memref<16x1xf32, #tpu.memory_space<vmem>>, vector<16x1xf32>
    %cst_24 = arith.constant dense<0.000000e+00> : vector<16x1xf32>
    %51 = tpu.matmul %49, %50, %cst_24 {dimension_numbers = #tpu.dot_dimension_numbers<[1], [0], [0], [1], [0, 0, 1, 1], [], []>} : vector<16x16xf32>, vector<16x1xf32>, vector<16x1xf32> -> vector<16x1xf32>
    %c0_25 = arith.constant 0 : index
    %c0_26 = arith.constant 0 : index
    %52 = vector.load %arg6[%c0_25, %c0_26] : memref<1x1xf32, #tpu.memory_space<vmem>>, vector<1x1xf32>
    %53 = vector.broadcast %52 : vector<1x1xf32> to vector<16x1xf32>
    %54 = arith.addf %51, %53 : vector<16x1xf32>
    %cst_27 = arith.constant 0.000000e+00 : f32
    %55 = vector.broadcast %cst_27 : f32 to vector<16x1xf32>
    %56 = arith.subf %55, %54 : vector<16x1xf32>
    %57 = math.exp %56 : vector<16x1xf32>
    %cst_28 = arith.constant 1.000000e+00 : f32
    %58 = vector.broadcast %cst_28 : f32 to vector<16x1xf32>
    %59 = arith.addf %58, %57 : vector<16x1xf32>
    %cst_29 = arith.constant 1.000000e+00 : f32
    %60 = vector.broadcast %cst_29 : f32 to vector<16x1xf32>
    %61 = arith.divf %60, %59 : vector<16x1xf32>
    %c0_30 = arith.constant 0 : index
    %c0_31 = arith.constant 0 : index
    %62 = vector.load %arg7[%c0_30, %c0_31] : memref<16x1xf32, #tpu.memory_space<vmem>>, vector<16x1xf32>
    tpu.vector_store %arg7[%c0_30, %c0_31], %61 {strides = array<i32>} : memref<16x1xf32, #tpu.memory_space<vmem>>, vector<16x1xf32>,
    return
  }
}

</mosaic_0001>

<bundles_post_ra>
// kernel: visual_discriminator_forward.3
= control target key start
LH: loop header
LB: loop body
LE: loop exit
PB: predicated region body
PF: predicated region fallthrough
CT: control target
= control target key end

     0   :  { %8 = vsyncpa [#allocation3], 0  ;;  %s232_s15 = smov [#allocation2]   ;;  %s478_s0 = inlined_call_operand.vmem [shape: f32[16,512], index: 0, kind: input, shape index: {}]   ;;  %s479_s1 = inlined_call_operand.vmem [shape: f32[512,100], index: 1, kind: input, shape index: {}]   ;;  %s480_s2 = inlined_call_operand.hbm [shape: f32[1,100], index: 2, kind: input, shape index: {}]   ;;  %s481_s3 = inlined_call_operand.vmem [shape: f32[16,100], index: 3, kind: output, shape index: {}]  }
   0x1   :  { %s18_s14 = sshll.u32 %s480_s2, 4  ;;  %s20_s16 = sshll.u32 %s232_s15, 4  ;;  %s19_s14 = int_to_ptr.hbm [resolvable:$true] %s18_s14  ;;  %s21_s16 = int_to_ptr.vmem [resolvable:$true] %s20_s16 }
   0x2   :  { %23 = dma.hbm_to_vmem [thread:$0]  %s19_s14, 16, %s21_s16, [#allocation3]  }
   0x3   :  { %230 = dma.done.wait [#allocation3], 16  }
   0x4   :  { %231 = vsyncadd [#allocation3], 4294967280  ;;  %v83_v0 = vld [vmem:[%s479_s1 + $0x178] sm:$0xff]  ;;  %v82_v2 = vld [vmem:[%s479_s1 + $0x170] sm:$0xff]  ;;  %vm196_vm0 = vcmask 818176  }
   0x5   :  { %v51_v1 = vld [vmem:[%s479_s1 + $0x78] sm:$0xff]  ;;  %150 = vmatpush.msra.mxu2 %v83_v0  ;;  %v50_v4 = vld [vmem:[%s479_s1 + $0x70] sm:$0xff]  ;;  %v81_v6 = vld [vmem:[%s479_s1 + $0x168] sm:$0xff] }
   0x6   :  { %104 = vmatpush.msra.mxu0 %v51_v1  ;;  %v99_v3 = vld [vmem:[%s479_s1 + $0x1f8] sm:$0xff]  ;;  %v98_v7 = vld [vmem:[%s479_s1 + $0x1f0] sm:$0xff]  ;;  %v49_v8 = vld [vmem:[%s479_s1 + $0x68] sm:$0xff] }
   0x7   :  { %v67_v5 = vld [vmem:[%s479_s1 + $0xf8] sm:$0xff]  ;;  %173 = vmatpush.msra.mxu3 %v99_v3  ;;  %151 = vmatpush.msra.mxu2 %v82_v2  ;;  %v66_v9 = vld [vmem:[%s479_s1 + $0xf0] sm:$0xff]  ;;  %v97_v10 = vld [vmem:[%s479_s1 + $0x1e8] sm:$0xff] }
   0x8   :  { %127 = vmatpush.msra.mxu1 %v67_v5  ;;  %105 = vmatpush.msra.mxu0 %v50_v4  ;;  %v80_v11 = vld [vmem:[%s479_s1 + $0x160] sm:$0xff]  ;;  %v65_v13 = vld [vmem:[%s479_s1 + $0xe8] sm:$0xff]  ;;  %v79_v16 = vld [vmem:[%s479_s1 + $0x158] sm:$0xff] }
   0x9   :  { %174 = vmatpush.msra.mxu3 %v98_v7  ;;  %v48_v12 = vld [vmem:[%s479_s1 + $0x60] sm:$0xff]  ;;  %152 = vmatpush.msra.mxu2 %v81_v6  ;;  %v47_v17 = vld [vmem:[%s479_s1 + $0x58] sm:$0xff]  ;;  %v78_v20 = vld [vmem:[%s479_s1 + $0x150] sm:$0xff] }
   0xa   :  { %128 = vmatpush.msra.mxu1 %v66_v9  ;;  %106 = vmatpush.msra.mxu0 %v49_v8  ;;  %v96_v14 = vld [vmem:[%s479_s1 + $0x1e0] sm:$0xff]  ;;  %v95_v18 = vld [vmem:[%s479_s1 + $0x1d8] sm:$0xff]  ;;  %v46_v21 = vld [vmem:[%s479_s1 + $0x50] sm:$0xff] }
   0xb   :  { %v64_v15 = vld [vmem:[%s479_s1 + $0xe0] sm:$0xff]  ;;  %175 = vmatpush.msra.mxu3 %v97_v10  ;;  %153 = vmatpush.msra.mxu2 %v80_v11  ;;  %v63_v19 = vld [vmem:[%s479_s1 + $0xd8] sm:$0xff]  ;;  %v94_v22 = vld [vmem:[%s479_s1 + $0x1d0] sm:$0xff] }
   0xc   :  { %129 = vmatpush.msra.mxu1 %v65_v13  ;;  %107 = vmatpush.msra.mxu0 %v48_v12  ;;  %v62_v23 = vld [vmem:[%s479_s1 + $0xd0] sm:$0xff]  ;;  %v77_v24 = vld [vmem:[%s479_s1 + $0x148] sm:$0xff]  ;;  %v76_v28 = vld [vmem:[%s479_s1 + $0x140] sm:$0xff] }
   0xd   :  { %176 = vmatpush.msra.mxu3 %v96_v14  ;;  %154 = vmatpush.msra.mxu2 %v79_v16  ;;  %v45_v25 = vld [vmem:[%s479_s1 + $0x48] sm:$0xff]  ;;  %v44_v29 = vld [vmem:[%s479_s1 + $0x40] sm:$0xff]  ;;  %v75_v32 = vld [vmem:[%s479_s1 + $0x138] sm:$0xff] }
   0xe   :  { %130 = vmatpush.msra.mxu1 %v64_v15  ;;  %108 = vmatpush.msra.mxu0 %v47_v17  ;;  %v93_v26 = vld [vmem:[%s479_s1 + $0x1c8] sm:$0xff]  ;;  %v92_v30 = vld [vmem:[%s479_s1 + $0x1c0] sm:$0xff]  ;;  %v43_v33 = vld [vmem:[%s479_s1 + $0x38] sm:$0xff] }
   0xf   :  { %177 = vmatpush.msra.mxu3 %v95_v18  ;;  %155 = vmatpush.msra.mxu2 %v78_v20  ;;  %v61_v27 = vld [vmem:[%s479_s1 + $0xc8] sm:$0xff]  ;;  %v60_v31 = vld [vmem:[%s479_s1 + $0xc0] sm:$0xff]  ;;  %v91_v34 = vld [vmem:[%s479_s1 + $0x1b8] sm:$0xff] }
  0x10   :  { %131 = vmatpush.msra.mxu1 %v63_v19  ;;  %109 = vmatpush.msra.mxu0 %v46_v21  ;;  %v59_v35 = vld [vmem:[%s479_s1 + $0xb8] sm:$0xff]  ;;  %v74_v36 = vld [vmem:[%s479_s1 + $0x130] sm:$0xff]  ;;  %v73_v40 = vld [vmem:[%s479_s1 + $0x128] sm:$0xff] }
  0x11   :  { %178 = vmatpush.msra.mxu3 %v94_v22  ;;  %156 = vmatpush.msra.mxu2 %v77_v24  ;;  %v42_v37 = vld [vmem:[%s479_s1 + $0x30] sm:$0xff]  ;;  %v41_v41 = vld [vmem:[%s479_s1 + $0x28] sm:$0xff]  ;;  %v72_v44 = vld [vmem:[%s479_s1 + $0x120] sm:$0xff] }
  0x12   :  { %132 = vmatpush.msra.mxu1 %v62_v23  ;;  %110 = vmatpush.msra.mxu0 %v45_v25  ;;  %v90_v38 = vld [vmem:[%s479_s1 + $0x1b0] sm:$0xff]  ;;  %v89_v42 = vld [vmem:[%s479_s1 + $0x1a8] sm:$0xff]  ;;  %v40_v45 = vld [vmem:[%s479_s1 + $0x20] sm:$0xff] }
  0x13   :  { %179 = vmatpush.msra.mxu3 %v93_v26  ;;  %157 = vmatpush.msra.mxu2 %v76_v28  ;;  %v58_v39 = vld [vmem:[%s479_s1 + $0xb0] sm:$0xff]  ;;  %v57_v43 = vld [vmem:[%s479_s1 + $0xa8] sm:$0xff]  ;;  %v88_v46 = vld [vmem:[%s479_s1 + $0x1a0] sm:$0xff] }
  0x14   :  { %133 = vmatpush.msra.mxu1 %v61_v27  ;;  %111 = vmatpush.msra.mxu0 %v44_v29  ;;  %v56_v47 = vld [vmem:[%s479_s1 + $0xa0] sm:$0xff]  ;;  %v71_v48 = vld [vmem:[%s479_s1 + $0x118] sm:$0xff]  ;;  %v70_v52 = vld [vmem:[%s479_s1 + $0x110] sm:$0xff] }
  0x15   :  { %180 = vmatpush.msra.mxu3 %v92_v30  ;;  %158 = vmatpush.msra.mxu2 %v75_v32  ;;  %v39_v49 = vld [vmem:[%s479_s1 + $0x18] sm:$0xff]  ;;  %v38_v53 = vld [vmem:[%s479_s1 + $0x10] sm:$0xff]  ;;  %v69_v56 = vld [vmem:[%s479_s1 + $0x108] sm:$0xff] }
  0x16   :  { %134 = vmatpush.msra.mxu1 %v60_v31  ;;  %112 = vmatpush.msra.mxu0 %v43_v33  ;;  %v87_v50 = vld [vmem:[%s479_s1 + $0x198] sm:$0xff]  ;;  %v86_v54 = vld [vmem:[%s479_s1 + $0x190] sm:$0xff]  ;;  %v37_v57 = vld [vmem:[%s479_s1 + $0x8] sm:$0xff] }
  0x17   :  { %181 = vmatpush.msra.mxu3 %v91_v34  ;;  %159 = vmatpush.msra.mxu2 %v74_v36  ;;  %v55_v51 = vld [vmem:[%s479_s1 + $0x98] sm:$0xff]  ;;  %v54_v55 = vld [vmem:[%s479_s1 + $0x90] sm:$0xff]  ;;  %v85_v58 = vld [vmem:[%s479_s1 + $0x188] sm:$0xff] }
  0x18   :  { %135 = vmatpush.msra.mxu1 %v59_v35  ;;  %113 = vmatpush.msra.mxu0 %v42_v37  ;;  %v53_v59 = vld [vmem:[%s479_s1 + $0x88] sm:$0xff]  ;;  %v68_v60 = vld [vmem:[%s479_s1 + $0x100] sm:$0xff]  ;;  %v30_v62 = vld [vmem:[%s478_s0 + $0x10] sm:$0xff] }
  0x19   :  { %182 = vmatpush.msra.mxu3 %v90_v38  ;;  %160 = vmatpush.msra.mxu2 %v73_v40  ;;  %v36_v61 = vld [vmem:[%s479_s1] sm:$0xff]  ;;  %v31_v1 = vld [vmem:[%s478_s0 + $0x18] sm:$0xff]  ;;  %v29_v3 = vld [vmem:[%s478_s0 + $0x8] sm:$0xff] }
  0x1a   :  { %136 = vmatpush.msra.mxu1 %v58_v39  ;;  %114 = vmatpush.msra.mxu0 %v41_v41  ;;  %v84_v63 = vld [vmem:[%s479_s1 + $0x180] sm:$0xff]  ;;  %v34_v4 = vld [vmem:[%s478_s0 + $0x30] sm:$0xff]  ;;  %v35_v6 = vld [vmem:[%s478_s0 + $0x38] sm:$0xff] }
  0x1b   :  { %183 = vmatpush.msra.mxu3 %v89_v42  ;;  %161 = vmatpush.msra.mxu2 %v72_v44  ;;  %v28_v0 = vld [vmem:[%s478_s0] sm:$0xff]  ;;  %v33_v7 = vld [vmem:[%s478_s0 + $0x28] sm:$0xff] }
  0x1c   :  { %137 = vmatpush.msra.mxu1 %v57_v43  ;;  %115 = vmatpush.msra.mxu0 %v40_v45  ;;  %v52_v2 = vld [vmem:[%s479_s1 + $0x80] sm:$0xff] }
  0x1d   :  { %184 = vmatpush.msra.mxu3 %v88_v46  ;;  %162 = vmatpush.msra.mxu2 %v71_v48  ;;  %v32_v5 = vld [vmem:[%s478_s0 + $0x20] sm:$0xff] }
  0x1e   :  { %138 = vmatpush.msra.mxu1 %v56_v47  ;;  %116 = vmatpush.msra.mxu0 %v39_v49  ;;  %v205_v8 = vld [vmem:[#allocation2] ss:$0 sm:$0xff] }
  0x1f   :  { %185 = vmatpush.msra.mxu3 %v87_v50  ;;  %163 = vmatpush.msra.mxu2 %v70_v52 }
  0x20   :  { %139 = vmatpush.msra.mxu1 %v55_v51  ;;  %117 = vmatpush.msra.mxu0 %v38_v53 }
  0x21   :  { %186 = vmatpush.msra.mxu3 %v86_v54  ;;  %164 = vmatpush.msra.mxu2 %v69_v56 }
  0x22   :  { %140 = vmatpush.msra.mxu1 %v54_v55  ;;  %118 = vmatpush.msra.mxu0 %v37_v57 }
  0x23   :  { %187 = vmatpush.msra.mxu3 %v85_v58  ;;  %165 = vmatpush.msra.mxu2 %v68_v60 }
  0x24   :  { %141 = vmatpush.msra.mxu1 %v53_v59  ;;  %119 = vmatpush.msra.mxu0 %v36_v61 }
  0x25   :  { %166 = vmatmul.f32.vlgmr.msra.gmra.mxu2 %v30_v62  ;;  %188 = vmatpush.msra.mxu3 %v84_v63 }
  0x26   :  { %120 = vmatmul.f32.vlgmr.msra.gmra.mxu0 %v28_v0  ;;  %189 = vmatmul.f32.vlgmr.msra.gmra.mxu3 %v31_v1 }
  0x27   :  { %142 = vmatpush.msra.mxu1 %v52_v2 }
  0x28   :  { %143 = vmatmul.f32.vlgmr.msra.gmra.mxu1 %v29_v3 }
  0x2d   :  { %169 = vmatmul.f32.gmra.mxu2 %v34_v4 }
  0x2e   :  { %123 = vmatmul.f32.gmra.mxu0 %v32_v5  ;;  %192 = vmatmul.f32.gmra.mxu3 %v35_v6 }
  0x30   :  { %146 = vmatmul.f32.gmra.mxu1 %v33_v7 }
  0xa3   :  { %v121_v9 = vpop.f32.mrf.mxu0 }
  0xa4   :  { %v122_v10 = vadd.f32 %v205_v8, %v121_v9 }
  0xa5   :  { %v144_v11 = vpop.f32.mrf.mxu1 }
  0xa6   :  { %v145_v12 = vadd.f32 %v144_v11, %v122_v10 }
  0xa8   :  { %v167_v13 = vpop.f32.mrf.mxu2 }
  0xa9   :  { %v168_v14 = vadd.f32 %v167_v13, %v145_v12  ;;  %v190_v15 = vpop.f32.mrf.mxu3 }
  0xab   :  { %v191_v16 = vadd.f32 %v190_v15, %v168_v14  ;;  %v124_v17 = vpop.f32.mrf.mxu0 }
  0xac   :  { %v125_v18 = vadd.f32 %v205_v8, %v124_v17 }
  0xad   :  { %197 = vst.msk [vmem:[%s481_s3] sm:$0xff] %vm196_vm0, %v191_v16  ;;  %v147_v19 = vpop.f32.mrf.mxu1 }
  0xae   :  { %v148_v20 = vadd.f32 %v147_v19, %v125_v18 }
  0xb0   :  { %v170_v21 = vpop.f32.mrf.mxu2 }
  0xb1   :  { %v171_v22 = vadd.f32 %v170_v21, %v148_v20  ;;  %v193_v23 = vpop.f32.mrf.mxu3 }
  0xb3   :  { %v194_v24 = vadd.f32 %v193_v23, %v171_v22 }
  0xb5   :  { %198 = vst.msk [vmem:[%s481_s3 + $0x8] sm:$0xff] %vm196_vm0, %v194_v24 }
  0xb6   :  { %203 = vsyncpa [#allocation3], 1 }

// kernel: visual_discriminator_forward.4
= control target key start
LH: loop header
LB: loop body
LE: loop exit
PB: predicated region body
PF: predicated region fallthrough
CT: control target
= control target key end

     0   :  { %vm16_vm0 = vcmask 818176   ;;  %s53_s0 = inlined_call_operand.vmem [shape: f32[2,8,100], index: 0, kind: input, shape index: {}]   ;;  %s54_s1 = inlined_call_operand.vmem [shape: f32[8,100], index: 1, kind: input, shape index: {}]   ;;  %s55_s2 = inlined_call_operand.vmem [shape: f32[2,8,100], index: 2, kind: output, shape index: {}]  }
   0x1   :  { %v11_v0 = vld [vmem:[%s53_s0] sm:$0xff]  ;;  %v12_v2 = vld [vmem:[%s53_s0 + $0x8] sm:$0xff] }
   0x2   :  { %v13_v1 = vld [vmem:[%s54_s1] sm:$0xff] }
   0x3   :  { %v14_v3 = vadd.f32 %v13_v1, %v11_v0  ;;  %v15_v4 = vadd.f32 %v13_v1, %v12_v2 }
   0x5   :  { %17 = vst.msk [vmem:[%s55_s2] sm:$0xff] %vm16_vm0, %v14_v3 }
   0x6   :  { %18 = vst.msk [vmem:[%s55_s2 + $0x8] sm:$0xff] %vm16_vm0, %v15_v4 }

// kernel: closed_call.7
= control target key start
LH: loop header
LB: loop body
LE: loop exit
PB: predicated region body
PF: predicated region fallthrough
CT: control target
= control target key end

     0   :  { %s1701_s24 = smov 0   ;;  %s2050_s0 = inlined_call_operand.vmem [shape: f32[2,8,100], index: 0, kind: input, shape index: {}]   ;;  %s2051_s1 = inlined_call_operand.vmem [shape: f32[100,300], index: 1, kind: input, shape index: {}]   ;;  %s2052_s2 = inlined_call_operand.vmem [shape: f32[1,300], index: 2, kind: input, shape index: {}]   ;;  %s2053_s3 = inlined_call_operand.vmem [shape: f32[100,100], index: 3, kind: input, shape index: {}]   ;;  %s2054_s4 = inlined_call_operand.vmem [shape: f32[1,100], index: 4, kind: input, shape index: {}]   ;;  %s2055_s5 = inlined_call_operand.vmem [shape: f32[1,100], index: 5, kind: input, shape index: {}]   ;;  %s2056_s6 = inlined_call_operand.vmem [shape: f32[1,100], index: 6, kind: input, shape index: {}]   ;;  %s2057_s7 = inlined_call_operand.vmem [shape: f32[2,8,100], index: 7, kind: output, shape index: {}]  }
   0x1 LB: > { %s1468_s25 = sadd.s32 4294967295, %s1629_s24   ;;  %p1472_p0 = scmp.ge.s32.totalorder %s1629_s24, 1  ;;  %s1629_s24 = sphi %s1701_s24, %s17_s24  }
   0x2   : > { %p236_p1 = scmp.lt.s32.totalorder %s1629_s24, 3 }
   0x4   : > { %p237_p2 = pnand %p1472_p0, %p236_p1 }
   0x5   : > { %p266_p3 = scmp.lt.s32.totalorder (!%p237_p2), %s1468_s25, 1  ;;  %s1631_s20 = smov (!%p237_p2), 18  }
   0x6   : > { %240 = sbr.rel (%p237_p2) target bundleno = 3314 (0xcf2), region = 48  ;;  %s1632_s21 = smov (!%p237_p2), 28  }
   0x7   : > { %s1633_s22 = smov (!%p237_p2), 118   ;;  %s1634_s27 = smov (!%p237_p2), 8  }
   0x8   : > { %s1635_s28 = smov (!%p237_p2), 108   ;;  %s1637_s11 = smov (!%p237_p2), 36  }
   0x9   : > { %s1638_s12 = smov (!%p237_p2), 78   ;;  %s1639_s13 = smov (!%p237_p2), 56  }
   0xa   : > { %s1640_s14 = smov (!%p237_p2), 126   ;;  %s1644_s23 = smov (!%p237_p2), 88  }
   0xb   : > { %v311_v0 = vld [vmem:[%s2051_s1 + $0x120] sm:$0xf]  ;;  %vm326_vm0 = vcmask 1043456   ;;  %v308_v1 = vld [vmem:[%s2051_s1 + $0x108] sm:$0xff]  ;;  %v305_v2 = vld [vmem:[%s2051_s1 + $0xf0] sm:$0xff]  ;;  %s2059_s25 = smov (!%p266_p3, %s1468_s25), 1 }
   0xc   : > { %1475 = vmatpush.msk.msra.mxu0 %vm326_vm0, %v311_v0  ;;  %v302_v3 = vld [vmem:[%s2051_s1 + $0xd8] sm:$0xff]  ;;  %v312_v4 = vld [vmem:[%s2051_s1 + $0x128] sm:$0xf]  ;;  %v309_v5 = vld [vmem:[%s2051_s1 + $0x110] sm:$0xff]  ;;  %s1473_s18 = sshll.u32 %s2059_s25, 3  ;;  %vm322_vm1 = vcmask 818176  }
   0xd   : > { %1477 = vmatpush.msk.msra.mxu1 %vm326_vm0, %v312_v4  ;;  %v299_v6 = vld [vmem:[%s2051_s1 + $0xc0] sm:$0xff]  ;;  %v306_v7 = vld [vmem:[%s2051_s1 + $0xf8] sm:$0xff]  ;;  %v296_v8 = vld [vmem:[%s2051_s1 + $0xa8] sm:$0xff]  ;;  %s269_s29 = scalar_lea.vmem %s2050_s0, %s1473_s18  ;;  %vm413_vm2 = vcmask 80896   ;;  %vm439_vm3 = vcmask 64512   ;;  %vm553_vm4 = vcmask 1041408   ;;  %s273_s8 = scalar_lea.vmem %s2057_s7, %s1473_s18 }
   0xe   : > { %340 = vmatpush.msra.mxu0 %v308_v1  ;;  %v303_v9 = vld [vmem:[%s2051_s1 + $0xe0] sm:$0xff]  ;;  %v293_v10 = vld [vmem:[%s2051_s1 + $0x90] sm:$0xff]  ;;  %v300_v11 = vld [vmem:[%s2051_s1 + $0xc8] sm:$0xff]  ;;  %s1645_s30 = smov 26   ;;  %vm545_vm5 = vcmask 1045504   ;;  %s1646_s10 = smov 16  }
   0xf   : > { %360 = vmatpush.msra.mxu1 %v309_v5  ;;  %v290_v12 = vld [vmem:[%s2051_s1 + $0x78] sm:$0xff]  ;;  %v297_v13 = vld [vmem:[%s2051_s1 + $0xb0] sm:$0xff]  ;;  %v287_v14 = vld [vmem:[%s2051_s1 + $0x60] sm:$0xff]  ;;  %vm932_vm6 = vcmask 48128   ;;  %s1653_s26 = smov 48  }
  0x10   : > { %341 = vmatpush.msra.mxu0 %v305_v2  ;;  %v294_v15 = vld [vmem:[%s2051_s1 + $0x98] sm:$0xff]  ;;  %v284_v16 = vld [vmem:[%s2051_s1 + $0x48] sm:$0xff]  ;;  %v291_v17 = vld [vmem:[%s2051_s1 + $0x80] sm:$0xff] }
  0x11   : > { %361 = vmatpush.msra.mxu1 %v306_v7  ;;  %v281_v18 = vld [vmem:[%s2051_s1 + $0x30] sm:$0xff]  ;;  %v288_v19 = vld [vmem:[%s2051_s1 + $0x68] sm:$0xff]  ;;  %v278_v20 = vld [vmem:[%s2051_s1 + $0x18] sm:$0xff] }
  0x12   : > { %342 = vmatpush.msra.mxu0 %v302_v3  ;;  %v285_v21 = vld [vmem:[%s2051_s1 + $0x50] sm:$0xff]  ;;  %v275_v22 = vld [vmem:[%s2051_s1] sm:$0xff]  ;;  %v282_v23 = vld [vmem:[%s2051_s1 + $0x38] sm:$0xff] }
  0x13   : > { %362 = vmatpush.msra.mxu1 %v303_v9  ;;  %v1795_v24 = vld [vmem:[%s269_s29] sm:$0xff]  ;;  %v276_v26 = vld [vmem:[%s2051_s1 + $0x8] sm:$0xff]  ;;  %v313_v32 = vld [vmem:[%s2051_s1 + $0x130] sm:$0xf]  ;;  %s1636_s29 = smov 98  }
  0x14   : > { %343 = vmatpush.msra.mxu0 %v299_v6  ;;  %v279_v25 = vld [vmem:[%s2051_s1 + $0x20] sm:$0xff]  ;;  %1479 = vmatpush.msk.msra.mxu2 %vm326_vm0, %v313_v32  ;;  %v310_v36 = vld [vmem:[%s2051_s1 + $0x118] sm:$0xff]  ;;  %v304_v38 = vld [vmem:[%s2051_s1 + $0xe8] sm:$0xff] }
  0x15   : > { %363 = vmatpush.msra.mxu1 %v300_v11  ;;  %v1810_v27 = vld [vmem:[%s2052_s2] sm:$0x7]  ;;  %v301_v39 = vld [vmem:[%s2051_s1 + $0xd0] sm:$0xff]  ;;  %v298_v40 = vld [vmem:[%s2051_s1 + $0xb8] sm:$0xff] }
  0x16   : > { %344 = vmatpush.msra.mxu0 %v296_v8  ;;  %v316_v28 = vperm.slane %v1810_v27, 0  ;;  %v317_v33 = vperm.slane %v1810_v27, 1  ;;  %v307_v37 = vld [vmem:[%s2051_s1 + $0x100] sm:$0xff]  ;;  %380 = vmatpush.msra.mxu2 %v310_v36  ;;  %v292_v42 = vld [vmem:[%s2051_s1 + $0x88] sm:$0xff]  ;;  %v289_v43 = vld [vmem:[%s2051_s1 + $0x70] sm:$0xff] }
  0x17   : > { %364 = vmatpush.msra.mxu1 %v297_v13  ;;  %v295_v41 = vld [vmem:[%s2051_s1 + $0xa0] sm:$0xff]  ;;  %v286_v44 = vld [vmem:[%s2051_s1 + $0x58] sm:$0xff]  ;;  %v280_v46 = vld [vmem:[%s2051_s1 + $0x28] sm:$0xff] }
  0x18   : > { %345 = vmatpush.msra.mxu0 %v293_v10  ;;  %381 = vmatpush.msra.mxu2 %v307_v37  ;;  %v283_v45 = vld [vmem:[%s2051_s1 + $0x40] sm:$0xff]  ;;  %v277_v47 = vld [vmem:[%s2051_s1 + $0x10] sm:$0xff]  ;;  %v1882_v1 = vld [vmem:[%s2053_s3 + $0x8] sm:$0xff] }
  0x19   : > { %365 = vmatpush.msra.mxu1 %v294_v15  ;;  %v396_v2 = vld [vmem:[%s2053_s3] sm:$0xff]  ;;  %v399_v37 = vld [vmem:[%s2053_s3 + $0x18] sm:$0xff] }
  0x1a   : > { %346 = vmatpush.msra.mxu0 %v290_v12  ;;  %382 = vmatpush.msra.mxu2 %v304_v38  ;;  %v400_v36 = vld [vmem:[%s2053_s3 + $0x20] sm:$0xff] }
  0x1b   : > { %366 = vmatpush.msra.mxu1 %v291_v17 }
  0x1c   : > { %347 = vmatpush.msra.mxu0 %v287_v14  ;;  %383 = vmatpush.msra.mxu2 %v301_v39  ;;  %v767_v39 = vrot.slane %v400_v36, 6 }
  0x1d   : > { %367 = vmatpush.msra.mxu1 %v288_v19 }
  0x1e   : > { %348 = vmatpush.msra.mxu0 %v284_v16  ;;  %384 = vmatpush.msra.mxu2 %v298_v40  ;;  %v766_v40 = vrot.slane %v399_v37, 6 }
  0x1f   : > { %368 = vmatpush.msra.mxu1 %v285_v21 }
  0x20   : > { %349 = vmatpush.msra.mxu0 %v281_v18  ;;  %385 = vmatpush.msra.mxu2 %v295_v41 }
  0x21   : > { %369 = vmatpush.msra.mxu1 %v282_v23 }
  0x22   : > { %350 = vmatpush.msra.mxu0 %v278_v20  ;;  %386 = vmatpush.msra.mxu2 %v292_v42 }
  0x23   : > { %370 = vmatpush.msra.mxu1 %v279_v25 }
  0x24   : > { %351 = vmatpush.msra.mxu0 %v275_v22  ;;  %387 = vmatpush.msra.mxu2 %v289_v43 }
  0x25   : > { %1476 = vmatmul.msk.f32.vlgmr.msra.gmra.mxu0 %vm322_vm1, %v1795_v24  ;;  %371 = vmatpush.msra.mxu1 %v276_v26 }
  0x26   : > { %1478 = vmatmul.msk.f32.vlgmr.msra.gmra.mxu1 %vm322_vm1, %v1795_v24  ;;  %388 = vmatpush.msra.mxu2 %v286_v44  ;;  %v768_v44 = vsel %vm553_vm4, %v766_v40, %v767_v39 }
  0x27   : > { %1489 = vmatpush.msk.msrb.mxu1 %vm553_vm4, %v1882_v1 }
  0x28   : > { %389 = vmatpush.msra.mxu2 %v283_v45 }
  0x29   : > { %596 = vmatpush.msrb.mxu1 %v396_v2 }
  0x2a   : > { %390 = vmatpush.msra.mxu2 %v280_v46 }
  0x2c   : > { %391 = vmatpush.msra.mxu2 %v277_v47 }
  0x2d   : > { %1480 = vmatmul.msk.f32.vlgmr.msra.gmra.mxu2 %vm322_vm1, %v1795_v24 }
  0xa2   : > { %v353_v29 = vpop.f32.mrf.mxu0 }
  0xa3   : > { %v354_v30 = vadd.f32 %v353_v29, %v316_v28  ;;  %v373_v34 = vpop.f32.mrf.mxu1 }
  0xa4   : > { %v1821_v35 = vadd.f32 %v373_v34, %v317_v33 }
  0xa5   : > { %480 = vrot.lane.b32.xlu2 %v354_v30, %s1631_s20  ;;  %411 = vrot.lane.b32.xlu0 %v354_v30, %s1632_s21  ;;  %v1813_v31 = vmul.f32 0.31622776, %v354_v30  ;;  %s1641_s20 = smov 46   ;;  %s1642_s21 = smov 116  }
  0xad   : > { %478 = vrot.lane.b32.xlu2 %v1813_v31, %s1633_s22  ;;  %s1643_s22 = smov 106  }
  0xb0   : > { %v1870_v55 = vpop.f32.mrf.mxu2 }
  0xb5   : > { %603 = vrot.lane.b32.xlu2 %v354_v30, %s1634_s27 }
  0xbd   : > { %605 = vrot.lane.b32.xlu2 %v1821_v35, %s1634_s27  ;;  %s1654_s27 = smov 114  }
  0xc5   : > { %601 = vrot.lane.b32.xlu2 %v1813_v31, %s1635_s28  ;;  %s1655_s28 = smov 66  }
  0xcd   : > { %700 = vrot.lane.b32.xlu2 %v1813_v31, %s1636_s29  ;;  %s1656_s29 = smov 38  }
  0xff   : > { %v481_v48 = vpop.permute.xlu2 %480 }
 0x107   : > { %v479_v49 = vpop.permute.xlu2 %478 }
 0x10f   : > { %v604_v50 = vpop.permute.xlu2 %603 }
 0x117   : > { %v412_v51 = vpop.permute.xlu0 %411  ;;  %v606_v52 = vpop.permute.xlu2 %605 }
 0x118   : > { %1481 = vmatpush.xpose.msk.msra.mxu3 %vm413_vm2, %v412_v51  ;;  %v607_v53 = vsel %vm439_vm3, %v604_v50, %v606_v52  ;;  %v398_v50 = vld [vmem:[%s2053_s3 + $0x10] sm:$0xff]  ;;  %v671_v52 = vrot.slane %v399_v37, 4 }
 0x119   : > { %1491 = vmatpush.xpose.msk.msrb.mxu2 %vm413_vm2, %v607_v53  ;;  %v547_v51 = vrot.slane %v398_v50, 2 }
 0x11b   : > { %1482 = vmatmul.msk.f32.vlgmr.msra.gmra.mxu3 %vm413_vm2, %v1813_v31  ;;  %1487 = vmatpush.msk.msrb.mxu0 %vm553_vm4, %v547_v51 }
 0x11f   : > { %v602_v54 = vpop.permute.xlu2 %601 }
 0x120   : > { %1492 = vmatmul.msk.f32.vlgmr.msrb.gmra.mxu2 %vm413_vm2, %v602_v54  ;;  %v670_v54 = vrot.slane %v398_v50, 4 }
 0x127   : > { %v701_v9 = vpop.permute.xlu2 %700 }
 0x19e   : > { %v436_v56 = vpop.f32.mrf.mxu3 }
 0x19f   : > { %v440_v57 = vsel %vm439_vm3, %v436_v56, -inf }
 0x1a0   : > { %441 = vmax.xlane.f32.xlu0 %v440_v57 }
 0x1a3   : > { %v629_v58 = vpop.f32.mrf.mxu2 }
 0x1a4   : > { %v632_v59 = vsel %vm439_vm3, %v629_v58, -inf }
 0x1a5   : > { %633 = vmax.xlane.f32.xlu2 %v632_v59 }
 0x1bd   : > { %643 = vrot.lane.b32.xlu2 %v1821_v35, %s1637_s11  ;;  %s1647_s11 = smov 68  }
 0x1c5   : > { %888 = vrot.lane.b32.xlu2 %v1813_v31, %s1638_s12  ;;  %s1648_s12 = smov 58  }
 0x213   : > { %v442_v60 = vpop.xlane.xlu0 %441 }
 0x214   : > { %v443_v61 = vsub.f32 %v436_v56, %v442_v60  ;;  %v672_v56 = vsel %vm326_vm0, %v670_v54, %v671_v52 }
 0x216   : > { %v444_v62 = vmul.f32 1.442695, %v443_v61 }
 0x218   : > { %1579 = vpow2.f32 %v444_v62  ;;  %v634_v12 = vpop.xlane.xlu2 %633 }
 0x219   : > { %v635_v13 = vsub.f32 %v629_v58, %v634_v12 }
 0x21b   : > { %v636_v15 = vmul.f32 1.442695, %v635_v13 }
 0x21e   : > { %v1580_v63 = vpop.eup %1579 }
 0x21f   : > { %v446_v0 = vsel %vm439_vm3, %v1580_v63, 0.0 }
 0x220   : > { %447 = vadd.xlane.f32.xlu1 %v446_v0  ;;  %v644_v43 = vpop.permute.xlu2 %643 }
 0x239   : > { %452 = vrot.lane.b32.xlu1 %v1821_v35, %s1639_s13  ;;  %s1649_s13 = smov 6  }
 0x241   : > { %702 = vrot.lane.b32.xlu1 %v1821_v35, %s1640_s14  ;;  %s1650_s14 = smov 86  }
 0x293   : > { %v448_v3 = vpop.xlane.xlu1 %447 }
 0x294   : > { %1581 = vrcp.f32 %v448_v3 }
 0x295   : > { %1583 = vpow2.f32 %v636_v15 }
 0x29a   : > { %v1582_v4 = vpop.eup %1581 }
 0x29b   : > { %v450_v6 = vmul.f32 %v1582_v4, %v1580_v63  ;;  %v1584_v21 = vpop.eup %1583 }
 0x29c   : > { %v638_v22 = vsel %vm439_vm3, %v1584_v21, 0.0 }
 0x2ab   : > { %v453_v5 = vpop.permute.xlu1 %452 }
 0x2ac   : > { %473 = vmatpush.msrb.mxu3 %v453_v5 }
 0x2ad   : > { %1483 = vmatmul.msk.f32.vlgmr.msrb.gmra.mxu3 %vm439_vm3, %v450_v6 }
 0x2ae   : > { %1484 = vmatpush.xpose.msk.msra.mxu3 %vm413_vm2, %v481_v48 }
 0x2b3   : > { %v703_v7 = vpop.permute.xlu1 %702 }
 0x2b4   : > { %1496 = vmatpush.xpose.msk.msra.mxu1 %vm413_vm2, %v703_v7 }
 0x2b5   : > { %1485 = vmatmul.msk.f32.vlgmr.msra.gmra.mxu3 %vm413_vm2, %v479_v49  ;;  %v546_v49 = vrot.slane %v1882_v1, 2  ;;  %v889_v1 = vpop.permute.xlu2 %888 }
 0x2b7   : > { %v548_v53 = vsel %vm545_vm5, %v546_v49, %v547_v51 }
 0x2b8   : > { %571 = vmatpush.msrb.mxu0 %v548_v53 }
 0x2ba   : > { %1494 = vmatpush.msk.msra.mxu0 %vm553_vm4, %v671_v52 }
 0x2bc   : > { %694 = vmatpush.msra.mxu0 %v672_v56 }
 0x330   : > { %v475_v8 = vpop.f32.mrf.mxu3 }
 0x331   : > { %1490 = vmatmul.msk.f32.vlgmr.msrb.gmra.mxu1 %vm413_vm2, %v475_v8 }
 0x338   : > { %v503_v10 = vpop.f32.mrf.mxu3 }
 0x339   : > { %1497 = vmatmul.msk.f32.vlgmr.msra.gmra.mxu1 %vm413_vm2, %v701_v9  ;;  %v506_v11 = vsel %vm439_vm3, %v503_v10, -inf }
 0x33a   : > { %507 = vmax.xlane.f32.xlu1 %v506_v11 }
 0x3ad   : > { %v508_v16 = vpop.xlane.xlu1 %507 }
 0x3ae   : > { %v1896_v14 = vpop.f32.mrf.mxu1  ;;  %v509_v17 = vsub.f32 %v503_v10, %v508_v16 }
 0x3b0   : > { %v510_v20 = vmul.f32 1.442695, %v509_v17  ;;  %v318_v17 = vperm.slane %v1810_v27, 2  ;;  %v402_v27 = vld [vmem:[%s2053_s3 + $0x30] sm:$0xff] }
 0x3b2   : > { %1585 = vpow2.f32 %v510_v20 }
 0x3b6   : > { %v725_v18 = vpop.f32.mrf.mxu1 }
 0x3b7   : > { %v728_v19 = vsel %vm439_vm3, %v725_v18, -inf }
 0x3b8   : > { %729 = vmax.xlane.f32.xlu0 %v728_v19  ;;  %v1586_v23 = vpop.eup %1585 }
 0x3b9   : > { %v512_v25 = vsel %vm439_vm3, %v1586_v23, 0.0 }
 0x3c0   : > { %639 = vadd.xlane.f32.xlu0 %v638_v22 }
 0x3c8   : > { %513 = vadd.xlane.f32.xlu0 %v512_v25 }
 0x3dc   : > { %517 = vrot.lane.b32.xlu0 %v1821_v35, %s1641_s20  ;;  %s1651_s20 = smov 96  }
 0x3e4   : > { %798 = vrot.lane.b32.xlu0 %v1821_v35, %s1642_s21 }
 0x3ec   : > { %890 = vrot.lane.b32.xlu0 %v1821_v35, %s1643_s22 }
 0x3f4   : > { %796 = vrot.lane.b32.xlu0 %v1813_v31, %s1644_s23  ;;  %s1652_s23 = smov 124  }
 0x42b   : > { %v730_v26 = vpop.xlane.xlu0 %729 }
 0x42c   : > { %v731_v28 = vsub.f32 %v725_v18, %v730_v26  ;;  %v1943_v18 = vadd.f32 %v1870_v55, %v318_v17  ;;  %v1957_v26 = vld [vmem:[%s2053_s3 + $0x38] sm:$0xff] }
 0x42e   : > { %v732_v29 = vmul.f32 1.442695, %v731_v28  ;;  %v1571_v19 = vpack.i.bf16 %v1943_v18, %v1821_v35  ;;  %v960_v28 = vrot.slane %v1957_v26, 2 }
 0x430   : > { %1587 = vpow2.f32 %v732_v29  ;;  %v959_v29 = vrot.slane %v402_v27, 2 }
 0x432   : > { %v961_v36 = vsel %vm545_vm5, %v959_v29, %v960_v28 }
 0x433   : > { %v640_v33 = vpop.xlane.xlu0 %639 }
 0x436   : > { %v1588_v30 = vpop.eup %1587 }
 0x437   : > { %v734_v32 = vsel %vm439_vm3, %v1588_v30, 0.0 }
 0x438   : > { %735 = vadd.xlane.f32.xlu1 %v734_v32 }
 0x43b   : > { %v514_v34 = vpop.xlane.xlu0 %513 }
 0x43c   : > { %1589 = vrcp.f32 %v514_v34 }
 0x43d   : > { %1591 = vrcp.f32 %v640_v33 }
 0x442   : > { %v1590_v38 = vpop.eup %1589 }
 0x443   : > { %v516_v41 = vmul.f32 %v1590_v38, %v1586_v23  ;;  %v1592_v45 = vpop.eup %1591 }
 0x444   : > { %v642_v46 = vmul.f32 %v1592_v45, %v1584_v21 }
 0x44e   : > { %v518_v42 = vpop.permute.xlu0 %517 }
 0x44f   : > { %538 = vmatpush.msrb.mxu3 %v518_v42 }
 0x450   : > { %1486 = vmatmul.msk.f32.vlgmr.msrb.gmra.mxu3 %vm439_vm3, %v516_v41  ;;  %v401_v41 = vld [vmem:[%s2053_s3 + $0x28] sm:$0xff] }
 0x451   : > { %664 = vmatpush.msra.mxu3 %v644_v43  ;;  %739 = vrot.lane.b32.xlu1 %v1821_v35, %s1645_s30 }
 0x453   : > { %1499 = vmatpush.msk.msrb.mxu3 %vm553_vm4, %v767_v39 }
 0x455   : > { %790 = vmatpush.msrb.mxu3 %v768_v44 }
 0x456   : > { %v799_v47 = vpop.permute.xlu0 %798 }
 0x458   : > { %1493 = vmatmul.msk.f32.vlgmr.msra.gmra.mxu3 %vm439_vm3, %v642_v46 }
 0x45e   : > { %v891_v48 = vpop.permute.xlu0 %890 }
 0x45f   : > { %1506 = vmatpush.xpose.msk.msra.mxu3 %vm413_vm2, %v891_v48 }
 0x466   : > { %v797_v63 = vpop.permute.xlu0 %796 }
 0x4ab   : > { %v736_v57 = vpop.xlane.xlu1 %735 }
 0x4ac   : > { %1593 = vrcp.f32 %v736_v57 }
 0x4b2   : > { %v1594_v58 = vpop.eup %1593 }
 0x4b3   : > { %v738_v59 = vmul.f32 %v1594_v58, %v1588_v30 }
 0x4c3   : > { %v740_v60 = vpop.permute.xlu1 %739 }
 0x4c4   : > { %760 = vmatpush.msra.mxu2 %v740_v60 }
 0x4c5   : > { %1498 = vmatmul.msk.f32.vlgmr.msra.gmra.mxu2 %vm439_vm3, %v738_v59 }
 0x4c6   : > { %1504 = vmatpush.msk.msrb.mxu2 %vm553_vm4, %v402_v27 }
 0x4c8   : > { %882 = vmatpush.msrb.mxu2 %v401_v41 }
 0x4d3   : > { %v540_v61 = vpop.f32.mrf.mxu3 }
 0x4d4   : > { %1488 = vmatmul.msk.f32.vlgmr.msrb.gmra.mxu0 %vm413_vm2, %v540_v61 }
 0x4d5   : > { %1501 = vmatpush.xpose.msk.msrb.mxu0 %vm413_vm2, %v799_v47 }
 0x4db   : > { %v666_v62 = vpop.f32.mrf.mxu3 }
 0x4dc   : > { %1495 = vmatmul.msk.f32.vlgmr.msra.gmra.mxu0 %vm413_vm2, %v666_v62 }
 0x4e4   : > { %1502 = vmatmul.msk.f32.vlgmr.msrb.gmra.mxu0 %vm413_vm2, %v797_v63 }
 0x548   : > { %v762_v0 = vpop.f32.mrf.mxu2 }
 0x549   : > { %1500 = vmatmul.msk.f32.vlgmr.msrb.gmra.mxu3 %vm413_vm2, %v762_v0 }
 0x551   : > { %v573_v2 = vpop.f32.mrf.mxu0  ;;  %1507 = vmatmul.msk.f32.vlgmr.msra.gmra.mxu3 %vm413_vm2, %v889_v1 }
 0x552   : > { %v599_v3 = vadd.f32 %v1896_v14, %v573_v2 }
 0x559   : > { %v696_v4 = vpop.f32.mrf.mxu0 }
 0x55a   : > { %v699_v5 = vadd.f32 %v696_v4, %v599_v3  ;;  %v405_v3 = vld [vmem:[%s2053_s3 + $0x48] sm:$0xff]  ;;  %v404_v4 = vld [vmem:[%s2053_s3 + $0x40] sm:$0xff] }
 0x561   : > { %v821_v6 = vpop.f32.mrf.mxu0 }
 0x562   : > { %v824_v7 = vsel %vm439_vm3, %v821_v6, -inf }
 0x563   : > { %825 = vmax.xlane.f32.xlu1 %v824_v7  ;;  %v1056_v7 = vrot.slane %v404_v4, 4 }
 0x5cc   : > { %v792_v8 = vpop.f32.mrf.mxu3 }
 0x5cd   : > { %v1935_v9 = vadd.f32 %v792_v8, %v699_v5  ;;  %v1151_v8 = vrot.slane %v404_v4, 6 }
 0x5d4   : > { %v913_v10 = vpop.f32.mrf.mxu3 }
 0x5d5   : > { %v916_v11 = vsel %vm439_vm3, %v913_v10, -inf }
 0x5d6   : > { %917 = vmax.xlane.f32.xlu0 %v916_v11  ;;  %v826_v12 = vpop.xlane.xlu1 %825 }
 0x5d7   : > { %v827_v13 = vsub.f32 %v821_v6, %v826_v12  ;;  %v1152_v6 = vrot.slane %v405_v3, 6 }
 0x5d9   : > { %v828_v15 = vmul.f32 1.442695, %v827_v13 }
 0x5db   : > { %1595 = vpow2.f32 %v828_v15 }
 0x5e1   : > { %v1596_v16 = vpop.eup %1595 }
 0x5e2   : > { %v830_v14 = vsel %vm439_vm3, %v1596_v16, 0.0 }
 0x5e3   : > { %831 = vadd.xlane.f32.xlu2 %v830_v14  ;;  %v1055_v14 = vrot.slane %v1957_v26, 4 }
 0x5e5   : > { %v1057_v17 = vsel %vm326_vm0, %v1055_v14, %v1056_v7 }
 0x5ea   : > { %835 = vrot.lane.b32.xlu0 %v1821_v35, %s1646_s10 }
 0x5f2   : > { %989 = vrot.lane.b32.xlu0 %v1813_v31, %s1647_s11  ;;  %s1657_s11 = smov 76  }
 0x5fa   : > { %1085 = vrot.lane.b32.xlu0 %v1813_v31, %s1648_s12  ;;  %s1658_s12 = smov 104  }
 0x5fb   : > { %1572 = vrot.lane.b32.xlu2 %v1571_v19, %s1649_s13  ;;  %s1659_s13 = smov 94  }
 0x603   : > { %1087 = vrot.lane.b32.xlu2 %v1821_v35, %s1650_s14 }
 0x649   : > { %v918_v20 = vpop.xlane.xlu0 %917 }
 0x64a   : > { %v919_v55 = vsub.f32 %v913_v10, %v918_v20 }
 0x64c   : > { %v920_v21 = vmul.f32 1.442695, %v919_v55 }
 0x64e   : > { %1597 = vpow2.f32 %v920_v21 }
 0x654   : > { %v1598_v22 = vpop.eup %1597 }
 0x655   : > { %v922_v23 = vsel %vm439_vm3, %v1598_v22, 0.0 }
 0x656   : > { %923 = vadd.xlane.f32.xlu1 %v922_v23  ;;  %v832_v25 = vpop.xlane.xlu2 %831 }
 0x657   : > { %1599 = vrcp.f32 %v832_v25 }
 0x65c   : > { %v836_v30 = vpop.permute.xlu0 %835 }
 0x65d   : > { %v1600_v32 = vpop.eup %1599  ;;  %856 = vmatpush.msrb.mxu1 %v836_v30 }
 0x65e   : > { %v834_v33 = vmul.f32 %v1600_v32, %v1596_v16  ;;  %v1573_v34 = vpop.permute.xlu2 %1572 }
 0x65f   : > { %1509 = vmatpush.msk.msra.mxu1 %vm553_vm4, %v960_v28  ;;  %v1575_v37 = vunpack.i.h.bf16 %v1573_v34  ;;  %v1574_v38 = vunpack.i.l.bf16 %v1573_v34 }
 0x660   : > { %1503 = vmatmul.msk.f32.vlgmr.msrb.gmra.mxu1 %vm439_vm3, %v834_v33 }
 0x661   : > { %v933_v39 = vsel %vm932_vm6, %v1574_v38, %v1575_v37  ;;  %983 = vmatpush.msra.mxu1 %v961_v36 }
 0x662   : > { %953 = vmatpush.msra.mxu0 %v933_v39 }
 0x664   : > { %v990_v47 = vpop.permute.xlu0 %989  ;;  %1514 = vmatpush.msk.msrb.mxu0 %vm553_vm4, %v1056_v7 }
 0x666   : > { %v1088_v40 = vpop.permute.xlu2 %1087  ;;  %1079 = vmatpush.msrb.mxu0 %v1057_v17 }
 0x667   : > { %1516 = vmatpush.xpose.msk.msrb.mxu1 %vm413_vm2, %v1088_v40 }
 0x66c   : > { %v1086_v49 = vpop.permute.xlu0 %1085 }
 0x66f   : > { %991 = vrot.lane.b32.xlu1 %v1821_v35, %s1651_s20 }
 0x6c9   : > { %v924_v42 = vpop.xlane.xlu1 %923 }
 0x6ca   : > { %1601 = vrcp.f32 %v924_v42 }
 0x6d0   : > { %v1602_v43 = vpop.eup %1601 }
 0x6d1   : > { %v926_v44 = vmul.f32 %v1602_v43, %v1598_v22 }
 0x6d3   : > { %1508 = vmatmul.msk.f32.vlgmr.msra.gmra.mxu0 %vm439_vm3, %v926_v44 }
 0x6dd   : > { %v858_v45 = vpop.f32.mrf.mxu1 }
 0x6de   : > { %1505 = vmatmul.msk.f32.vlgmr.msrb.gmra.mxu2 %vm413_vm2, %v858_v45 }
 0x6e1   : > { %v992_v46 = vpop.permute.xlu1 %991 }
 0x6e2   : > { %1511 = vmatpush.xpose.msk.msra.mxu2 %vm413_vm2, %v992_v46 }
 0x6e6   : > { %1512 = vmatmul.msk.f32.vlgmr.msra.gmra.mxu2 %vm413_vm2, %v990_v47 }
 0x750   : > { %v955_v48 = vpop.f32.mrf.mxu0 }
 0x751   : > { %1510 = vmatmul.msk.f32.vlgmr.msra.gmra.mxu1 %vm413_vm2, %v955_v48 }
 0x759   : > { %1517 = vmatmul.msk.f32.vlgmr.msrb.gmra.mxu1 %vm413_vm2, %v1086_v49 }
 0x761   : > { %v884_v50 = vpop.f32.mrf.mxu2 }
 0x762   : > { %v887_v51 = vadd.f32 %v884_v50, %v1935_v9 }
 0x769   : > { %v1014_v52 = vpop.f32.mrf.mxu2 }
 0x76a   : > { %v1017_v53 = vsel %vm439_vm3, %v1014_v52, -inf }
 0x76b   : > { %1018 = vmax.xlane.f32.xlu1 %v1017_v53 }
 0x7ce   : > { %v985_v54 = vpop.f32.mrf.mxu1 }
 0x7cf   : > { %v1976_v56 = vadd.f32 %v985_v54, %v887_v51  ;;  %v406_v51 = vld [vmem:[%s2053_s3 + $0x50] sm:$0xff] }
 0x7d6   : > { %v1110_v57 = vpop.f32.mrf.mxu1 }
 0x7d7   : > { %v1113_v58 = vsel %vm439_vm3, %v1110_v57, -inf }
 0x7d8   : > { %1114 = vmax.xlane.f32.xlu2 %v1113_v58 }
 0x7de   : > { %v1019_v59 = vpop.xlane.xlu1 %1018 }
 0x7df   : > { %v1020_v60 = vsub.f32 %v1014_v52, %v1019_v59  ;;  %v408_v52 = vld [vmem:[%s2053_s3 + $0x60] sm:$0xf] }
 0x7e0   : > { %v1340_v53 = vrot.slane %v408_v52, 2 }
 0x7e1   : > { %v1021_v61 = vmul.f32 1.442695, %v1020_v60 }
 0x7e3   : > { %1603 = vpow2.f32 %v1021_v61 }
 0x7e9   : > { %v1604_v62 = vpop.eup %1603 }
 0x7ea   : > { %v1023_v63 = vsel %vm439_vm3, %v1604_v62, 0.0 }
 0x7eb   : > { %1024 = vadd.xlane.f32.xlu0 %v1023_v63 }
 0x7f0   : > { %1028 = vrot.lane.b32.xlu2 %v1943_v18, %s1652_s23 }
 0x7f8   : > { %1181 = vrot.lane.b32.xlu2 %v1813_v31, %s1653_s26 }
 0x7ff   : > { %1124 = vrot.lane.b32.xlu0 %v1943_v18, %s1654_s27 }
 0x807   : > { %1275 = vrot.lane.b32.xlu0 %v1821_v35, %s1655_s28 }
 0x80f   : > { %1273 = vrot.lane.b32.xlu0 %v1813_v31, %s1656_s29  ;;  %v1153_v31 = vsel %vm553_vm4, %v1151_v8, %v1152_v6 }
 0x84b   : > { %v1115_v0 = vpop.xlane.xlu2 %1114 }
 0x84c   : > { %v1116_v1 = vsub.f32 %v1110_v57, %v1115_v0  ;;  %v1576_v0 = vld [vmem:[%s2054_s4] ss:$0 sm:$0xff] }
 0x84e   : > { %v1117_v2 = vmul.f32 1.442695, %v1116_v1 }
 0x850   : > { %1605 = vpow2.f32 %v1117_v2 }
 0x853   : > { %v1029_v5 = vpop.permute.xlu2 %1028 }
 0x854   : > { %1049 = vmatpush.msrb.mxu3 %v1029_v5 }
 0x856   : > { %1519 = vmatpush.msk.msra.mxu3 %vm553_vm4, %v1152_v6  ;;  %v1606_v9 = vpop.eup %1605  ;;  %v1660_v6 = vmov 100.0  }
 0x857   : > { %v1119_v10 = vsel %vm439_vm3, %v1606_v9, 0.0 }
 0x858   : > { %1175 = vmatpush.msra.mxu3 %v1153_v31  ;;  %1120 = vadd.xlane.f32.xlu1 %v1119_v10 }
 0x85b   : > { %v1182_v21 = vpop.permute.xlu2 %1181 }
 0x85e   : > { %v1025_v11 = vpop.xlane.xlu0 %1024 }
 0x85f   : > { %1607 = vrcp.f32 %v1025_v11 }
 0x865   : > { %v1608_v12 = vpop.eup %1607 }
 0x866   : > { %v1027_v13 = vmul.f32 %v1608_v12, %v1604_v62 }
 0x868   : > { %1513 = vmatmul.msk.f32.vlgmr.msrb.gmra.mxu3 %vm439_vm3, %v1027_v13 }
 0x871   : > { %1183 = vrot.lane.b32.xlu1 %v1821_v35, %s1657_s11  ;;  %v1125_v15 = vpop.permute.xlu0 %1124 }
 0x872   : > { %1145 = vmatpush.msrb.mxu2 %v1125_v15 }
 0x879   : > { %v1276_v16 = vpop.permute.xlu0 %1275 }
 0x87a   : > { %1526 = vmatpush.xpose.msk.msrb.mxu3 %vm413_vm2, %v1276_v16 }
 0x881   : > { %v1274_v23 = vpop.permute.xlu0 %1273 }
 0x8cb   : > { %v1121_v19 = vpop.xlane.xlu1 %1120 }
 0x8cc   : > { %1609 = vrcp.f32 %v1121_v19 }
 0x8d2   : > { %v1610_v27 = vpop.eup %1609 }
 0x8d3   : > { %v1123_v20 = vmul.f32 %v1610_v27, %v1606_v9 }
 0x8d5   : > { %1518 = vmatmul.msk.f32.vlgmr.msrb.gmra.mxu2 %vm439_vm3, %v1123_v20 }
 0x8e3   : > { %v1184_v55 = vpop.permute.xlu1 %1183 }
 0x8e4   : > { %1521 = vmatpush.xpose.msk.msra.mxu0 %vm413_vm2, %v1184_v55 }
 0x8eb   : > { %v1051_v35 = vpop.f32.mrf.mxu3 }
 0x8ec   : > { %1515 = vmatmul.msk.f32.vlgmr.msrb.gmra.mxu0 %vm413_vm2, %v1051_v35 }
 0x8f4   : > { %1522 = vmatmul.msk.f32.vlgmr.msra.gmra.mxu0 %vm413_vm2, %v1182_v21 }
 0x958   : > { %v1147_v22 = vpop.f32.mrf.mxu2 }
 0x959   : > { %1520 = vmatmul.msk.f32.vlgmr.msra.gmra.mxu3 %vm413_vm2, %v1147_v22 }
 0x961   : > { %1527 = vmatmul.msk.f32.vlgmr.msrb.gmra.mxu3 %vm413_vm2, %v1274_v23  ;;  %v1577_v23 = vld [vmem:[%s2055_s5] ss:$0 sm:$0xff] }
 0x969   : > { %v1081_v25 = vpop.f32.mrf.mxu0 }
 0x96a   : > { %v1084_v26 = vadd.f32 %v1081_v25, %v1976_v56 }
 0x971   : > { %v1206_v28 = vpop.f32.mrf.mxu0 }
 0x972   : > { %v1209_v29 = vsel %vm439_vm3, %v1206_v28, -inf }
 0x973   : > { %1210 = vmax.xlane.f32.xlu1 %v1209_v29 }
 0x9dc   : > { %v1177_v30 = vpop.f32.mrf.mxu3 }
 0x9dd   : > { %v1180_v32 = vadd.f32 %v1177_v30, %v1084_v26  ;;  %v1578_v26 = vld [vmem:[%s2056_s6] ss:$0 sm:$0xff] }
 0x9e4   : > { %v1298_v33 = vpop.f32.mrf.mxu3 }
 0x9e5   : > { %v1301_v34 = vsel %vm439_vm3, %v1298_v33, -inf }
 0x9e6   : > { %1302 = vmax.xlane.f32.xlu2 %v1301_v34  ;;  %v1211_v36 = vpop.xlane.xlu1 %1210 }
 0x9e7   : > { %v1212_v37 = vsub.f32 %v1206_v28, %v1211_v36 }
 0x9e9   : > { %v1213_v38 = vmul.f32 1.442695, %v1212_v37 }
 0x9eb   : > { %1611 = vpow2.f32 %v1213_v38 }
 0x9f1   : > { %v1612_v39 = vpop.eup %1611 }
 0x9f2   : > { %v1215_v40 = vsel %vm439_vm3, %v1612_v39, 0.0 }
 0x9f3   : > { %1216 = vadd.xlane.f32.xlu0 %v1215_v40 }
 0x9fe   : > { %1220 = vrot.lane.b32.xlu2 %v1943_v18, %s1658_s12 }
 0xa07   : > { %1312 = vrot.lane.b32.xlu0 %v1943_v18, %s1659_s13  ;;  %v407_v18 = vld [vmem:[%s2053_s3 + $0x58] sm:$0xff] }
 0xa08   : > { %1524 = vmatpush.msk.msra.mxu2 %vm553_vm4, %v407_v18  ;;  %v1339_v59 = vrot.slane %v407_v18, 2 }
 0xa0a   : > { %1267 = vmatpush.msra.mxu2 %v406_v51  ;;  %v1341_v60 = vsel %vm545_vm5, %v1339_v59, %v1340_v53 }
 0xa59   : > { %v1303_v41 = vpop.xlane.xlu2 %1302 }
 0xa5a   : > { %v1304_v42 = vsub.f32 %v1298_v33, %v1303_v41 }
 0xa5c   : > { %v1305_v43 = vmul.f32 1.442695, %v1304_v42 }
 0xa5e   : > { %1613 = vpow2.f32 %v1305_v43 }
 0xa61   : > { %v1221_v44 = vpop.permute.xlu2 %1220 }
 0xa62   : > { %1241 = vmatpush.msra.mxu1 %v1221_v44 }
 0xa64   : > { %v1614_v45 = vpop.eup %1613  ;;  %1529 = vmatpush.msk.msrb.mxu1 %vm553_vm4, %v1340_v53 }
 0xa65   : > { %v1307_v46 = vsel %vm439_vm3, %v1614_v45, 0.0 }
 0xa66   : > { %1308 = vadd.xlane.f32.xlu1 %v1307_v46  ;;  %v1217_v47 = vpop.xlane.xlu0 %1216  ;;  %1363 = vmatpush.msrb.mxu1 %v1341_v60 }
 0xa67   : > { %1615 = vrcp.f32 %v1217_v47 }
 0xa6d   : > { %v1616_v48 = vpop.eup %1615 }
 0xa6e   : > { %v1219_v49 = vmul.f32 %v1616_v48, %v1612_v39 }
 0xa70   : > { %1523 = vmatmul.msk.f32.vlgmr.msra.gmra.mxu1 %vm439_vm3, %v1219_v49 }
 0xa79   : > { %v1313_v50 = vpop.permute.xlu0 %1312 }
 0xa7a   : > { %1333 = vmatpush.msrb.mxu0 %v1313_v50 }
 0xad9   : > { %v1309_v54 = vpop.xlane.xlu1 %1308 }
 0xada   : > { %1617 = vrcp.f32 %v1309_v54 }
 0xadb   : > { %1619 = vrcp.f32 %v1660_v6 }
 0xae0   : > { %v1618_v56 = vpop.eup %1617 }
 0xae1   : > { %v1311_v57 = vmul.f32 %v1618_v56, %v1614_v45  ;;  %v1620_v7 = vpop.eup %1619 }
 0xae2   : > { %v1381_v8 = vmul.f32 100.0, %v1620_v7  ;;  %vm1385_vm7 = vweird.f32 %v1620_v7 }
 0xae3   : > { %1528 = vmatmul.msk.f32.vlgmr.msrb.gmra.mxu0 %vm439_vm3, %v1311_v57 }
 0xae4   : > { %v1382_v31 = vsub.f32 1.0, %v1381_v8 }
 0xae6   : > { %v1383_v9 = vmul.f32 %v1620_v7, %v1382_v31 }
 0xae8   : > { %v1384_v10 = vadd.f32 %v1620_v7, %v1383_v9 }
 0xaea   : > { %v1386_v11 = vsel %vm1385_vm7, %v1620_v7, %v1384_v10 }
 0xaed   : > { %v1243_v58 = vpop.f32.mrf.mxu1 }
 0xaee   : > { %1525 = vmatmul.msk.f32.vlgmr.msra.gmra.mxu2 %vm413_vm2, %v1243_v58 }
 0xb60   : > { %v1335_v61 = vpop.f32.mrf.mxu0 }
 0xb61   : > { %1530 = vmatmul.msk.f32.vlgmr.msrb.gmra.mxu1 %vm413_vm2, %v1335_v61 }
 0xb71   : > { %v1269_v62 = vpop.f32.mrf.mxu2 }
 0xb72   : > { %v1272_v63 = vadd.f32 %v1269_v62, %v1180_v32 }
 0xbde   : > { %v1365_v1 = vpop.f32.mrf.mxu1 }
 0xbdf   : > { %v1368_v2 = vadd.f32 %v1365_v1, %v1272_v63 }
 0xbe1   : > { %v1373_v3 = vadd.f32 %v1576_v0, %v1368_v2 }
 0xbe3   : > { %v1374_v4 = vadd.f32 %v1373_v3, %v1795_v24 }
 0xbe5   : > { %v1377_v5 = vsel %vm322_vm1, %v1374_v4, 0.0 }
 0xbe6   : > { %1378 = vadd.xlane.f32.xlu1 %v1377_v5 }
 0xc59   : > { %v1379_v12 = vpop.xlane.xlu1 %1378 }
 0xc5a   : > { %v1387_v13 = vmul.f32 %v1386_v11, %v1379_v12 }
 0xc5c   : > { %v1388_v15 = vsub.f32 %v1374_v4, %v1387_v13 }
 0xc5e   : > { %v1389_v16 = vmul.f32 %v1388_v15, %v1388_v15 }
 0xc60   : > { %v1390_v14 = vsel %vm322_vm1, %v1389_v16, 0.0 }
 0xc61   : > { %1391 = vadd.xlane.f32.xlu1 %v1390_v14 }
 0xcd4   : > { %v1392_v24 = vpop.xlane.xlu1 %1391 }
 0xcd5   : > { %v1393_v17 = vmul.f32 %v1392_v24, %v1386_v11 }
 0xcd7   : > { %v1394_v19 = vadd.f32 1e-05, %v1393_v17 }
 0xcd9   : > { %1621 = vrsqrt.f32 %v1394_v19  ;;  %vm1401_vm9 = vweird.f32 %v1394_v19 }
 0xcdf   : > { %v1622_v27 = vpop.eup %1621 }
 0xce0   : > { %v1396_v20 = vmul.f32 %v1622_v27, %v1394_v19  ;;  %vm1402_vm8 = vweird.f32 %v1622_v27 }
 0xce1   : > { %vm1403_vm10 = vmor %vm1401_vm9, %vm1402_vm8 }
 0xce2   : > { %v1397_v55 = vmul.f32 %v1622_v27, %v1396_v20 }
 0xce4   : > { %v1398_v35 = vmul.f32 0.5, %v1397_v55 }
 0xce6   : > { %v1399_v21 = vsub.f32 1.5, %v1398_v35 }
 0xce8   : > { %v1400_v22 = vmul.f32 %v1622_v27, %v1399_v21 }
 0xcea   : > { %v1404_v25 = vsel %vm1403_vm10, %v1622_v27, %v1400_v22 }
 0xceb   : > { %v1405_v28 = vmul.f32 %v1404_v25, %v1388_v15 }
 0xced   : > { %v1409_v29 = vmul.f32 %v1577_v23, %v1405_v28 }
 0xcef   : > { %v1413_v30 = vadd.f32 %v1578_v26, %v1409_v29 }
 0xcf1   : > { %1414 = vst.msk [vmem:[%s273_s8] sm:$0xff] %vm322_vm1, %v1413_v30 }
 0xcf2 PF: > { %s17_s24 = sadd.s32 1, %s1629_s24  }
 0xcf3   : > { %p14_p4 = scmp.ge.s32.totalorder %s17_s24, 4  }
 0xcf5   :  { %16 = sbr.rel (!%p14_p4) target bundleno = 1 (0x1), region = 78 }

// kernel: closed_call.8
= control target key start
LH: loop header
LB: loop body
LE: loop exit
PB: predicated region body
PF: predicated region fallthrough
CT: control target
= control target key end

     0   :  { %s1689_s24 = smov 0   ;;  %s3207_s0 = inlined_call_operand.vmem [shape: f32[2,8,100], index: 0, kind: input, shape index: {}]   ;;  %s3208_s1 = inlined_call_operand.vmem [shape: f32[100,2048], index: 1, kind: input, shape index: {}]   ;;  %s3209_s2 = inlined_call_operand.vmem [shape: f32[1,2048], index: 2, kind: input, shape index: {}]   ;;  %s3210_s3 = inlined_call_operand.vmem [shape: f32[2048,100], index: 3, kind: input, shape index: {}]   ;;  %s3211_s4 = inlined_call_operand.vmem [shape: f32[1,100], index: 4, kind: input, shape index: {}]   ;;  %s3212_s5 = inlined_call_operand.vmem [shape: f32[1,100], index: 5, kind: input, shape index: {}]   ;;  %s3213_s6 = inlined_call_operand.vmem [shape: f32[1,100], index: 6, kind: input, shape index: {}]   ;;  %s3214_s7 = inlined_call_operand.vmem [shape: f32[2,8,100], index: 7, kind: output, shape index: {}]  }
   0x1 LB: > { %s1582_s25 = sadd.s32 4294967295, %s1646_s24   ;;  %p1586_p0 = scmp.ge.s32.totalorder %s1646_s24, 1  ;;  %s1646_s24 = sphi %s1689_s24, %s17_s24  }
   0x2   : > { %p236_p1 = scmp.lt.s32.totalorder %s1646_s24, 3 }
   0x4   : > { %p237_p2 = pnand %p1586_p0, %p236_p1 }
   0x5   : > { %p1859_p3 = scmp.lt.s32.totalorder (!%p237_p2), %s1582_s25, 1 }
   0x6   : > { %240 = sbr.rel (%p237_p2) target bundleno = 668 (0x29c), region = 48 }
   0xb   : > { %v467_v0 = vld [vmem:[%s3208_s1 + $0x600] sm:$0xf]  ;;  %vm523_vm0 = vcmask 1043456   ;;  %v469_v1 = vld [vmem:[%s3208_s1 + $0x610] sm:$0xf]  ;;  %v452_v7 = vld [vmem:[%s3208_s1 + $0x588] sm:$0xff] }
   0xc   : > { %v451_v2 = vld [vmem:[%s3208_s1 + $0x580] sm:$0xff]  ;;  %1589 = vmatpush.msk.msra.mxu0 %vm523_vm0, %v467_v0  ;;  %1593 = vmatpush.msk.msra.mxu2 %vm523_vm0, %v469_v1  ;;  %v468_v3 = vld [vmem:[%s3208_s1 + $0x608] sm:$0xf]  ;;  %v453_v4 = vld [vmem:[%s3208_s1 + $0x590] sm:$0xff]  ;;  %s3217_s25 = smov (!%p1859_p3, %s1582_s25), 1  ;;  %vm519_vm1 = vcmask 818176  }
   0xd   : > { %v470_v5 = vld [vmem:[%s3208_s1 + $0x618] sm:$0xf]  ;;  %1591 = vmatpush.msk.msra.mxu1 %vm523_vm0, %v468_v3  ;;  %v435_v6 = vld [vmem:[%s3208_s1 + $0x500] sm:$0xff]  ;;  %v437_v8 = vld [vmem:[%s3208_s1 + $0x510] sm:$0xff]  ;;  %s1587_s14 = sshll.u32 %s3217_s25, 3 }
   0xe   : > { %1595 = vmatpush.msk.msra.mxu3 %vm523_vm0, %v470_v5  ;;  %576 = vmatpush.msra.mxu0 %v451_v2  ;;  %v454_v9 = vld [vmem:[%s3208_s1 + $0x598] sm:$0xff]  ;;  %v436_v10 = vld [vmem:[%s3208_s1 + $0x508] sm:$0xff]  ;;  %v419_v11 = vld [vmem:[%s3208_s1 + $0x480] sm:$0xff]  ;;  %s1945_s8 = scalar_lea.vmem %s3207_s0, %s1587_s14  ;;  %s273_s22 = scalar_lea.vmem %s3214_s7, %s1587_s14 }
   0xf   : > { %616 = vmatpush.msra.mxu2 %v453_v4  ;;  %596 = vmatpush.msra.mxu1 %v452_v7  ;;  %v421_v12 = vld [vmem:[%s3208_s1 + $0x490] sm:$0xff]  ;;  %v438_v13 = vld [vmem:[%s3208_s1 + $0x518] sm:$0xff]  ;;  %v420_v14 = vld [vmem:[%s3208_s1 + $0x488] sm:$0xff] }
  0x10   : > { %636 = vmatpush.msra.mxu3 %v454_v9  ;;  %577 = vmatpush.msra.mxu0 %v435_v6  ;;  %v422_v15 = vld [vmem:[%s3208_s1 + $0x498] sm:$0xff]  ;;  %v403_v16 = vld [vmem:[%s3208_s1 + $0x400] sm:$0xff]  ;;  %v405_v17 = vld [vmem:[%s3208_s1 + $0x410] sm:$0xff] }
  0x11   : > { %617 = vmatpush.msra.mxu2 %v437_v8  ;;  %597 = vmatpush.msra.mxu1 %v436_v10  ;;  %v404_v18 = vld [vmem:[%s3208_s1 + $0x408] sm:$0xff]  ;;  %v406_v19 = vld [vmem:[%s3208_s1 + $0x418] sm:$0xff]  ;;  %v387_v20 = vld [vmem:[%s3208_s1 + $0x380] sm:$0xff] }
  0x12   : > { %637 = vmatpush.msra.mxu3 %v438_v13  ;;  %578 = vmatpush.msra.mxu0 %v419_v11  ;;  %v389_v21 = vld [vmem:[%s3208_s1 + $0x390] sm:$0xff]  ;;  %v388_v22 = vld [vmem:[%s3208_s1 + $0x388] sm:$0xff]  ;;  %v390_v23 = vld [vmem:[%s3208_s1 + $0x398] sm:$0xff] }
  0x13   : > { %618 = vmatpush.msra.mxu2 %v421_v12  ;;  %598 = vmatpush.msra.mxu1 %v420_v14  ;;  %v371_v24 = vld [vmem:[%s3208_s1 + $0x300] sm:$0xff]  ;;  %v373_v25 = vld [vmem:[%s3208_s1 + $0x310] sm:$0xff]  ;;  %v372_v26 = vld [vmem:[%s3208_s1 + $0x308] sm:$0xff] }
  0x14   : > { %638 = vmatpush.msra.mxu3 %v422_v15  ;;  %579 = vmatpush.msra.mxu0 %v403_v16  ;;  %v374_v27 = vld [vmem:[%s3208_s1 + $0x318] sm:$0xff]  ;;  %v355_v28 = vld [vmem:[%s3208_s1 + $0x280] sm:$0xff]  ;;  %v357_v29 = vld [vmem:[%s3208_s1 + $0x290] sm:$0xff] }
  0x15   : > { %619 = vmatpush.msra.mxu2 %v405_v17  ;;  %599 = vmatpush.msra.mxu1 %v404_v18  ;;  %v356_v30 = vld [vmem:[%s3208_s1 + $0x288] sm:$0xff]  ;;  %v358_v31 = vld [vmem:[%s3208_s1 + $0x298] sm:$0xff]  ;;  %v339_v32 = vld [vmem:[%s3208_s1 + $0x200] sm:$0xff] }
  0x16   : > { %639 = vmatpush.msra.mxu3 %v406_v19  ;;  %580 = vmatpush.msra.mxu0 %v387_v20  ;;  %v341_v33 = vld [vmem:[%s3208_s1 + $0x210] sm:$0xff]  ;;  %v340_v34 = vld [vmem:[%s3208_s1 + $0x208] sm:$0xff]  ;;  %v342_v35 = vld [vmem:[%s3208_s1 + $0x218] sm:$0xff] }
  0x17   : > { %620 = vmatpush.msra.mxu2 %v389_v21  ;;  %600 = vmatpush.msra.mxu1 %v388_v22  ;;  %v323_v36 = vld [vmem:[%s3208_s1 + $0x180] sm:$0xff]  ;;  %v325_v37 = vld [vmem:[%s3208_s1 + $0x190] sm:$0xff]  ;;  %v324_v38 = vld [vmem:[%s3208_s1 + $0x188] sm:$0xff] }
  0x18   : > { %640 = vmatpush.msra.mxu3 %v390_v23  ;;  %581 = vmatpush.msra.mxu0 %v371_v24  ;;  %v326_v39 = vld [vmem:[%s3208_s1 + $0x198] sm:$0xff]  ;;  %v307_v40 = vld [vmem:[%s3208_s1 + $0x100] sm:$0xff]  ;;  %v309_v41 = vld [vmem:[%s3208_s1 + $0x110] sm:$0xff] }
  0x19   : > { %621 = vmatpush.msra.mxu2 %v373_v25  ;;  %601 = vmatpush.msra.mxu1 %v372_v26  ;;  %v308_v42 = vld [vmem:[%s3208_s1 + $0x108] sm:$0xff]  ;;  %v310_v43 = vld [vmem:[%s3208_s1 + $0x118] sm:$0xff]  ;;  %v291_v44 = vld [vmem:[%s3208_s1 + $0x80] sm:$0xff] }
  0x1a   : > { %641 = vmatpush.msra.mxu3 %v374_v27  ;;  %582 = vmatpush.msra.mxu0 %v355_v28  ;;  %v293_v45 = vld [vmem:[%s3208_s1 + $0x90] sm:$0xff]  ;;  %v292_v46 = vld [vmem:[%s3208_s1 + $0x88] sm:$0xff]  ;;  %v294_v47 = vld [vmem:[%s3208_s1 + $0x98] sm:$0xff] }
  0x1b   : > { %622 = vmatpush.msra.mxu2 %v357_v29  ;;  %602 = vmatpush.msra.mxu1 %v356_v30  ;;  %v275_v48 = vld [vmem:[%s3208_s1] sm:$0xff]  ;;  %v277_v49 = vld [vmem:[%s3208_s1 + $0x10] sm:$0xff]  ;;  %v276_v52 = vld [vmem:[%s3208_s1 + $0x8] sm:$0xff] }
  0x1c   : > { %642 = vmatpush.msra.mxu3 %v358_v31  ;;  %583 = vmatpush.msra.mxu0 %v339_v32  ;;  %v471_v50 = vld [vmem:[%s3208_s1 + $0x620] sm:$0xf]  ;;  %v473_v51 = vld [vmem:[%s3208_s1 + $0x630] sm:$0xf]  ;;  %v278_v53 = vld [vmem:[%s3208_s1 + $0x18] sm:$0xff] }
  0x1d   : > { %623 = vmatpush.msra.mxu2 %v341_v33  ;;  %603 = vmatpush.msra.mxu1 %v340_v34  ;;  %v455_v54 = vld [vmem:[%s3208_s1 + $0x5a0] sm:$0xff]  ;;  %v472_v55 = vld [vmem:[%s3208_s1 + $0x628] sm:$0xf]  ;;  %v457_v56 = vld [vmem:[%s3208_s1 + $0x5b0] sm:$0xff] }
  0x1e   : > { %643 = vmatpush.msra.mxu3 %v342_v35  ;;  %584 = vmatpush.msra.mxu0 %v323_v36  ;;  %v474_v57 = vld [vmem:[%s3208_s1 + $0x638] sm:$0xf]  ;;  %v439_v58 = vld [vmem:[%s3208_s1 + $0x520] sm:$0xff]  ;;  %v456_v59 = vld [vmem:[%s3208_s1 + $0x5a8] sm:$0xff] }
  0x1f   : > { %624 = vmatpush.msra.mxu2 %v325_v37  ;;  %604 = vmatpush.msra.mxu1 %v324_v38  ;;  %v441_v60 = vld [vmem:[%s3208_s1 + $0x530] sm:$0xff]  ;;  %v458_v61 = vld [vmem:[%s3208_s1 + $0x5b8] sm:$0xff]  ;;  %v423_v62 = vld [vmem:[%s3208_s1 + $0x4a0] sm:$0xff] }
  0x20   : > { %644 = vmatpush.msra.mxu3 %v326_v39  ;;  %585 = vmatpush.msra.mxu0 %v307_v40  ;;  %v440_v63 = vld [vmem:[%s3208_s1 + $0x528] sm:$0xff]  ;;  %v425_v0 = vld [vmem:[%s3208_s1 + $0x4b0] sm:$0xff]  ;;  %v442_v1 = vld [vmem:[%s3208_s1 + $0x538] sm:$0xff] }
  0x21   : > { %625 = vmatpush.msra.mxu2 %v309_v41  ;;  %605 = vmatpush.msra.mxu1 %v308_v42  ;;  %v407_v2 = vld [vmem:[%s3208_s1 + $0x420] sm:$0xff]  ;;  %v424_v3 = vld [vmem:[%s3208_s1 + $0x4a8] sm:$0xff]  ;;  %v409_v4 = vld [vmem:[%s3208_s1 + $0x430] sm:$0xff] }
  0x22   : > { %645 = vmatpush.msra.mxu3 %v310_v43  ;;  %586 = vmatpush.msra.mxu0 %v291_v44  ;;  %v426_v5 = vld [vmem:[%s3208_s1 + $0x4b8] sm:$0xff]  ;;  %v391_v6 = vld [vmem:[%s3208_s1 + $0x3a0] sm:$0xff]  ;;  %v408_v7 = vld [vmem:[%s3208_s1 + $0x428] sm:$0xff] }
  0x23   : > { %626 = vmatpush.msra.mxu2 %v293_v45  ;;  %606 = vmatpush.msra.mxu1 %v292_v46  ;;  %v393_v8 = vld [vmem:[%s3208_s1 + $0x3b0] sm:$0xff]  ;;  %v410_v9 = vld [vmem:[%s3208_s1 + $0x438] sm:$0xff]  ;;  %v375_v10 = vld [vmem:[%s3208_s1 + $0x320] sm:$0xff] }
  0x24   : > { %646 = vmatpush.msra.mxu3 %v294_v47  ;;  %587 = vmatpush.msra.mxu0 %v275_v48  ;;  %v392_v11 = vld [vmem:[%s3208_s1 + $0x3a8] sm:$0xff]  ;;  %v377_v12 = vld [vmem:[%s3208_s1 + $0x330] sm:$0xff]  ;;  %v394_v13 = vld [vmem:[%s3208_s1 + $0x3b8] sm:$0xff] }
  0x25   : > { %627 = vmatpush.msra.mxu2 %v277_v49  ;;  %607 = vmatpush.msra.mxu1 %v276_v52  ;;  %v1960_v14 = vld [vmem:[%s1945_s8] sm:$0xff]  ;;  %v376_v16 = vld [vmem:[%s3208_s1 + $0x328] sm:$0xff]  ;;  %v361_v17 = vld [vmem:[%s3208_s1 + $0x2b0] sm:$0xff] }
  0x26   : > { %1597 = vmatpush.msk.msrb.mxu0 %vm523_vm0, %v471_v50  ;;  %647 = vmatpush.msra.mxu3 %v278_v53  ;;  %v359_v15 = vld [vmem:[%s3208_s1 + $0x2a0] sm:$0xff]  ;;  %v378_v18 = vld [vmem:[%s3208_s1 + $0x338] sm:$0xff]  ;;  %v360_v20 = vld [vmem:[%s3208_s1 + $0x2a8] sm:$0xff] }
  0x27   : > { %1601 = vmatpush.msk.msrb.mxu2 %vm523_vm0, %v473_v51  ;;  %1599 = vmatpush.msk.msrb.mxu1 %vm523_vm0, %v472_v55  ;;  %v343_v19 = vld [vmem:[%s3208_s1 + $0x220] sm:$0xff]  ;;  %v345_v21 = vld [vmem:[%s3208_s1 + $0x230] sm:$0xff]  ;;  %v362_v22 = vld [vmem:[%s3208_s1 + $0x2b8] sm:$0xff] }
  0x28   : > { %656 = vmatpush.msrb.mxu0 %v455_v54  ;;  %1603 = vmatpush.msk.msrb.mxu3 %vm523_vm0, %v474_v57  ;;  %v327_v23 = vld [vmem:[%s3208_s1 + $0x1a0] sm:$0xff]  ;;  %v344_v24 = vld [vmem:[%s3208_s1 + $0x228] sm:$0xff]  ;;  %v329_v25 = vld [vmem:[%s3208_s1 + $0x1b0] sm:$0xff] }
  0x29   : > { %696 = vmatpush.msrb.mxu2 %v457_v56  ;;  %676 = vmatpush.msrb.mxu1 %v456_v59  ;;  %v346_v26 = vld [vmem:[%s3208_s1 + $0x238] sm:$0xff]  ;;  %v311_v27 = vld [vmem:[%s3208_s1 + $0x120] sm:$0xff]  ;;  %v328_v28 = vld [vmem:[%s3208_s1 + $0x1a8] sm:$0xff] }
  0x2a   : > { %657 = vmatpush.msrb.mxu0 %v439_v58  ;;  %716 = vmatpush.msrb.mxu3 %v458_v61  ;;  %v313_v29 = vld [vmem:[%s3208_s1 + $0x130] sm:$0xff]  ;;  %v330_v30 = vld [vmem:[%s3208_s1 + $0x1b8] sm:$0xff]  ;;  %v295_v31 = vld [vmem:[%s3208_s1 + $0xa0] sm:$0xff] }
  0x2b   : > { %697 = vmatpush.msrb.mxu2 %v441_v60  ;;  %677 = vmatpush.msrb.mxu1 %v440_v63  ;;  %v312_v32 = vld [vmem:[%s3208_s1 + $0x128] sm:$0xff]  ;;  %v297_v33 = vld [vmem:[%s3208_s1 + $0xb0] sm:$0xff]  ;;  %v314_v34 = vld [vmem:[%s3208_s1 + $0x138] sm:$0xff] }
  0x2c   : > { %658 = vmatpush.msrb.mxu0 %v423_v62  ;;  %717 = vmatpush.msrb.mxu3 %v442_v1  ;;  %v279_v35 = vld [vmem:[%s3208_s1 + $0x20] sm:$0xff]  ;;  %v296_v36 = vld [vmem:[%s3208_s1 + $0xa8] sm:$0xff]  ;;  %v281_v37 = vld [vmem:[%s3208_s1 + $0x30] sm:$0xff] }
  0x2d   : > { %698 = vmatpush.msrb.mxu2 %v425_v0  ;;  %678 = vmatpush.msrb.mxu1 %v424_v3  ;;  %v298_v38 = vld [vmem:[%s3208_s1 + $0xb8] sm:$0xff]  ;;  %v475_v39 = vld [vmem:[%s3208_s1 + $0x640] sm:$0xf]  ;;  %v477_v40 = vld [vmem:[%s3208_s1 + $0x650] sm:$0xf] }
  0x2e   : > { %659 = vmatpush.msrb.mxu0 %v407_v2  ;;  %718 = vmatpush.msrb.mxu3 %v426_v5  ;;  %v280_v41 = vld [vmem:[%s3208_s1 + $0x28] sm:$0xff]  ;;  %v282_v42 = vld [vmem:[%s3208_s1 + $0x38] sm:$0xff]  ;;  %v459_v43 = vld [vmem:[%s3208_s1 + $0x5c0] sm:$0xff] }
  0x2f   : > { %699 = vmatpush.msrb.mxu2 %v409_v4  ;;  %679 = vmatpush.msrb.mxu1 %v408_v7  ;;  %v476_v44 = vld [vmem:[%s3208_s1 + $0x648] sm:$0xf]  ;;  %v461_v45 = vld [vmem:[%s3208_s1 + $0x5d0] sm:$0xff]  ;;  %v478_v46 = vld [vmem:[%s3208_s1 + $0x658] sm:$0xf] }
  0x30   : > { %660 = vmatpush.msrb.mxu0 %v391_v6  ;;  %719 = vmatpush.msrb.mxu3 %v410_v9  ;;  %v460_v47 = vld [vmem:[%s3208_s1 + $0x5c8] sm:$0xff]  ;;  %v443_v48 = vld [vmem:[%s3208_s1 + $0x540] sm:$0xff]  ;;  %v445_v49 = vld [vmem:[%s3208_s1 + $0x550] sm:$0xff] }
  0x31   : > { %700 = vmatpush.msrb.mxu2 %v393_v8  ;;  %680 = vmatpush.msrb.mxu1 %v392_v11  ;;  %v462_v50 = vld [vmem:[%s3208_s1 + $0x5d8] sm:$0xff]  ;;  %v427_v51 = vld [vmem:[%s3208_s1 + $0x4c0] sm:$0xff]  ;;  %v444_v52 = vld [vmem:[%s3208_s1 + $0x548] sm:$0xff] }
  0x32   : > { %661 = vmatpush.msrb.mxu0 %v375_v10  ;;  %720 = vmatpush.msrb.mxu3 %v394_v13  ;;  %v429_v53 = vld [vmem:[%s3208_s1 + $0x4d0] sm:$0xff]  ;;  %v446_v54 = vld [vmem:[%s3208_s1 + $0x558] sm:$0xff]  ;;  %v411_v55 = vld [vmem:[%s3208_s1 + $0x440] sm:$0xff] }
  0x33   : > { %701 = vmatpush.msrb.mxu2 %v377_v12  ;;  %1590 = vmatmul.msk.f32.vlgmr.msra.gmra.mxu0 %vm519_vm1, %v1960_v14  ;;  %v428_v56 = vld [vmem:[%s3208_s1 + $0x4c8] sm:$0xff]  ;;  %v413_v57 = vld [vmem:[%s3208_s1 + $0x450] sm:$0xff]  ;;  %v430_v58 = vld [vmem:[%s3208_s1 + $0x4d8] sm:$0xff] }
  0x34   : > { %1594 = vmatmul.msk.f32.vlgmr.msra.gmra.mxu2 %vm519_vm1, %v1960_v14  ;;  %662 = vmatpush.msrb.mxu0 %v359_v15  ;;  %v395_v59 = vld [vmem:[%s3208_s1 + $0x3c0] sm:$0xff]  ;;  %v412_v60 = vld [vmem:[%s3208_s1 + $0x448] sm:$0xff]  ;;  %v397_v61 = vld [vmem:[%s3208_s1 + $0x3d0] sm:$0xff] }
  0x35   : > { %681 = vmatpush.msrb.mxu1 %v376_v16  ;;  %702 = vmatpush.msrb.mxu2 %v361_v17  ;;  %v414_v62 = vld [vmem:[%s3208_s1 + $0x458] sm:$0xff]  ;;  %v379_v63 = vld [vmem:[%s3208_s1 + $0x340] sm:$0xff]  ;;  %v396_v0 = vld [vmem:[%s3208_s1 + $0x3c8] sm:$0xff] }
  0x36   : > { %721 = vmatpush.msrb.mxu3 %v378_v18  ;;  %1592 = vmatmul.msk.f32.vlgmr.msra.gmra.mxu1 %vm519_vm1, %v1960_v14  ;;  %v381_v1 = vld [vmem:[%s3208_s1 + $0x350] sm:$0xff]  ;;  %v398_v2 = vld [vmem:[%s3208_s1 + $0x3d8] sm:$0xff]  ;;  %v363_v3 = vld [vmem:[%s3208_s1 + $0x2c0] sm:$0xff] }
  0x37   : > { %1596 = vmatmul.msk.f32.vlgmr.msra.gmra.mxu3 %vm519_vm1, %v1960_v14  ;;  %663 = vmatpush.msrb.mxu0 %v343_v19  ;;  %v380_v4 = vld [vmem:[%s3208_s1 + $0x348] sm:$0xff]  ;;  %v365_v5 = vld [vmem:[%s3208_s1 + $0x2d0] sm:$0xff]  ;;  %v382_v6 = vld [vmem:[%s3208_s1 + $0x358] sm:$0xff] }
  0x38   : > { %682 = vmatpush.msrb.mxu1 %v360_v20  ;;  %703 = vmatpush.msrb.mxu2 %v345_v21  ;;  %v347_v7 = vld [vmem:[%s3208_s1 + $0x240] sm:$0xff]  ;;  %v364_v8 = vld [vmem:[%s3208_s1 + $0x2c8] sm:$0xff]  ;;  %v349_v9 = vld [vmem:[%s3208_s1 + $0x250] sm:$0xff] }
  0x39   : > { %722 = vmatpush.msrb.mxu3 %v362_v22  ;;  %664 = vmatpush.msrb.mxu0 %v327_v23  ;;  %v366_v10 = vld [vmem:[%s3208_s1 + $0x2d8] sm:$0xff]  ;;  %v331_v11 = vld [vmem:[%s3208_s1 + $0x1c0] sm:$0xff]  ;;  %v348_v12 = vld [vmem:[%s3208_s1 + $0x248] sm:$0xff] }
  0x3a   : > { %683 = vmatpush.msrb.mxu1 %v344_v24  ;;  %704 = vmatpush.msrb.mxu2 %v329_v25  ;;  %v333_v13 = vld [vmem:[%s3208_s1 + $0x1d0] sm:$0xff]  ;;  %v350_v15 = vld [vmem:[%s3208_s1 + $0x258] sm:$0xff]  ;;  %v315_v16 = vld [vmem:[%s3208_s1 + $0x140] sm:$0xff] }
  0x3b   : > { %723 = vmatpush.msrb.mxu3 %v346_v26  ;;  %665 = vmatpush.msrb.mxu0 %v311_v27  ;;  %v332_v17 = vld [vmem:[%s3208_s1 + $0x1c8] sm:$0xff]  ;;  %v317_v18 = vld [vmem:[%s3208_s1 + $0x150] sm:$0xff]  ;;  %v334_v19 = vld [vmem:[%s3208_s1 + $0x1d8] sm:$0xff] }
  0x3c   : > { %684 = vmatpush.msrb.mxu1 %v328_v28  ;;  %705 = vmatpush.msrb.mxu2 %v313_v29  ;;  %v299_v20 = vld [vmem:[%s3208_s1 + $0xc0] sm:$0xff]  ;;  %v316_v21 = vld [vmem:[%s3208_s1 + $0x148] sm:$0xff]  ;;  %v301_v22 = vld [vmem:[%s3208_s1 + $0xd0] sm:$0xff] }
  0x3d   : > { %724 = vmatpush.msrb.mxu3 %v330_v30  ;;  %666 = vmatpush.msrb.mxu0 %v295_v31  ;;  %v318_v23 = vld [vmem:[%s3208_s1 + $0x158] sm:$0xff]  ;;  %v283_v24 = vld [vmem:[%s3208_s1 + $0x40] sm:$0xff]  ;;  %v300_v25 = vld [vmem:[%s3208_s1 + $0xc8] sm:$0xff] }
  0x3e   : > { %685 = vmatpush.msrb.mxu1 %v312_v32  ;;  %706 = vmatpush.msrb.mxu2 %v297_v33  ;;  %v285_v26 = vld [vmem:[%s3208_s1 + $0x50] sm:$0xff]  ;;  %v302_v27 = vld [vmem:[%s3208_s1 + $0xd8] sm:$0xff]  ;;  %v479_v28 = vld [vmem:[%s3208_s1 + $0x660] sm:$0xf] }
  0x3f   : > { %725 = vmatpush.msrb.mxu3 %v314_v34  ;;  %667 = vmatpush.msrb.mxu0 %v279_v35  ;;  %v481_v29 = vld [vmem:[%s3208_s1 + $0x670] sm:$0xf]  ;;  %v284_v30 = vld [vmem:[%s3208_s1 + $0x48] sm:$0xff]  ;;  %v286_v31 = vld [vmem:[%s3208_s1 + $0x58] sm:$0xff] }
  0x40   : > { %686 = vmatpush.msrb.mxu1 %v296_v36  ;;  %707 = vmatpush.msrb.mxu2 %v281_v37  ;;  %v463_v32 = vld [vmem:[%s3208_s1 + $0x5e0] sm:$0xff]  ;;  %v480_v33 = vld [vmem:[%s3208_s1 + $0x668] sm:$0xf]  ;;  %v465_v34 = vld [vmem:[%s3208_s1 + $0x5f0] sm:$0xff] }
  0x41   : > { %726 = vmatpush.msrb.mxu3 %v298_v38  ;;  %1602 = vmatmul.msk.f32.vlgmr.msrb.gmra.mxu2 %vm519_vm1, %v1960_v14  ;;  %v482_v35 = vld [vmem:[%s3208_s1 + $0x678] sm:$0xf]  ;;  %v447_v36 = vld [vmem:[%s3208_s1 + $0x560] sm:$0xff]  ;;  %v464_v37 = vld [vmem:[%s3208_s1 + $0x5e8] sm:$0xff] }
  0x42   : > { %1605 = vmatpush.msk.msra.mxu0 %vm523_vm0, %v475_v39  ;;  %1609 = vmatpush.msk.msra.mxu2 %vm523_vm0, %v477_v40  ;;  %v449_v38 = vld [vmem:[%s3208_s1 + $0x570] sm:$0xff]  ;;  %v466_v39 = vld [vmem:[%s3208_s1 + $0x5f8] sm:$0xff]  ;;  %v431_v40 = vld [vmem:[%s3208_s1 + $0x4e0] sm:$0xff] }
  0x43   : > { %687 = vmatpush.msrb.mxu1 %v280_v41  ;;  %727 = vmatpush.msrb.mxu3 %v282_v42  ;;  %v448_v41 = vld [vmem:[%s3208_s1 + $0x568] sm:$0xff]  ;;  %v433_v42 = vld [vmem:[%s3208_s1 + $0x4f0] sm:$0xff] }
  0x44   : > { %736 = vmatpush.msra.mxu0 %v459_v43  ;;  %1604 = vmatmul.msk.f32.vlgmr.msrb.gmra.mxu3 %vm519_vm1, %v1960_v14  ;;  %v450_v43 = vld [vmem:[%s3208_s1 + $0x578] sm:$0xff] }
  0x45   : > { %1607 = vmatpush.msk.msra.mxu1 %vm523_vm0, %v476_v44  ;;  %776 = vmatpush.msra.mxu2 %v461_v45  ;;  %v415_v44 = vld [vmem:[%s3208_s1 + $0x460] sm:$0xff]  ;;  %v432_v45 = vld [vmem:[%s3208_s1 + $0x4e8] sm:$0xff] }
  0x46   : > { %1611 = vmatpush.msk.msra.mxu3 %vm523_vm0, %v478_v46  ;;  %1598 = vmatmul.msk.f32.vlgmr.msrb.gmra.mxu0 %vm519_vm1, %v1960_v14  ;;  %v417_v46 = vld [vmem:[%s3208_s1 + $0x470] sm:$0xff] }
  0x47   : > { %756 = vmatpush.msra.mxu1 %v460_v47  ;;  %737 = vmatpush.msra.mxu0 %v443_v48  ;;  %v434_v47 = vld [vmem:[%s3208_s1 + $0x4f8] sm:$0xff]  ;;  %v399_v48 = vld [vmem:[%s3208_s1 + $0x3e0] sm:$0xff] }
  0x48   : > { %777 = vmatpush.msra.mxu2 %v445_v49  ;;  %796 = vmatpush.msra.mxu3 %v462_v50  ;;  %v416_v49 = vld [vmem:[%s3208_s1 + $0x468] sm:$0xff]  ;;  %v401_v50 = vld [vmem:[%s3208_s1 + $0x3f0] sm:$0xff] }
  0x49   : > { %1600 = vmatmul.msk.f32.vlgmr.msrb.gmra.mxu1 %vm519_vm1, %v1960_v14  ;;  %738 = vmatpush.msra.mxu0 %v427_v51  ;;  %v418_v51 = vld [vmem:[%s3208_s1 + $0x478] sm:$0xff] }
  0x4a   : > { %757 = vmatpush.msra.mxu1 %v444_v52  ;;  %778 = vmatpush.msra.mxu2 %v429_v53  ;;  %v383_v52 = vld [vmem:[%s3208_s1 + $0x360] sm:$0xff]  ;;  %v400_v53 = vld [vmem:[%s3208_s1 + $0x3e8] sm:$0xff] }
  0x4b   : > { %797 = vmatpush.msra.mxu3 %v446_v54  ;;  %739 = vmatpush.msra.mxu0 %v411_v55  ;;  %v385_v54 = vld [vmem:[%s3208_s1 + $0x370] sm:$0xff]  ;;  %v402_v55 = vld [vmem:[%s3208_s1 + $0x3f8] sm:$0xff] }
  0x4c   : > { %758 = vmatpush.msra.mxu1 %v428_v56  ;;  %779 = vmatpush.msra.mxu2 %v413_v57  ;;  %v367_v56 = vld [vmem:[%s3208_s1 + $0x2e0] sm:$0xff]  ;;  %v384_v57 = vld [vmem:[%s3208_s1 + $0x368] sm:$0xff] }
  0x4d   : > { %798 = vmatpush.msra.mxu3 %v430_v58  ;;  %740 = vmatpush.msra.mxu0 %v395_v59  ;;  %v369_v58 = vld [vmem:[%s3208_s1 + $0x2f0] sm:$0xff]  ;;  %v386_v59 = vld [vmem:[%s3208_s1 + $0x378] sm:$0xff] }
  0x4e   : > { %759 = vmatpush.msra.mxu1 %v412_v60  ;;  %780 = vmatpush.msra.mxu2 %v397_v61  ;;  %v351_v60 = vld [vmem:[%s3208_s1 + $0x260] sm:$0xff]  ;;  %v368_v61 = vld [vmem:[%s3208_s1 + $0x2e8] sm:$0xff] }
  0x4f   : > { %799 = vmatpush.msra.mxu3 %v414_v62  ;;  %741 = vmatpush.msra.mxu0 %v379_v63  ;;  %v353_v62 = vld [vmem:[%s3208_s1 + $0x270] sm:$0xff]  ;;  %v370_v63 = vld [vmem:[%s3208_s1 + $0x2f8] sm:$0xff] }
  0x50   : > { %760 = vmatpush.msra.mxu1 %v396_v0  ;;  %781 = vmatpush.msra.mxu2 %v381_v1  ;;  %v335_v0 = vld [vmem:[%s3208_s1 + $0x1e0] sm:$0xff]  ;;  %v352_v1 = vld [vmem:[%s3208_s1 + $0x268] sm:$0xff] }
  0x51   : > { %800 = vmatpush.msra.mxu3 %v398_v2  ;;  %742 = vmatpush.msra.mxu0 %v363_v3  ;;  %v337_v2 = vld [vmem:[%s3208_s1 + $0x1f0] sm:$0xff]  ;;  %v354_v3 = vld [vmem:[%s3208_s1 + $0x278] sm:$0xff] }
  0x52   : > { %761 = vmatpush.msra.mxu1 %v380_v4  ;;  %782 = vmatpush.msra.mxu2 %v365_v5  ;;  %v319_v4 = vld [vmem:[%s3208_s1 + $0x160] sm:$0xff]  ;;  %v336_v5 = vld [vmem:[%s3208_s1 + $0x1e8] sm:$0xff] }
  0x53   : > { %801 = vmatpush.msra.mxu3 %v382_v6  ;;  %743 = vmatpush.msra.mxu0 %v347_v7  ;;  %v321_v6 = vld [vmem:[%s3208_s1 + $0x170] sm:$0xff]  ;;  %v338_v7 = vld [vmem:[%s3208_s1 + $0x1f8] sm:$0xff] }
  0x54   : > { %762 = vmatpush.msra.mxu1 %v364_v8  ;;  %783 = vmatpush.msra.mxu2 %v349_v9  ;;  %v303_v8 = vld [vmem:[%s3208_s1 + $0xe0] sm:$0xff]  ;;  %v320_v9 = vld [vmem:[%s3208_s1 + $0x168] sm:$0xff] }
  0x55   : > { %802 = vmatpush.msra.mxu3 %v366_v10  ;;  %744 = vmatpush.msra.mxu0 %v331_v11  ;;  %v305_v10 = vld [vmem:[%s3208_s1 + $0xf0] sm:$0xff]  ;;  %v322_v11 = vld [vmem:[%s3208_s1 + $0x178] sm:$0xff] }
  0x56   : > { %763 = vmatpush.msra.mxu1 %v348_v12  ;;  %784 = vmatpush.msra.mxu2 %v333_v13  ;;  %v287_v12 = vld [vmem:[%s3208_s1 + $0x60] sm:$0xff]  ;;  %v304_v13 = vld [vmem:[%s3208_s1 + $0xe8] sm:$0xff] }
  0x57   : > { %803 = vmatpush.msra.mxu3 %v350_v15  ;;  %745 = vmatpush.msra.mxu0 %v315_v16  ;;  %v289_v15 = vld [vmem:[%s3208_s1 + $0x70] sm:$0xff]  ;;  %v306_v16 = vld [vmem:[%s3208_s1 + $0xf8] sm:$0xff] }
  0x58   : > { %764 = vmatpush.msra.mxu1 %v332_v17  ;;  %785 = vmatpush.msra.mxu2 %v317_v18  ;;  %v288_v17 = vld [vmem:[%s3208_s1 + $0x68] sm:$0xff]  ;;  %v290_v18 = vld [vmem:[%s3208_s1 + $0x78] sm:$0xff] }
  0x59   : > { %804 = vmatpush.msra.mxu3 %v334_v19  ;;  %746 = vmatpush.msra.mxu0 %v299_v20  ;;  %v923_v19 = vld [vmem:[%s3210_s3 + $0x78] sm:$0xff] }
  0x5a   : > { %765 = vmatpush.msra.mxu1 %v316_v21  ;;  %786 = vmatpush.msra.mxu2 %v301_v22  ;;  %v939_v20 = vld [vmem:[%s3210_s3 + $0xf8] sm:$0xff] }
  0x5b   : > { %805 = vmatpush.msra.mxu3 %v318_v23  ;;  %747 = vmatpush.msra.mxu0 %v283_v24  ;;  %v955_v21 = vld [vmem:[%s3210_s3 + $0x178] sm:$0xff]  ;;  %v922_v23 = vld [vmem:[%s3210_s3 + $0x70] sm:$0xff] }
  0x5c   : > { %766 = vmatpush.msra.mxu1 %v300_v25  ;;  %787 = vmatpush.msra.mxu2 %v285_v26  ;;  %v971_v22 = vld [vmem:[%s3210_s3 + $0x1f8] sm:$0xff]  ;;  %v938_v24 = vld [vmem:[%s3210_s3 + $0xf0] sm:$0xff] }
  0x5d   : > { %806 = vmatpush.msra.mxu3 %v302_v27  ;;  %1606 = vmatmul.msk.f32.vlgmr.msra.gmra.mxu0 %vm519_vm1, %v1960_v14  ;;  %v954_v25 = vld [vmem:[%s3210_s3 + $0x170] sm:$0xff]  ;;  %v937_v27 = vld [vmem:[%s3210_s3 + $0xe8] sm:$0xff] }
  0x5e   : > { %1610 = vmatmul.msk.f32.vlgmr.msra.gmra.mxu2 %vm519_vm1, %v1960_v14  ;;  %1613 = vmatpush.msk.msrb.mxu0 %vm523_vm0, %v479_v28  ;;  %v970_v26 = vld [vmem:[%s3210_s3 + $0x1f0] sm:$0xff]  ;;  %v953_v28 = vld [vmem:[%s3210_s3 + $0x168] sm:$0xff] }
  0x5f   : > { %1617 = vmatpush.msk.msrb.mxu2 %vm523_vm0, %v481_v29  ;;  %767 = vmatpush.msra.mxu1 %v284_v30  ;;  %v969_v29 = vld [vmem:[%s3210_s3 + $0x1e8] sm:$0xff]  ;;  %v920_v30 = vld [vmem:[%s3210_s3 + $0x60] sm:$0xff] }
  0x60   : > { %807 = vmatpush.msra.mxu3 %v286_v31  ;;  %1608 = vmatmul.msk.f32.vlgmr.msra.gmra.mxu1 %vm519_vm1, %v1960_v14  ;;  %v936_v31 = vld [vmem:[%s3210_s3 + $0xe0] sm:$0xff] }
  0x61   : > { %1612 = vmatmul.msk.f32.vlgmr.msra.gmra.mxu3 %vm519_vm1, %v1960_v14  ;;  %816 = vmatpush.msrb.mxu0 %v463_v32  ;;  %v952_v32 = vld [vmem:[%s3210_s3 + $0x160] sm:$0xff] }
  0x62   : > { %1615 = vmatpush.msk.msrb.mxu1 %vm523_vm0, %v480_v33  ;;  %856 = vmatpush.msrb.mxu2 %v465_v34  ;;  %v968_v33 = vld [vmem:[%s3210_s3 + $0x1e0] sm:$0xff]  ;;  %v919_v34 = vld [vmem:[%s3210_s3 + $0x58] sm:$0xff] }
  0x63   : > { %1619 = vmatpush.msk.msrb.mxu3 %vm523_vm0, %v482_v35  ;;  %817 = vmatpush.msrb.mxu0 %v447_v36  ;;  %v935_v35 = vld [vmem:[%s3210_s3 + $0xd8] sm:$0xff] }
  0x64   : > { %836 = vmatpush.msrb.mxu1 %v464_v37  ;;  %857 = vmatpush.msrb.mxu2 %v449_v38  ;;  %v951_v36 = vld [vmem:[%s3210_s3 + $0x158] sm:$0xff]  ;;  %v918_v38 = vld [vmem:[%s3210_s3 + $0x50] sm:$0xff] }
  0x65   : > { %876 = vmatpush.msrb.mxu3 %v466_v39  ;;  %818 = vmatpush.msrb.mxu0 %v431_v40  ;;  %v967_v37 = vld [vmem:[%s3210_s3 + $0x1d8] sm:$0xff]  ;;  %v934_v39 = vld [vmem:[%s3210_s3 + $0xd0] sm:$0xff] }
  0x66   : > { %837 = vmatpush.msrb.mxu1 %v448_v41  ;;  %858 = vmatpush.msrb.mxu2 %v433_v42  ;;  %v950_v40 = vld [vmem:[%s3210_s3 + $0x150] sm:$0xff]  ;;  %v917_v42 = vld [vmem:[%s3210_s3 + $0x48] sm:$0xff] }
  0x67   : > { %877 = vmatpush.msrb.mxu3 %v450_v43  ;;  %819 = vmatpush.msrb.mxu0 %v415_v44  ;;  %v966_v41 = vld [vmem:[%s3210_s3 + $0x1d0] sm:$0xff]  ;;  %v933_v43 = vld [vmem:[%s3210_s3 + $0xc8] sm:$0xff] }
  0x68   : > { %838 = vmatpush.msrb.mxu1 %v432_v45  ;;  %859 = vmatpush.msrb.mxu2 %v417_v46  ;;  %v949_v44 = vld [vmem:[%s3210_s3 + $0x148] sm:$0xff]  ;;  %v916_v46 = vld [vmem:[%s3210_s3 + $0x40] sm:$0xff] }
  0x69   : > { %878 = vmatpush.msrb.mxu3 %v434_v47  ;;  %820 = vmatpush.msrb.mxu0 %v399_v48  ;;  %v965_v45 = vld [vmem:[%s3210_s3 + $0x1c8] sm:$0xff]  ;;  %v932_v47 = vld [vmem:[%s3210_s3 + $0xc0] sm:$0xff] }
  0x6a   : > { %839 = vmatpush.msrb.mxu1 %v416_v49  ;;  %860 = vmatpush.msrb.mxu2 %v401_v50  ;;  %v948_v48 = vld [vmem:[%s3210_s3 + $0x140] sm:$0xff]  ;;  %v915_v50 = vld [vmem:[%s3210_s3 + $0x38] sm:$0xff] }
  0x6b   : > { %879 = vmatpush.msrb.mxu3 %v418_v51  ;;  %821 = vmatpush.msrb.mxu0 %v383_v52  ;;  %v964_v49 = vld [vmem:[%s3210_s3 + $0x1c0] sm:$0xff]  ;;  %v931_v51 = vld [vmem:[%s3210_s3 + $0xb8] sm:$0xff] }
  0x6c   : > { %840 = vmatpush.msrb.mxu1 %v400_v53  ;;  %861 = vmatpush.msrb.mxu2 %v385_v54  ;;  %v947_v52 = vld [vmem:[%s3210_s3 + $0x138] sm:$0xff]  ;;  %v914_v54 = vld [vmem:[%s3210_s3 + $0x30] sm:$0xff] }
  0x6d   : > { %880 = vmatpush.msrb.mxu3 %v402_v55  ;;  %822 = vmatpush.msrb.mxu0 %v367_v56  ;;  %v963_v53 = vld [vmem:[%s3210_s3 + $0x1b8] sm:$0xff]  ;;  %v930_v55 = vld [vmem:[%s3210_s3 + $0xb0] sm:$0xff] }
  0x6e   : > { %841 = vmatpush.msrb.mxu1 %v384_v57  ;;  %862 = vmatpush.msrb.mxu2 %v369_v58  ;;  %v946_v56 = vld [vmem:[%s3210_s3 + $0x130] sm:$0xff]  ;;  %v913_v58 = vld [vmem:[%s3210_s3 + $0x28] sm:$0xff] }
  0x6f   : > { %881 = vmatpush.msrb.mxu3 %v386_v59  ;;  %823 = vmatpush.msrb.mxu0 %v351_v60  ;;  %v962_v57 = vld [vmem:[%s3210_s3 + $0x1b0] sm:$0xff]  ;;  %v929_v59 = vld [vmem:[%s3210_s3 + $0xa8] sm:$0xff] }
  0x70   : > { %842 = vmatpush.msrb.mxu1 %v368_v61  ;;  %863 = vmatpush.msrb.mxu2 %v353_v62  ;;  %v945_v60 = vld [vmem:[%s3210_s3 + $0x128] sm:$0xff]  ;;  %v912_v62 = vld [vmem:[%s3210_s3 + $0x20] sm:$0xff] }
  0x71   : > { %882 = vmatpush.msrb.mxu3 %v370_v63  ;;  %824 = vmatpush.msrb.mxu0 %v335_v0  ;;  %v961_v61 = vld [vmem:[%s3210_s3 + $0x1a8] sm:$0xff]  ;;  %v928_v63 = vld [vmem:[%s3210_s3 + $0xa0] sm:$0xff] }
  0x72   : > { %843 = vmatpush.msrb.mxu1 %v352_v1  ;;  %864 = vmatpush.msrb.mxu2 %v337_v2  ;;  %v944_v0 = vld [vmem:[%s3210_s3 + $0x120] sm:$0xff]  ;;  %v911_v2 = vld [vmem:[%s3210_s3 + $0x18] sm:$0xff] }
  0x73   : > { %883 = vmatpush.msrb.mxu3 %v354_v3  ;;  %825 = vmatpush.msrb.mxu0 %v319_v4  ;;  %v960_v1 = vld [vmem:[%s3210_s3 + $0x1a0] sm:$0xff]  ;;  %v927_v3 = vld [vmem:[%s3210_s3 + $0x98] sm:$0xff] }
  0x74   : > { %844 = vmatpush.msrb.mxu1 %v336_v5  ;;  %865 = vmatpush.msrb.mxu2 %v321_v6  ;;  %v943_v4 = vld [vmem:[%s3210_s3 + $0x118] sm:$0xff]  ;;  %v910_v6 = vld [vmem:[%s3210_s3 + $0x10] sm:$0xff] }
  0x75   : > { %884 = vmatpush.msrb.mxu3 %v338_v7  ;;  %826 = vmatpush.msrb.mxu0 %v303_v8  ;;  %v959_v5 = vld [vmem:[%s3210_s3 + $0x198] sm:$0xff]  ;;  %v926_v7 = vld [vmem:[%s3210_s3 + $0x90] sm:$0xff] }
  0x76   : > { %845 = vmatpush.msrb.mxu1 %v320_v9  ;;  %866 = vmatpush.msrb.mxu2 %v305_v10  ;;  %v942_v8 = vld [vmem:[%s3210_s3 + $0x110] sm:$0xff]  ;;  %v909_v10 = vld [vmem:[%s3210_s3 + $0x8] sm:$0xff] }
  0x77   : > { %885 = vmatpush.msrb.mxu3 %v322_v11  ;;  %827 = vmatpush.msrb.mxu0 %v287_v12  ;;  %v958_v9 = vld [vmem:[%s3210_s3 + $0x190] sm:$0xff]  ;;  %v925_v11 = vld [vmem:[%s3210_s3 + $0x88] sm:$0xff] }
  0x78   : > { %846 = vmatpush.msrb.mxu1 %v304_v13  ;;  %867 = vmatpush.msrb.mxu2 %v289_v15  ;;  %v941_v12 = vld [vmem:[%s3210_s3 + $0x108] sm:$0xff]  ;;  %v908_v15 = vld [vmem:[%s3210_s3] sm:$0xff] }
  0x79   : > { %886 = vmatpush.msrb.mxu3 %v306_v16  ;;  %1614 = vmatmul.msk.f32.vlgmr.msrb.gmra.mxu0 %vm519_vm1, %v1960_v14  ;;  %v957_v13 = vld [vmem:[%s3210_s3 + $0x188] sm:$0xff]  ;;  %v924_v16 = vld [vmem:[%s3210_s3 + $0x80] sm:$0xff] }
  0x7a   : > { %1618 = vmatmul.msk.f32.vlgmr.msrb.gmra.mxu2 %vm519_vm1, %v1960_v14  ;;  %847 = vmatpush.msrb.mxu1 %v288_v17  ;;  %v987_v17 = vld [vmem:[%s3210_s3 + $0x278] sm:$0xff] }
  0x7b   : > { %887 = vmatpush.msrb.mxu3 %v290_v18  ;;  %1616 = vmatmul.msk.f32.vlgmr.msrb.gmra.mxu1 %vm519_vm1, %v1960_v14  ;;  %v1003_v18 = vld [vmem:[%s3210_s3 + $0x2f8] sm:$0xff] }
  0x7c   : > { %1620 = vmatmul.msk.f32.vlgmr.msrb.gmra.mxu3 %vm519_vm1, %v1960_v14  ;;  %1168 = vmatpush.msra.mxu0 %v923_v19  ;;  %v921_v14 = vld [vmem:[%s3210_s3 + $0x68] sm:$0xff]  ;;  %v940_v19 = vld [vmem:[%s3210_s3 + $0x100] sm:$0xff] }
  0x7d   : > { %1188 = vmatpush.msra.mxu1 %v939_v20  ;;  %1208 = vmatpush.msra.mxu2 %v955_v21  ;;  %v956_v20 = vld [vmem:[%s3210_s3 + $0x180] sm:$0xff]  ;;  %v986_v21 = vld [vmem:[%s3210_s3 + $0x270] sm:$0xff] }
  0x7e   : > { %1228 = vmatpush.msra.mxu3 %v971_v22  ;;  %1169 = vmatpush.msra.mxu0 %v922_v23  ;;  %v1002_v22 = vld [vmem:[%s3210_s3 + $0x2f0] sm:$0xff]  ;;  %v1019_v23 = vld [vmem:[%s3210_s3 + $0x378] sm:$0xff] }
  0x7f   : > { %1189 = vmatpush.msra.mxu1 %v938_v24  ;;  %1209 = vmatpush.msra.mxu2 %v954_v25  ;;  %v1035_v24 = vld [vmem:[%s3210_s3 + $0x3f8] sm:$0xff]  ;;  %v985_v25 = vld [vmem:[%s3210_s3 + $0x268] sm:$0xff] }
  0x80   : > { %1229 = vmatpush.msra.mxu3 %v970_v26  ;;  %1170 = vmatpush.msra.mxu0 %v921_v14  ;;  %v1001_v26 = vld [vmem:[%s3210_s3 + $0x2e8] sm:$0xff]  ;;  %v1018_v14 = vld [vmem:[%s3210_s3 + $0x370] sm:$0xff] }
  0x81   : > { %1190 = vmatpush.msra.mxu1 %v937_v27  ;;  %1210 = vmatpush.msra.mxu2 %v953_v28  ;;  %v1034_v27 = vld [vmem:[%s3210_s3 + $0x3f0] sm:$0xff]  ;;  %v984_v28 = vld [vmem:[%s3210_s3 + $0x260] sm:$0xff] }
  0x82   : > { %1230 = vmatpush.msra.mxu3 %v969_v29  ;;  %1171 = vmatpush.msra.mxu0 %v920_v30  ;;  %v1000_v29 = vld [vmem:[%s3210_s3 + $0x2e0] sm:$0xff]  ;;  %v1017_v30 = vld [vmem:[%s3210_s3 + $0x368] sm:$0xff] }
  0x83   : > { %1191 = vmatpush.msra.mxu1 %v936_v31  ;;  %1211 = vmatpush.msra.mxu2 %v952_v32  ;;  %v1033_v31 = vld [vmem:[%s3210_s3 + $0x3e8] sm:$0xff]  ;;  %v983_v32 = vld [vmem:[%s3210_s3 + $0x258] sm:$0xff] }
  0x84   : > { %1231 = vmatpush.msra.mxu3 %v968_v33  ;;  %1172 = vmatpush.msra.mxu0 %v919_v34  ;;  %v999_v33 = vld [vmem:[%s3210_s3 + $0x2d8] sm:$0xff]  ;;  %v1016_v34 = vld [vmem:[%s3210_s3 + $0x360] sm:$0xff] }
  0x85   : > { %1192 = vmatpush.msra.mxu1 %v935_v35  ;;  %1212 = vmatpush.msra.mxu2 %v951_v36  ;;  %v1032_v35 = vld [vmem:[%s3210_s3 + $0x3e0] sm:$0xff]  ;;  %v982_v36 = vld [vmem:[%s3210_s3 + $0x250] sm:$0xff] }
  0x86   : > { %1232 = vmatpush.msra.mxu3 %v967_v37  ;;  %1173 = vmatpush.msra.mxu0 %v918_v38  ;;  %v998_v37 = vld [vmem:[%s3210_s3 + $0x2d0] sm:$0xff]  ;;  %v1015_v38 = vld [vmem:[%s3210_s3 + $0x358] sm:$0xff] }
  0x87   : > { %1193 = vmatpush.msra.mxu1 %v934_v39  ;;  %1213 = vmatpush.msra.mxu2 %v950_v40  ;;  %v1031_v39 = vld [vmem:[%s3210_s3 + $0x3d8] sm:$0xff]  ;;  %v981_v40 = vld [vmem:[%s3210_s3 + $0x248] sm:$0xff] }
  0x88   : > { %1233 = vmatpush.msra.mxu3 %v966_v41  ;;  %1174 = vmatpush.msra.mxu0 %v917_v42  ;;  %v997_v41 = vld [vmem:[%s3210_s3 + $0x2c8] sm:$0xff]  ;;  %v1014_v42 = vld [vmem:[%s3210_s3 + $0x350] sm:$0xff] }
  0x89   : > { %1194 = vmatpush.msra.mxu1 %v933_v43  ;;  %1214 = vmatpush.msra.mxu2 %v949_v44  ;;  %v1030_v43 = vld [vmem:[%s3210_s3 + $0x3d0] sm:$0xff]  ;;  %v980_v44 = vld [vmem:[%s3210_s3 + $0x240] sm:$0xff] }
  0x8a   : > { %1234 = vmatpush.msra.mxu3 %v965_v45  ;;  %1175 = vmatpush.msra.mxu0 %v916_v46  ;;  %v996_v45 = vld [vmem:[%s3210_s3 + $0x2c0] sm:$0xff]  ;;  %v1013_v46 = vld [vmem:[%s3210_s3 + $0x348] sm:$0xff] }
  0x8b   : > { %1195 = vmatpush.msra.mxu1 %v932_v47  ;;  %1215 = vmatpush.msra.mxu2 %v948_v48  ;;  %v1029_v47 = vld [vmem:[%s3210_s3 + $0x3c8] sm:$0xff]  ;;  %v979_v48 = vld [vmem:[%s3210_s3 + $0x238] sm:$0xff] }
  0x8c   : > { %1235 = vmatpush.msra.mxu3 %v964_v49  ;;  %1176 = vmatpush.msra.mxu0 %v915_v50  ;;  %v995_v49 = vld [vmem:[%s3210_s3 + $0x2b8] sm:$0xff]  ;;  %v1012_v50 = vld [vmem:[%s3210_s3 + $0x340] sm:$0xff] }
  0x8d   : > { %1196 = vmatpush.msra.mxu1 %v931_v51  ;;  %1216 = vmatpush.msra.mxu2 %v947_v52  ;;  %v1028_v51 = vld [vmem:[%s3210_s3 + $0x3c0] sm:$0xff]  ;;  %v978_v52 = vld [vmem:[%s3210_s3 + $0x230] sm:$0xff] }
  0x8e   : > { %1236 = vmatpush.msra.mxu3 %v963_v53  ;;  %1177 = vmatpush.msra.mxu0 %v914_v54  ;;  %v994_v53 = vld [vmem:[%s3210_s3 + $0x2b0] sm:$0xff]  ;;  %v2695_v54 = vld [vmem:[%s3209_s2] sm:$0xff] }
  0x8f   : > { %1197 = vmatpush.msra.mxu1 %v930_v55  ;;  %1217 = vmatpush.msra.mxu2 %v946_v56  ;;  %v1011_v55 = vld [vmem:[%s3210_s3 + $0x338] sm:$0xff] }
  0x90   : > { %1237 = vmatpush.msra.mxu3 %v962_v57  ;;  %1178 = vmatpush.msra.mxu0 %v913_v58  ;;  %v1027_v56 = vld [vmem:[%s3210_s3 + $0x3b8] sm:$0xff]  ;;  %v977_v57 = vld [vmem:[%s3210_s3 + $0x228] sm:$0xff] }
  0x91   : > { %1198 = vmatpush.msra.mxu1 %v929_v59  ;;  %1218 = vmatpush.msra.mxu2 %v945_v60  ;;  %v993_v58 = vld [vmem:[%s3210_s3 + $0x2a8] sm:$0xff]  ;;  %v1010_v59 = vld [vmem:[%s3210_s3 + $0x330] sm:$0xff]  ;;  %v487_v60 = vperm.slane %v2695_v54, 0 }
  0x92   : > { %1238 = vmatpush.msra.mxu3 %v961_v61  ;;  %1179 = vmatpush.msra.mxu0 %v912_v62  ;;  %v1026_v61 = vld [vmem:[%s3210_s3 + $0x3b0] sm:$0xff]  ;;  %v976_v62 = vld [vmem:[%s3210_s3 + $0x220] sm:$0xff] }
  0x93   : > { %1199 = vmatpush.msra.mxu1 %v928_v63  ;;  %1219 = vmatpush.msra.mxu2 %v944_v0  ;;  %v992_v63 = vld [vmem:[%s3210_s3 + $0x2a0] sm:$0xff]  ;;  %v1009_v0 = vld [vmem:[%s3210_s3 + $0x328] sm:$0xff] }
  0x94   : > { %1239 = vmatpush.msra.mxu3 %v960_v1  ;;  %1180 = vmatpush.msra.mxu0 %v911_v2  ;;  %v1025_v1 = vld [vmem:[%s3210_s3 + $0x3a8] sm:$0xff]  ;;  %v975_v2 = vld [vmem:[%s3210_s3 + $0x218] sm:$0xff] }
  0x95   : > { %1200 = vmatpush.msra.mxu1 %v927_v3  ;;  %1220 = vmatpush.msra.mxu2 %v943_v4  ;;  %v991_v4 = vld [vmem:[%s3210_s3 + $0x298] sm:$0xff] }
  0x96   : > { %1240 = vmatpush.msra.mxu3 %v959_v5  ;;  %1181 = vmatpush.msra.mxu0 %v910_v6  ;;  %v488_v5 = vperm.slane %v2695_v54, 1 }
  0x97   : > { %1201 = vmatpush.msra.mxu1 %v926_v7  ;;  %1221 = vmatpush.msra.mxu2 %v942_v8  ;;  %v1008_v7 = vld [vmem:[%s3210_s3 + $0x320] sm:$0xff] }
  0x98   : > { %1241 = vmatpush.msra.mxu3 %v958_v9  ;;  %1182 = vmatpush.msra.mxu0 %v909_v10  ;;  %v1024_v8 = vld [vmem:[%s3210_s3 + $0x3a0] sm:$0xff]  ;;  %v974_v9 = vld [vmem:[%s3210_s3 + $0x210] sm:$0xff] }
  0x99   : > { %1202 = vmatpush.msra.mxu1 %v925_v11  ;;  %1222 = vmatpush.msra.mxu2 %v941_v12  ;;  %v990_v10 = vld [vmem:[%s3210_s3 + $0x290] sm:$0xff] }
  0x9a   : > { %1242 = vmatpush.msra.mxu3 %v957_v13  ;;  %1183 = vmatpush.msra.mxu0 %v908_v15  ;;  %v1007_v13 = vld [vmem:[%s3210_s3 + $0x318] sm:$0xff]  ;;  %v489_v15 = vperm.slane %v2695_v54, 2 }
  0x9b   : > { %1203 = vmatpush.msra.mxu1 %v924_v16  ;;  %1223 = vmatpush.msra.mxu2 %v940_v19  ;;  %v1006_v19 = vld [vmem:[%s3210_s3 + $0x310] sm:$0xff] }
  0x9c   : > { %1248 = vmatpush.msrb.mxu0 %v987_v17  ;;  %1243 = vmatpush.msra.mxu3 %v956_v20  ;;  %v973_v17 = vld [vmem:[%s3210_s3 + $0x208] sm:$0xff]  ;;  %v1023_v20 = vld [vmem:[%s3210_s3 + $0x398] sm:$0xff] }
  0x9d   : > { %1268 = vmatpush.msrb.mxu1 %v1003_v18  ;;  %1288 = vmatpush.msrb.mxu2 %v1019_v23  ;;  %v989_v18 = vld [vmem:[%s3210_s3 + $0x288] sm:$0xff] }
  0x9e   : > { %1249 = vmatpush.msrb.mxu0 %v986_v21  ;;  %1308 = vmatpush.msrb.mxu3 %v1035_v24  ;;  %v988_v24 = vld [vmem:[%s3210_s3 + $0x280] sm:$0xff] }
  0x9f   : > { %1269 = vmatpush.msrb.mxu1 %v1002_v22  ;;  %1289 = vmatpush.msrb.mxu2 %v1018_v14  ;;  %v972_v22 = vld [vmem:[%s3210_s3 + $0x200] sm:$0xff] }
  0xa0   : > { %1250 = vmatpush.msrb.mxu0 %v985_v25  ;;  %1309 = vmatpush.msrb.mxu3 %v1034_v27  ;;  %v490_v25 = vperm.slane %v2695_v54, 3  ;;  %v1067_v27 = vld [vmem:[%s3210_s3 + $0x4f8] sm:$0xff] }
  0xa1   : > { %1270 = vmatpush.msrb.mxu1 %v1001_v26  ;;  %1290 = vmatpush.msrb.mxu2 %v1017_v30  ;;  %v1051_v26 = vld [vmem:[%s3210_s3 + $0x478] sm:$0xff] }
  0xa2   : > { %1251 = vmatpush.msrb.mxu0 %v984_v28  ;;  %1310 = vmatpush.msrb.mxu3 %v1033_v31  ;;  %v1005_v28 = vld [vmem:[%s3210_s3 + $0x308] sm:$0xff]  ;;  %v1022_v31 = vld [vmem:[%s3210_s3 + $0x390] sm:$0xff] }
  0xa3   : > { %1271 = vmatpush.msrb.mxu1 %v1000_v29  ;;  %1291 = vmatpush.msrb.mxu2 %v1016_v34  ;;  %v1050_v29 = vld [vmem:[%s3210_s3 + $0x470] sm:$0xff]  ;;  %v1004_v34 = vld [vmem:[%s3210_s3 + $0x300] sm:$0xff] }
  0xa4   : > { %1252 = vmatpush.msrb.mxu0 %v983_v32  ;;  %1311 = vmatpush.msrb.mxu3 %v1032_v35 }
  0xa5   : > { %1272 = vmatpush.msrb.mxu1 %v999_v33  ;;  %1292 = vmatpush.msrb.mxu2 %v1015_v38  ;;  %v1066_v33 = vld [vmem:[%s3210_s3 + $0x4f0] sm:$0xff]  ;;  %v1065_v38 = vld [vmem:[%s3210_s3 + $0x4e8] sm:$0xff] }
  0xa6   : > { %1253 = vmatpush.msrb.mxu0 %v982_v36  ;;  %1312 = vmatpush.msrb.mxu3 %v1031_v39  ;;  %v1049_v36 = vld [vmem:[%s3210_s3 + $0x468] sm:$0xff]  ;;  %v1048_v39 = vld [vmem:[%s3210_s3 + $0x460] sm:$0xff] }
  0xa7   : > { %1273 = vmatpush.msrb.mxu1 %v998_v37  ;;  %1293 = vmatpush.msrb.mxu2 %v1014_v42  ;;  %v1021_v37 = vld [vmem:[%s3210_s3 + $0x388] sm:$0xff]  ;;  %v1020_v42 = vld [vmem:[%s3210_s3 + $0x380] sm:$0xff] }
  0xa8   : > { %1254 = vmatpush.msrb.mxu0 %v981_v40  ;;  %1313 = vmatpush.msrb.mxu3 %v1030_v43  ;;  %v1083_v40 = vld [vmem:[%s3210_s3 + $0x578] sm:$0xff]  ;;  %v1064_v43 = vld [vmem:[%s3210_s3 + $0x4e0] sm:$0xff] }
  0xa9   : > { %1274 = vmatpush.msrb.mxu1 %v997_v41  ;;  %1294 = vmatpush.msrb.mxu2 %v1013_v46  ;;  %v1099_v46 = vld [vmem:[%s3210_s3 + $0x5f8] sm:$0xff] }
  0xaa   : > { %1255 = vmatpush.msrb.mxu0 %v980_v44  ;;  %1314 = vmatpush.msrb.mxu3 %v1029_v47  ;;  %v1047_v44 = vld [vmem:[%s3210_s3 + $0x458] sm:$0xff]  ;;  %v491_v47 = vperm.slane %v2695_v54, 4 }
  0xab   : > { %1275 = vmatpush.msrb.mxu1 %v996_v45  ;;  %1295 = vmatpush.msrb.mxu2 %v1012_v50  ;;  %v1082_v45 = vld [vmem:[%s3210_s3 + $0x570] sm:$0xff]  ;;  %v493_v50 = vperm.slane %v2695_v54, 6 }
  0xac   : > { %1256 = vmatpush.msrb.mxu0 %v979_v48  ;;  %1315 = vmatpush.msrb.mxu3 %v1028_v51  ;;  %v1046_v48 = vld [vmem:[%s3210_s3 + $0x450] sm:$0xff]  ;;  %v1081_v51 = vld [vmem:[%s3210_s3 + $0x568] sm:$0xff] }
  0xad   : > { %1276 = vmatpush.msrb.mxu1 %v995_v49  ;;  %1296 = vmatpush.msrb.mxu2 %v1011_v55  ;;  %v1063_v49 = vld [vmem:[%s3210_s3 + $0x4d8] sm:$0xff] }
  0xae   : > { %1257 = vmatpush.msrb.mxu0 %v978_v52  ;;  %1316 = vmatpush.msrb.mxu3 %v1027_v56  ;;  %v1098_v52 = vld [vmem:[%s3210_s3 + $0x5f0] sm:$0xff]  ;;  %v1045_v56 = vld [vmem:[%s3210_s3 + $0x448] sm:$0xff] }
  0xaf   : > { %1277 = vmatpush.msrb.mxu1 %v994_v53  ;;  %1297 = vmatpush.msrb.mxu2 %v1010_v59  ;;  %v492_v53 = vperm.slane %v2695_v54, 5  ;;  %v1080_v59 = vld [vmem:[%s3210_s3 + $0x560] sm:$0xff] }
  0xb0   : > { %1258 = vmatpush.msrb.mxu0 %v977_v57  ;;  %v589_v3 = vpop.f32.mrf.mxu0  ;;  %1317 = vmatpush.msrb.mxu3 %v1026_v61  ;;  %v1062_v57 = vld [vmem:[%s3210_s3 + $0x4d0] sm:$0xff] }
  0xb1   : > { %1278 = vmatpush.msrb.mxu1 %v993_v58  ;;  %v590_v6 = vadd.f32 %v589_v3, %v487_v60  ;;  %1298 = vmatpush.msrb.mxu2 %v1009_v0  ;;  %v1097_v60 = vld [vmem:[%s3210_s3 + $0x5e8] sm:$0xff] }
  0xb2   : > { %1259 = vmatpush.msrb.mxu0 %v976_v62  ;;  %1318 = vmatpush.msrb.mxu3 %v1025_v1  ;;  %v494_v62 = vperm.slane %v2695_v54, 7  ;;  %v1044_v1 = vld [vmem:[%s3210_s3 + $0x440] sm:$0xff]  ;;  %v1079_v54 = vld [vmem:[%s3210_s3 + $0x558] sm:$0xff] }
  0xb3   : > { %1279 = vmatpush.msrb.mxu1 %v992_v63  ;;  %v892_v11 = vmax.f32 %v590_v6, 0.0  ;;  %v609_v12 = vpop.f32.mrf.mxu1  ;;  %1299 = vmatpush.msrb.mxu2 %v1008_v7  ;;  %v1060_v7 = vld [vmem:[%s3210_s3 + $0x4c0] sm:$0xff] }
  0xb4   : > { %1260 = vmatpush.msrb.mxu0 %v975_v2  ;;  %v610_v16 = vadd.f32 %v609_v12, %v488_v5  ;;  %1319 = vmatpush.msrb.mxu3 %v1024_v8  ;;  %v1061_v2 = vld [vmem:[%s3210_s3 + $0x4c8] sm:$0xff]  ;;  %v1096_v5 = vld [vmem:[%s3210_s3 + $0x5e0] sm:$0xff] }
  0xb5   : > { %1280 = vmatpush.msrb.mxu1 %v991_v4  ;;  %1300 = vmatpush.msrb.mxu2 %v1007_v13  ;;  %v1095_v13 = vld [vmem:[%s3210_s3 + $0x5d8] sm:$0xff] }
  0xb6   : > { %1261 = vmatpush.msrb.mxu0 %v974_v9  ;;  %v893_v21 = vmax.f32 %v610_v16, 0.0  ;;  %1320 = vmatpush.msrb.mxu3 %v1023_v20  ;;  %v1059_v16 = vld [vmem:[%s3210_s3 + $0x4b8] sm:$0xff]  ;;  %v1041_v20 = vld [vmem:[%s3210_s3 + $0x428] sm:$0xff] }
  0xb7   : > { %1281 = vmatpush.msrb.mxu1 %v990_v10  ;;  %1184 = vmatmul.f32.vlgmr.msra.gmra.mxu0 %v892_v11  ;;  %v629_v23 = vpop.f32.mrf.mxu2  ;;  %v1043_v10 = vld [vmem:[%s3210_s3 + $0x438] sm:$0xff]  ;;  %v1078_v11 = vld [vmem:[%s3210_s3 + $0x550] sm:$0xff] }
  0xb8   : > { %1262 = vmatpush.msrb.mxu0 %v973_v17  ;;  %v630_v14 = vadd.f32 %v629_v23, %v489_v15  ;;  %1301 = vmatpush.msrb.mxu2 %v1006_v19  ;;  %v1042_v15 = vld [vmem:[%s3210_s3 + $0x430] sm:$0xff]  ;;  %v1077_v17 = vld [vmem:[%s3210_s3 + $0x548] sm:$0xff] }
  0xb9   : > { %1282 = vmatpush.msrb.mxu1 %v989_v18  ;;  %1321 = vmatpush.msrb.mxu3 %v1022_v31  ;;  %v1094_v19 = vld [vmem:[%s3210_s3 + $0x5d0] sm:$0xff]  ;;  %v1093_v23 = vld [vmem:[%s3210_s3 + $0x5c8] sm:$0xff] }
  0xba   : > { %1263 = vmatpush.msrb.mxu0 %v972_v22  ;;  %v649_v30 = vpop.f32.mrf.mxu3  ;;  %1204 = vmatmul.f32.vlgmr.msra.gmra.mxu1 %v893_v21  ;;  %v894_v35 = vmax.f32 %v630_v14, 0.0  ;;  %v1058_v21 = vld [vmem:[%s3210_s3 + $0x4b0] sm:$0xff]  ;;  %v1076_v22 = vld [vmem:[%s3210_s3 + $0x540] sm:$0xff] }
  0xbb   : > { %1283 = vmatpush.msrb.mxu1 %v988_v24  ;;  %v650_v32 = vadd.f32 %v649_v30, %v490_v25  ;;  %1302 = vmatpush.msrb.mxu2 %v1005_v28  ;;  %v1040_v24 = vld [vmem:[%s3210_s3 + $0x420] sm:$0xff]  ;;  %v1057_v25 = vld [vmem:[%s3210_s3 + $0x4a8] sm:$0xff]  ;;  %v1091_v30 = vld [vmem:[%s3210_s3 + $0x5b8] sm:$0xff] }
  0xbc   : > { %1328 = vmatpush.msra.mxu0 %v1051_v26  ;;  %1322 = vmatpush.msrb.mxu3 %v1021_v37  ;;  %v1075_v26 = vld [vmem:[%s3210_s3 + $0x538] sm:$0xff]  ;;  %v1092_v14 = vld [vmem:[%s3210_s3 + $0x5c0] sm:$0xff]  ;;  %v1038_v31 = vld [vmem:[%s3210_s3 + $0x410] sm:$0xff] }
  0xbd   : > { %1348 = vmatpush.msra.mxu1 %v1067_v27  ;;  %1303 = vmatpush.msrb.mxu2 %v1004_v34  ;;  %v895_v41 = vmax.f32 %v650_v32, 0.0  ;;  %v1039_v27 = vld [vmem:[%s3210_s3 + $0x418] sm:$0xff]  ;;  %v1056_v28 = vld [vmem:[%s3210_s3 + $0x4a0] sm:$0xff]  ;;  %v1090_v34 = vld [vmem:[%s3210_s3 + $0x5b0] sm:$0xff] }
  0xbe   : > { %1329 = vmatpush.msra.mxu0 %v1050_v29  ;;  %1224 = vmatmul.f32.vlgmr.msra.gmra.mxu2 %v894_v35  ;;  %v1074_v29 = vld [vmem:[%s3210_s3 + $0x530] sm:$0xff]  ;;  %v1055_v32 = vld [vmem:[%s3210_s3 + $0x498] sm:$0xff]  ;;  %v2936_v35 = vld [vmem:[%s3209_s2 + $0x8] sm:$0xff] }
  0xbf   : > { %1349 = vmatpush.msra.mxu1 %v1066_v33  ;;  %1368 = vmatpush.msra.mxu2 %v1083_v40  ;;  %v1073_v33 = vld [vmem:[%s3210_s3 + $0x528] sm:$0xff]  ;;  %v1054_v37 = vld [vmem:[%s3210_s3 + $0x490] sm:$0xff]  ;;  %v1036_v40 = vld [vmem:[%s3210_s3 + $0x400] sm:$0xff] }
  0xc0   : > { %1330 = vmatpush.msra.mxu0 %v1049_v36  ;;  %1323 = vmatpush.msrb.mxu3 %v1020_v42  ;;  %v1037_v36 = vld [vmem:[%s3210_s3 + $0x408] sm:$0xff]  ;;  %v495_v42 = vperm.slane %v2936_v35, 0 }
  0xc1   : > { %1350 = vmatpush.msra.mxu1 %v1065_v38  ;;  %1244 = vmatmul.f32.vlgmr.msra.gmra.mxu3 %v895_v41  ;;  %v1072_v38 = vld [vmem:[%s3210_s3 + $0x520] sm:$0xff]  ;;  %v1053_v41 = vld [vmem:[%s3210_s3 + $0x488] sm:$0xff] }
  0xc2   : > { %1331 = vmatpush.msra.mxu0 %v1048_v39  ;;  %1369 = vmatpush.msra.mxu2 %v1082_v45  ;;  %v1089_v39 = vld [vmem:[%s3210_s3 + $0x5a8] sm:$0xff]  ;;  %v1115_v45 = vld [vmem:[%s3210_s3 + $0x678] sm:$0xff] }
  0xc3   : > { %1351 = vmatpush.msra.mxu1 %v1064_v43  ;;  %1388 = vmatpush.msra.mxu3 %v1099_v46  ;;  %v669_v55 = vpop.f32.mrf.mxu0  ;;  %v1071_v43 = vld [vmem:[%s3210_s3 + $0x518] sm:$0xff]  ;;  %v1052_v46 = vld [vmem:[%s3210_s3 + $0x480] sm:$0xff] }
  0xc4   : > { %1332 = vmatpush.msra.mxu0 %v1047_v44  ;;  %v670_v58 = vadd.f32 %v669_v55, %v491_v47  ;;  %v709_v61 = vpop.f32.mrf.mxu2  ;;  %1370 = vmatpush.msra.mxu2 %v1081_v51  ;;  %v1088_v44 = vld [vmem:[%s3210_s3 + $0x5a0] sm:$0xff]  ;;  %v1069_v55 = vld [vmem:[%s3210_s3 + $0x508] sm:$0xff] }
  0xc5   : > { %1352 = vmatpush.msra.mxu1 %v1063_v49  ;;  %1389 = vmatpush.msra.mxu3 %v1098_v52  ;;  %v710_v0 = vadd.f32 %v709_v61, %v493_v50  ;;  %v1087_v49 = vld [vmem:[%s3210_s3 + $0x598] sm:$0xff]  ;;  %v496_v50 = vperm.slane %v2936_v35, 1  ;;  %v1114_v52 = vld [vmem:[%s3210_s3 + $0x670] sm:$0xff] }
  0xc6   : > { %1333 = vmatpush.msra.mxu0 %v1046_v48  ;;  %v689_v63 = vpop.f32.mrf.mxu1  ;;  %v896_v3 = vmax.f32 %v670_v58, 0.0  ;;  %1371 = vmatpush.msra.mxu2 %v1080_v59  ;;  %v1070_v48 = vld [vmem:[%s3210_s3 + $0x510] sm:$0xff]  ;;  %v1113_v58 = vld [vmem:[%s3210_s3 + $0x668] sm:$0xff] }
  0xc7   : > { %1353 = vmatpush.msra.mxu1 %v1062_v57  ;;  %v690_v4 = vadd.f32 %v689_v63, %v492_v53  ;;  %1390 = vmatpush.msra.mxu3 %v1097_v60  ;;  %v729_v6 = vpop.f32.mrf.mxu3  ;;  %v898_v12 = vmax.f32 %v710_v0, 0.0  ;;  %v1131_v53 = vld [vmem:[%s3210_s3 + $0x6f8] sm:$0xff]  ;;  %v1130_v59 = vld [vmem:[%s3210_s3 + $0x6f0] sm:$0xff]  ;;  %v497_v60 = vperm.slane %v2936_v35, 2  ;;  %v1068_v63 = vld [vmem:[%s3210_s3 + $0x500] sm:$0xff] }
  0xc8   : > { %1334 = vmatpush.msra.mxu0 %v1045_v56  ;;  %v730_v9 = vadd.f32 %v729_v6, %v494_v62  ;;  %1372 = vmatpush.msra.mxu2 %v1079_v54  ;;  %v1086_v56 = vld [vmem:[%s3210_s3 + $0x590] sm:$0xff]  ;;  %v1085_v0 = vld [vmem:[%s3210_s3 + $0x588] sm:$0xff] }
  0xc9   : > { %v897_v8 = vmax.f32 %v690_v4, 0.0  ;;  %1354 = vmatpush.msra.mxu1 %v1061_v2  ;;  %1391 = vmatpush.msra.mxu3 %v1096_v5  ;;  %v1147_v4 = vld [vmem:[%s3210_s3 + $0x778] sm:$0xff]  ;;  %v498_v5 = vperm.slane %v2936_v35, 3 }
  0xca   : > { %1335 = vmatpush.msra.mxu0 %v1044_v1  ;;  %1373 = vmatpush.msra.mxu2 %v1078_v11  ;;  %v899_v18 = vmax.f32 %v730_v9, 0.0  ;;  %v1129_v1 = vld [vmem:[%s3210_s3 + $0x6e8] sm:$0xff]  ;;  %v1128_v9 = vld [vmem:[%s3210_s3 + $0x6e0] sm:$0xff]  ;;  %v1163_v11 = vld [vmem:[%s3210_s3 + $0x7f8] sm:$0xff] }
  0xcb   : > { %1264 = vmatmul.f32.vlgmr.msrb.gmra.mxu0 %v896_v3  ;;  %1355 = vmatpush.msra.mxu1 %v1060_v7  ;;  %v1112_v3 = vld [vmem:[%s3210_s3 + $0x660] sm:$0xff] }
  0xcc   : > { %1336 = vmatpush.msra.mxu0 %v1043_v10  ;;  %1392 = vmatpush.msra.mxu3 %v1095_v13  ;;  %v1084_v7 = vld [vmem:[%s3210_s3 + $0x580] sm:$0xff]  ;;  %v1146_v10 = vld [vmem:[%s3210_s3 + $0x770] sm:$0xff] }
  0xcd   : > { %1284 = vmatmul.f32.vlgmr.msrb.gmra.mxu1 %v897_v8  ;;  %1304 = vmatmul.f32.vlgmr.msrb.gmra.mxu2 %v898_v12  ;;  %v1111_v8 = vld [vmem:[%s3210_s3 + $0x658] sm:$0xff] }
  0xce   : > { %1337 = vmatpush.msra.mxu0 %v1042_v15  ;;  %1356 = vmatpush.msra.mxu1 %v1059_v16  ;;  %v1110_v15 = vld [vmem:[%s3210_s3 + $0x650] sm:$0xff]  ;;  %v1127_v16 = vld [vmem:[%s3210_s3 + $0x6d8] sm:$0xff] }
  0xcf   : > { %1374 = vmatpush.msra.mxu2 %v1077_v17  ;;  %1393 = vmatpush.msra.mxu3 %v1094_v19  ;;  %v1162_v19 = vld [vmem:[%s3210_s3 + $0x7f0] sm:$0xff] }
  0xd0   : > { %1338 = vmatpush.msra.mxu0 %v1041_v20  ;;  %1324 = vmatmul.f32.vlgmr.msrb.gmra.mxu3 %v899_v18  ;;  %v1145_v18 = vld [vmem:[%s3210_s3 + $0x768] sm:$0xff] }
  0xd1   : > { %1357 = vmatpush.msra.mxu1 %v1058_v21  ;;  %1375 = vmatpush.msra.mxu2 %v1076_v22  ;;  %v1109_v20 = vld [vmem:[%s3210_s3 + $0x648] sm:$0xff]  ;;  %v1126_v21 = vld [vmem:[%s3210_s3 + $0x6d0] sm:$0xff]  ;;  %v1144_v22 = vld [vmem:[%s3210_s3 + $0x760] sm:$0xff] }
  0xd2   : > { %1394 = vmatpush.msra.mxu3 %v1093_v23  ;;  %1339 = vmatpush.msra.mxu0 %v1040_v24  ;;  %v1161_v24 = vld [vmem:[%s3210_s3 + $0x7e8] sm:$0xff] }
  0xd3   : > { %1358 = vmatpush.msra.mxu1 %v1057_v25  ;;  %1376 = vmatpush.msra.mxu2 %v1075_v26  ;;  %v1108_v25 = vld [vmem:[%s3210_s3 + $0x640] sm:$0xff]  ;;  %v1125_v26 = vld [vmem:[%s3210_s3 + $0x6c8] sm:$0xff] }
  0xd4   : > { %1395 = vmatpush.msra.mxu3 %v1092_v14  ;;  %1340 = vmatpush.msra.mxu0 %v1039_v27  ;;  %v1143_v14 = vld [vmem:[%s3210_s3 + $0x758] sm:$0xff]  ;;  %v1160_v27 = vld [vmem:[%s3210_s3 + $0x7e0] sm:$0xff] }
  0xd5   : > { %1359 = vmatpush.msra.mxu1 %v1056_v28  ;;  %1377 = vmatpush.msra.mxu2 %v1074_v29  ;;  %v1107_v28 = vld [vmem:[%s3210_s3 + $0x638] sm:$0xff]  ;;  %v1124_v29 = vld [vmem:[%s3210_s3 + $0x6c0] sm:$0xff] }
  0xd6   : > { %1396 = vmatpush.msra.mxu3 %v1091_v30  ;;  %1341 = vmatpush.msra.mxu0 %v1038_v31  ;;  %v1142_v30 = vld [vmem:[%s3210_s3 + $0x750] sm:$0xff]  ;;  %v1159_v31 = vld [vmem:[%s3210_s3 + $0x7d8] sm:$0xff] }
  0xd7   : > { %1360 = vmatpush.msra.mxu1 %v1055_v32  ;;  %1378 = vmatpush.msra.mxu2 %v1073_v33  ;;  %v1106_v32 = vld [vmem:[%s3210_s3 + $0x630] sm:$0xff]  ;;  %v1123_v33 = vld [vmem:[%s3210_s3 + $0x6b8] sm:$0xff] }
  0xd8   : > { %1397 = vmatpush.msra.mxu3 %v1090_v34  ;;  %1342 = vmatpush.msra.mxu0 %v1037_v36  ;;  %v1141_v34 = vld [vmem:[%s3210_s3 + $0x748] sm:$0xff]  ;;  %v1158_v36 = vld [vmem:[%s3210_s3 + $0x7d0] sm:$0xff] }
  0xd9   : > { %1361 = vmatpush.msra.mxu1 %v1054_v37  ;;  %1379 = vmatpush.msra.mxu2 %v1072_v38  ;;  %v1105_v37 = vld [vmem:[%s3210_s3 + $0x628] sm:$0xff]  ;;  %v1122_v38 = vld [vmem:[%s3210_s3 + $0x6b0] sm:$0xff] }
  0xda   : > { %1398 = vmatpush.msra.mxu3 %v1089_v39  ;;  %1343 = vmatpush.msra.mxu0 %v1036_v40  ;;  %v749_v47 = vpop.f32.mrf.mxu0  ;;  %v1140_v39 = vld [vmem:[%s3210_s3 + $0x740] sm:$0xff]  ;;  %v1157_v40 = vld [vmem:[%s3210_s3 + $0x7c8] sm:$0xff] }
  0xdb   : > { %1362 = vmatpush.msra.mxu1 %v1053_v41  ;;  %1380 = vmatpush.msra.mxu2 %v1071_v43  ;;  %v750_v51 = vadd.f32 %v749_v47, %v495_v42  ;;  %v1104_v41 = vld [vmem:[%s3210_s3 + $0x620] sm:$0xff]  ;;  %v1121_v42 = vld [vmem:[%s3210_s3 + $0x6a8] sm:$0xff]  ;;  %v1139_v43 = vld [vmem:[%s3210_s3 + $0x738] sm:$0xff]  ;;  %v499_v47 = vperm.slane %v2936_v35, 4 }
  0xdc   : > { %1399 = vmatpush.msra.mxu3 %v1088_v44  ;;  %1408 = vmatpush.msrb.mxu0 %v1115_v45  ;;  %v1156_v44 = vld [vmem:[%s3210_s3 + $0x7c0] sm:$0xff]  ;;  %v1103_v45 = vld [vmem:[%s3210_s3 + $0x618] sm:$0xff] }
  0xdd   : > { %1363 = vmatpush.msra.mxu1 %v1052_v46  ;;  %1381 = vmatpush.msra.mxu2 %v1070_v48  ;;  %v769_v57 = vpop.f32.mrf.mxu1  ;;  %v900_v61 = vmax.f32 %v750_v51, 0.0  ;;  %v1120_v46 = vld [vmem:[%s3210_s3 + $0x6a0] sm:$0xff]  ;;  %v1138_v48 = vld [vmem:[%s3210_s3 + $0x730] sm:$0xff]  ;;  %v1119_v51 = vld [vmem:[%s3210_s3 + $0x698] sm:$0xff] }
  0xde   : > { %1400 = vmatpush.msra.mxu3 %v1087_v49  ;;  %1409 = vmatpush.msrb.mxu0 %v1114_v52  ;;  %v770_v62 = vadd.f32 %v769_v57, %v496_v50  ;;  %v1155_v49 = vld [vmem:[%s3210_s3 + $0x7b8] sm:$0xff]  ;;  %v1102_v50 = vld [vmem:[%s3210_s3 + $0x610] sm:$0xff]  ;;  %v500_v52 = vperm.slane %v2936_v35, 5 }
  0xdf   : > { %1428 = vmatpush.msrb.mxu1 %v1131_v53  ;;  %1382 = vmatpush.msra.mxu2 %v1069_v55  ;;  %v1137_v55 = vld [vmem:[%s3210_s3 + $0x728] sm:$0xff] }
  0xe0   : > { %1401 = vmatpush.msra.mxu3 %v1086_v56  ;;  %v901_v2 = vmax.f32 %v770_v62, 0.0  ;;  %1410 = vmatpush.msrb.mxu0 %v1113_v58  ;;  %v1154_v56 = vld [vmem:[%s3210_s3 + $0x7b0] sm:$0xff]  ;;  %v1101_v58 = vld [vmem:[%s3210_s3 + $0x608] sm:$0xff] }
  0xe1   : > { %1429 = vmatpush.msrb.mxu1 %v1130_v59  ;;  %v789_v54 = vpop.f32.mrf.mxu2  ;;  %1383 = vmatpush.msra.mxu2 %v1068_v63  ;;  %v1118_v59 = vld [vmem:[%s3210_s3 + $0x690] sm:$0xff]  ;;  %v1153_v62 = vld [vmem:[%s3210_s3 + $0x7a8] sm:$0xff] }
  0xe2   : > { %1402 = vmatpush.msra.mxu3 %v1085_v0  ;;  %v790_v6 = vadd.f32 %v789_v54, %v497_v60  ;;  %1344 = vmatmul.f32.vlgmr.msra.gmra.mxu0 %v900_v61  ;;  %v1136_v61 = vld [vmem:[%s3210_s3 + $0x720] sm:$0xff] }
  0xe3   : > { %1430 = vmatpush.msrb.mxu1 %v1129_v1  ;;  %1411 = vmatpush.msrb.mxu0 %v1112_v3  ;;  %v1100_v0 = vld [vmem:[%s3210_s3 + $0x600] sm:$0xff]  ;;  %v1117_v1 = vld [vmem:[%s3210_s3 + $0x688] sm:$0xff] }
  0xe4   : > { %1448 = vmatpush.msrb.mxu2 %v1147_v4  ;;  %v809_v12 = vpop.f32.mrf.mxu3  ;;  %1403 = vmatpush.msra.mxu3 %v1084_v7  ;;  %v902_v17 = vmax.f32 %v790_v6, 0.0  ;;  %v1135_v4 = vld [vmem:[%s3210_s3 + $0x718] sm:$0xff]  ;;  %v1152_v54 = vld [vmem:[%s3210_s3 + $0x7a0] sm:$0xff]  ;;  %v502_v6 = vperm.slane %v2936_v35, 7 }
  0xe5   : > { %1364 = vmatmul.f32.vlgmr.msra.gmra.mxu1 %v901_v2  ;;  %v810_v13 = vadd.f32 %v809_v12, %v498_v5  ;;  %1412 = vmatpush.msrb.mxu0 %v1111_v8  ;;  %v501_v2 = vperm.slane %v2936_v35, 6  ;;  %v1116_v5 = vld [vmem:[%s3210_s3 + $0x680] sm:$0xff]  ;;  %v1133_v35 = vld [vmem:[%s3210_s3 + $0x708] sm:$0xff] }
  0xe6   : > { %1431 = vmatpush.msrb.mxu1 %v1128_v9  ;;  %1449 = vmatpush.msrb.mxu2 %v1146_v10  ;;  %v1134_v9 = vld [vmem:[%s3210_s3 + $0x710] sm:$0xff]  ;;  %v1151_v10 = vld [vmem:[%s3210_s3 + $0x798] sm:$0xff] }
  0xe7   : > { %1468 = vmatpush.msrb.mxu3 %v1163_v11  ;;  %1413 = vmatpush.msrb.mxu0 %v1110_v15  ;;  %v903_v23 = vmax.f32 %v810_v13, 0.0  ;;  %v1150_v13 = vld [vmem:[%s3210_s3 + $0x790] sm:$0xff] }
  0xe8   : > { %1432 = vmatpush.msrb.mxu1 %v1127_v16  ;;  %1450 = vmatpush.msrb.mxu2 %v1145_v18  ;;  %v1149_v18 = vld [vmem:[%s3210_s3 + $0x788] sm:$0xff] }
  0xe9   : > { %1469 = vmatpush.msrb.mxu3 %v1162_v19  ;;  %1384 = vmatmul.f32.vlgmr.msra.gmra.mxu2 %v902_v17  ;;  %v1132_v17 = vld [vmem:[%s3210_s3 + $0x700] sm:$0xff] }
  0xea   : > { %1414 = vmatpush.msrb.mxu0 %v1109_v20  ;;  %1433 = vmatpush.msrb.mxu1 %v1126_v21  ;;  %v1148_v20 = vld [vmem:[%s3210_s3 + $0x780] sm:$0xff] }
  0xeb   : > { %1451 = vmatpush.msrb.mxu2 %v1144_v22  ;;  %1470 = vmatpush.msrb.mxu3 %v1161_v24  ;;  %v1632_v21 = vld [vmem:[%s3211_s4] ss:$0 sm:$0xff] }
  0xec   : > { %1415 = vmatpush.msrb.mxu0 %v1108_v25  ;;  %1404 = vmatmul.f32.vlgmr.msra.gmra.mxu3 %v903_v23 }
  0xed   : > { %1434 = vmatpush.msrb.mxu1 %v1125_v26  ;;  %1452 = vmatpush.msrb.mxu2 %v1143_v14 }
  0xee   : > { %1471 = vmatpush.msrb.mxu3 %v1160_v27  ;;  %1416 = vmatpush.msrb.mxu0 %v1107_v28 }
  0xef   : > { %1435 = vmatpush.msrb.mxu1 %v1124_v29  ;;  %1453 = vmatpush.msrb.mxu2 %v1142_v30 }
  0xf0   : > { %1472 = vmatpush.msrb.mxu3 %v1159_v31  ;;  %1417 = vmatpush.msrb.mxu0 %v1106_v32 }
  0xf1   : > { %1436 = vmatpush.msrb.mxu1 %v1123_v33  ;;  %1454 = vmatpush.msrb.mxu2 %v1141_v34 }
  0xf2   : > { %1473 = vmatpush.msrb.mxu3 %v1158_v36  ;;  %1418 = vmatpush.msrb.mxu0 %v1105_v37 }
  0xf3   : > { %1437 = vmatpush.msrb.mxu1 %v1122_v38  ;;  %1455 = vmatpush.msrb.mxu2 %v1140_v39 }
  0xf4   : > { %1474 = vmatpush.msrb.mxu3 %v1157_v40  ;;  %1419 = vmatpush.msrb.mxu0 %v1104_v41 }
  0xf5   : > { %1438 = vmatpush.msrb.mxu1 %v1121_v42  ;;  %1456 = vmatpush.msrb.mxu2 %v1139_v43 }
  0xf6   : > { %1475 = vmatpush.msrb.mxu3 %v1156_v44  ;;  %1420 = vmatpush.msrb.mxu0 %v1103_v45  ;;  %v829_v53 = vpop.f32.mrf.mxu0 }
  0xf7   : > { %1439 = vmatpush.msrb.mxu1 %v1120_v46  ;;  %1457 = vmatpush.msrb.mxu2 %v1138_v48  ;;  %v830_v57 = vadd.f32 %v829_v53, %v499_v47 }
  0xf8   : > { %1476 = vmatpush.msrb.mxu3 %v1155_v49  ;;  %1421 = vmatpush.msrb.mxu0 %v1102_v50  ;;  %v849_v60 = vpop.f32.mrf.mxu1 }
  0xf9   : > { %1440 = vmatpush.msrb.mxu1 %v1119_v51  ;;  %1458 = vmatpush.msrb.mxu2 %v1137_v55  ;;  %v850_v63 = vadd.f32 %v849_v60, %v500_v52  ;;  %v904_v3 = vmax.f32 %v830_v57, 0.0  ;;  %v1639_v55 = vld [vmem:[%s1945_s8] sm:$0xff] }
  0xfa   : > { %1477 = vmatpush.msrb.mxu3 %v1154_v56  ;;  %1422 = vmatpush.msrb.mxu0 %v1101_v58  ;;  %v1648_v58 = vmov 100.0  }
  0xfb   : > { %1441 = vmatpush.msrb.mxu1 %v1118_v59  ;;  %1459 = vmatpush.msrb.mxu2 %v1136_v61  ;;  %v905_v7 = vmax.f32 %v850_v63, 0.0  ;;  %1635 = vrcp.f32 %v1648_v58 }
  0xfc   : > { %1478 = vmatpush.msrb.mxu3 %v1153_v62  ;;  %1423 = vmatpush.msrb.mxu0 %v1100_v0 }
  0xfd   : > { %1442 = vmatpush.msrb.mxu1 %v1117_v1  ;;  %v869_v8 = vpop.f32.mrf.mxu2  ;;  %1460 = vmatpush.msrb.mxu2 %v1135_v4 }
  0xfe   : > { %1479 = vmatpush.msrb.mxu3 %v1152_v54  ;;  %v870_v11 = vadd.f32 %v869_v8, %v501_v2  ;;  %1424 = vmatmul.f32.vlgmr.msrb.gmra.mxu0 %v904_v3 }
  0xff   : > { %1443 = vmatpush.msrb.mxu1 %v1116_v5  ;;  %v889_v12 = vpop.f32.mrf.mxu3  ;;  %1461 = vmatpush.msrb.mxu2 %v1134_v9 }
 0x100   : > { %1480 = vmatpush.msrb.mxu3 %v1151_v10  ;;  %v890_v15 = vadd.f32 %v889_v12, %v502_v6  ;;  %v906_v16 = vmax.f32 %v870_v11, 0.0  ;;  %1444 = vmatmul.f32.vlgmr.msrb.gmra.mxu1 %v905_v7 }
 0x101   : > { %1462 = vmatpush.msrb.mxu2 %v1133_v35  ;;  %v1636_v59 = vpop.eup %1635 }
 0x102   : > { %1481 = vmatpush.msrb.mxu3 %v1150_v13  ;;  %v907_v19 = vmax.f32 %v890_v15, 0.0  ;;  %v1495_v60 = vmul.f32 100.0, %v1636_v59  ;;  %vm1499_vm2 = vweird.f32 %v1636_v59  ;;  %v1633_v13 = vld [vmem:[%s3212_s5] ss:$0 sm:$0xff] }
 0x103   : > { %1463 = vmatpush.msrb.mxu2 %v1132_v17 }
 0x104   : > { %1482 = vmatpush.msrb.mxu3 %v1149_v18  ;;  %1464 = vmatmul.f32.vlgmr.msrb.gmra.mxu2 %v906_v16  ;;  %v1496_v61 = vsub.f32 1.0, %v1495_v60  ;;  %v1634_v16 = vld [vmem:[%s3213_s6] ss:$0 sm:$0xff] }
 0x106   : > { %1483 = vmatpush.msrb.mxu3 %v1148_v20  ;;  %v1497_v62 = vmul.f32 %v1636_v59, %v1496_v61 }
 0x107   : > { %1484 = vmatmul.f32.vlgmr.msrb.gmra.mxu3 %v907_v19 }
 0x108   : > { %v1498_v63 = vadd.f32 %v1636_v59, %v1497_v62 }
 0x10a   : > { %v1500_v0 = vsel %vm1499_vm2, %v1636_v59, %v1498_v63 }
 0x134   : > { %v1185_v22 = vpop.f32.mrf.mxu0 }
 0x135   : > { %v1186_v23 = vadd.f32 %v1632_v21, %v1185_v22 }
 0x137   : > { %v1205_v24 = vpop.f32.mrf.mxu1 }
 0x138   : > { %v1206_v25 = vadd.f32 %v1205_v24, %v1186_v23 }
 0x141   : > { %v1225_v26 = vpop.f32.mrf.mxu2 }
 0x142   : > { %v1226_v14 = vadd.f32 %v1225_v26, %v1206_v25 }
 0x144   : > { %v1245_v27 = vpop.f32.mrf.mxu3 }
 0x145   : > { %v1246_v28 = vadd.f32 %v1245_v27, %v1226_v14 }
 0x148   : > { %v1265_v29 = vpop.f32.mrf.mxu0 }
 0x149   : > { %v1266_v30 = vadd.f32 %v1265_v29, %v1246_v28 }
 0x14a   : > { %v1285_v31 = vpop.f32.mrf.mxu1 }
 0x14b   : > { %v1286_v33 = vadd.f32 %v1285_v31, %v1266_v30 }
 0x150   : > { %v1305_v32 = vpop.f32.mrf.mxu2 }
 0x151   : > { %v1306_v34 = vadd.f32 %v1305_v32, %v1286_v33 }
 0x153   : > { %v1325_v36 = vpop.f32.mrf.mxu3 }
 0x154   : > { %v1326_v38 = vadd.f32 %v1325_v36, %v1306_v34 }
 0x15f   : > { %v1345_v37 = vpop.f32.mrf.mxu0 }
 0x160   : > { %v1346_v39 = vadd.f32 %v1345_v37, %v1326_v38 }
 0x162   : > { %v1365_v40 = vpop.f32.mrf.mxu1 }
 0x163   : > { %v1366_v42 = vadd.f32 %v1365_v40, %v1346_v39 }
 0x16c   : > { %v1385_v41 = vpop.f32.mrf.mxu2 }
 0x16d   : > { %v1386_v43 = vadd.f32 %v1385_v41, %v1366_v42 }
 0x16f   : > { %v1405_v44 = vpop.f32.mrf.mxu3 }
 0x170   : > { %v1406_v46 = vadd.f32 %v1405_v44, %v1386_v43 }
 0x17b   : > { %v1425_v45 = vpop.f32.mrf.mxu0 }
 0x17c   : > { %v1426_v47 = vadd.f32 %v1425_v45, %v1406_v46 }
 0x17d   : > { %v1445_v48 = vpop.f32.mrf.mxu1 }
 0x17e   : > { %v1446_v49 = vadd.f32 %v1445_v48, %v1426_v47 }
 0x187   : > { %v1465_v50 = vpop.f32.mrf.mxu2 }
 0x188   : > { %v1466_v51 = vadd.f32 %v1465_v50, %v1446_v49 }
 0x18a   : > { %v1485_v52 = vpop.f32.mrf.mxu3 }
 0x18b   : > { %v1486_v53 = vadd.f32 %v1485_v52, %v1466_v51 }
 0x18d   : > { %v1488_v56 = vadd.f32 %v1639_v55, %v1486_v53 }
 0x18f   : > { %v1491_v57 = vsel %vm519_vm1, %v1488_v56, 0.0 }
 0x190   : > { %1492 = vadd.xlane.f32.xlu0 %v1491_v57 }
 0x203   : > { %v1493_v1 = vpop.xlane.xlu0 %1492 }
 0x204   : > { %v1501_v2 = vmul.f32 %v1500_v0, %v1493_v1 }
 0x206   : > { %v1502_v3 = vsub.f32 %v1488_v56, %v1501_v2 }
 0x208   : > { %v1503_v4 = vmul.f32 %v1502_v3, %v1502_v3 }
 0x20a   : > { %v1504_v54 = vsel %vm519_vm1, %v1503_v4, 0.0 }
 0x20b   : > { %1505 = vadd.xlane.f32.xlu0 %v1504_v54 }
 0x27e   : > { %v1506_v5 = vpop.xlane.xlu0 %1505 }
 0x27f   : > { %v1507_v6 = vmul.f32 %v1506_v5, %v1500_v0 }
 0x281   : > { %v1508_v7 = vadd.f32 1e-05, %v1507_v6 }
 0x283   : > { %1637 = vrsqrt.f32 %v1508_v7  ;;  %vm1515_vm4 = vweird.f32 %v1508_v7 }
 0x289   : > { %v1638_v8 = vpop.eup %1637 }
 0x28a   : > { %v1510_v9 = vmul.f32 %v1638_v8, %v1508_v7  ;;  %vm1516_vm3 = vweird.f32 %v1638_v8 }
 0x28b   : > { %vm1517_vm5 = vmor %vm1515_vm4, %vm1516_vm3 }
 0x28c   : > { %v1511_v10 = vmul.f32 %v1638_v8, %v1510_v9 }
 0x28e   : > { %v1512_v11 = vmul.f32 0.5, %v1511_v10 }
 0x290   : > { %v1513_v12 = vsub.f32 1.5, %v1512_v11 }
 0x292   : > { %v1514_v35 = vmul.f32 %v1638_v8, %v1513_v12 }
 0x294   : > { %v1518_v15 = vsel %vm1517_vm5, %v1638_v8, %v1514_v35 }
 0x295   : > { %v1519_v17 = vmul.f32 %v1518_v15, %v1502_v3 }
 0x297   : > { %v1523_v18 = vmul.f32 %v1633_v13, %v1519_v17 }
 0x299   : > { %v1527_v19 = vadd.f32 %v1634_v16, %v1523_v18 }
 0x29b   : > { %1528 = vst.msk [vmem:[%s273_s22] sm:$0xff] %vm519_vm1, %v1527_v19 }
 0x29c PF: > { %s17_s24 = sadd.s32 1, %s1646_s24  }
 0x29d   : > { %p14_p4 = scmp.ge.s32.totalorder %s17_s24, 4  }
 0x29f   :  { %16 = sbr.rel (!%p14_p4) target bundleno = 1 (0x1), region = 78 }

// kernel: visual_discriminator_forward.5
= control target key start
LH: loop header
LB: loop body
LE: loop exit
PB: predicated region body
PF: predicated region fallthrough
CT: control target
= control target key end

     0   :  { %vm72_vm0 = vcmask 1043456   ;;  %vm65_vm1 = vcmask 818176   ;;  %vm129_vm2 = vcmask 523264   ;;  %vm183_vm3 = vcmask 130048   ;;  %s433_s1 = inlined_call_operand.vmem [shape: f32[100,64], index: 1, kind: input, shape index: {}]   ;;  %s434_s0 = inlined_call_operand.vmem [shape: f32[16,100], index: 0, kind: input, shape index: {}]   ;;  %s435_s2 = inlined_call_operand.vmem [shape: f32[1,64], index: 2, kind: input, shape index: {}]   ;;  %s436_s4 = inlined_call_operand.vmem [shape: f32[1,16], index: 4, kind: input, shape index: {}]   ;;  %s437_s3 = inlined_call_operand.vmem [shape: f32[64,16], index: 3, kind: input, shape index: {}]   ;;  %s438_s5 = inlined_call_operand.vmem [shape: f32[16,1], index: 5, kind: input, shape index: {}]   ;;  %s439_s6 = inlined_call_operand.<no memory space> [shape: f32[1,1], index: 6, kind: input, shape index: {}]   ;;  %s440_s7 = inlined_call_operand.vmem [shape: f32[16,1], index: 7, kind: output, shape index: {}]  }
   0x1   :  { %v60_v0 = vld [vmem:[%s433_s1 + $0x60] sm:$0xf]  ;;  %v59_v1 = vld [vmem:[%s433_s1 + $0x58] sm:$0xff]  ;;  %v58_v2 = vld [vmem:[%s433_s1 + $0x50] sm:$0xff]  ;;  %vm251_vm7 = vcmask 7168  }
   0x2   :  { %258 = vmatpush.msk.msra.mxu0 %vm72_vm0, %v60_v0  ;;  %265 = vmatpush.msk.msra.mxu3 %vm72_vm0, %v60_v0  ;;  %v57_v3 = vld [vmem:[%s433_s1 + $0x48] sm:$0xff]  ;;  %v28_v4 = vld [vmem:[%s434_s0] sm:$0xff]  ;;  %v55_v11 = vld [vmem:[%s433_s1 + $0x38] sm:$0xff] }
   0x3   :  { %v29_v5 = vld [vmem:[%s434_s0 + $0x8] sm:$0xff]  ;;  %v32_v6 = vmul.f32 0.044715, %v28_v4  ;;  %v56_v8 = vld [vmem:[%s433_s1 + $0x40] sm:$0xff]  ;;  %v54_v14 = vld [vmem:[%s433_s1 + $0x30] sm:$0xff]  ;;  %v30_v24 = vmul.f32 0.5, %v28_v4 }
   0x4   :  { %80 = vmatpush.msra.mxu0 %v59_v1  ;;  %266 = vmatpush.msra.mxu3 %v59_v1  ;;  %v33_v7 = vmul.f32 0.044715, %v29_v5  ;;  %v53_v17 = vld [vmem:[%s433_s1 + $0x28] sm:$0xff]  ;;  %v52_v20 = vld [vmem:[%s433_s1 + $0x20] sm:$0xff]  ;;  %v51_v21 = vld [vmem:[%s433_s1 + $0x18] sm:$0xff]  ;;  %v31_v26 = vmul.f32 0.5, %v29_v5 }
   0x5   :  { %v34_v9 = vmul.f32 %v32_v6, %v28_v4  ;;  %v50_v22 = vld [vmem:[%s433_s1 + $0x10] sm:$0xff]  ;;  %v49_v23 = vld [vmem:[%s433_s1 + $0x8] sm:$0xff]  ;;  %v48_v28 = vld [vmem:[%s433_s1] sm:$0xff] }
   0x6   :  { %81 = vmatpush.msra.mxu0 %v58_v2  ;;  %267 = vmatpush.msra.mxu3 %v58_v2  ;;  %v35_v10 = vmul.f32 %v33_v7, %v29_v5  ;;  %v124_v33 = vld [vmem:[%s437_s3 + $0x38] sm:$0xff]  ;;  %v123_v34 = vld [vmem:[%s437_s3 + $0x30] sm:$0xff]  ;;  %v122_v35 = vld [vmem:[%s437_s3 + $0x28] sm:$0xff] }
   0x7   :  { %v36_v12 = vmul.f32 %v34_v9, %v28_v4  ;;  %144 = vmatpush.msra.mxu1 %v124_v33  ;;  %v121_v36 = vld [vmem:[%s437_s3 + $0x20] sm:$0xff]  ;;  %v120_v37 = vld [vmem:[%s437_s3 + $0x18] sm:$0xff]  ;;  %v119_v38 = vld [vmem:[%s437_s3 + $0x10] sm:$0xff] }
   0x8   :  { %82 = vmatpush.msra.mxu0 %v57_v3  ;;  %268 = vmatpush.msra.mxu3 %v57_v3  ;;  %v37_v13 = vmul.f32 %v35_v10, %v29_v5  ;;  %v118_v39 = vld [vmem:[%s437_s3 + $0x8] sm:$0xff]  ;;  %v117_v40 = vld [vmem:[%s437_s3] sm:$0xff] }
   0x9   :  { %v38_v15 = vadd.f32 %v36_v12, %v28_v4  ;;  %145 = vmatpush.msra.mxu1 %v123_v34  ;;  %v278_v41 = vld [vmem:[%s435_s2] ss:$0 sm:$0xff]  ;;  %v178_v0 = vld [vmem:[%s438_s5 + $0x8] sm:$0xff]  ;;  %v12_v4 = vstv %s439_s6 }
   0xa   :  { %83 = vmatpush.msra.mxu0 %v56_v8  ;;  %269 = vmatpush.msra.mxu3 %v56_v8  ;;  %v39_v16 = vadd.f32 %v37_v13, %v29_v5  ;;  %v177_v1 = vld [vmem:[%s438_s5] sm:$0xff]  ;;  %13 = vst [vmem:[#allocation2] sm:$0x1] %v12_v4 }
   0xb   :  { %v40_v18 = vmul.f32 0.7978846, %v38_v15  ;;  %146 = vmatpush.msra.mxu1 %v122_v35  ;;  %204 = vmatpush.msra.mxu2 %v178_v0  ;;  %v279_v2 = vld [vmem:[%s436_s4] ss:$0 sm:$0xff] }
   0xc   :  { %84 = vmatpush.msra.mxu0 %v55_v11  ;;  %270 = vmatpush.msra.mxu3 %v55_v11  ;;  %v41_v19 = vmul.f32 0.7978846, %v39_v16 }
   0xd   :  { %281 = vtanh.f32 %v40_v18  ;;  %147 = vmatpush.msra.mxu1 %v121_v36  ;;  %205 = vmatpush.msra.mxu2 %v177_v1 }
   0xe   :  { %85 = vmatpush.msra.mxu0 %v54_v14  ;;  %271 = vmatpush.msra.mxu3 %v54_v14  ;;  %283 = vtanh.f32 %v41_v19 }
   0xf   :  { %148 = vmatpush.msra.mxu1 %v120_v37 }
  0x10   :  { %86 = vmatpush.msra.mxu0 %v53_v17  ;;  %272 = vmatpush.msra.mxu3 %v53_v17 }
  0x11   :  { %149 = vmatpush.msra.mxu1 %v119_v38 }
  0x12   :  { %87 = vmatpush.msra.mxu0 %v52_v20  ;;  %273 = vmatpush.msra.mxu3 %v52_v20 }
  0x13   :  { %v282_v25 = vpop.eup %281  ;;  %150 = vmatpush.msra.mxu1 %v118_v39 }
  0x14   :  { %88 = vmatpush.msra.mxu0 %v51_v21  ;;  %274 = vmatpush.msra.mxu3 %v51_v21  ;;  %v284_v27 = vpop.eup %283  ;;  %v44_v29 = vadd.f32 1.0, %v282_v25 }
  0x15   :  { %v45_v30 = vadd.f32 1.0, %v284_v27  ;;  %151 = vmatpush.msra.mxu1 %v117_v40 }
  0x16   :  { %89 = vmatpush.msra.mxu0 %v50_v22  ;;  %275 = vmatpush.msra.mxu3 %v50_v22  ;;  %v46_v31 = vmul.f32 %v44_v29, %v30_v24 }
  0x17   :  { %v47_v32 = vmul.f32 %v45_v30, %v31_v26  ;;  %v280_v26 = vld [vmem:[#allocation2] ss:$0 sm:$0xff] }
  0x18   :  { %90 = vmatpush.msra.mxu0 %v49_v23  ;;  %276 = vmatpush.msra.mxu3 %v49_v23 }
  0x1a   :  { %91 = vmatpush.msra.mxu0 %v48_v28  ;;  %277 = vmatpush.msra.mxu3 %v48_v28 }
  0x1b   :  { %259 = vmatmul.msk.f32.vlgmr.msra.gmra.mxu0 %vm65_vm1, %v46_v31  ;;  %260 = vmatmul.msk.f32.vlgmr.msra.gmra.mxu3 %vm65_vm1, %v47_v32 }
  0x98   :  { %v93_v42 = vpop.f32.mrf.mxu0 }
  0x99   :  { %v94_v43 = vadd.f32 %v278_v41, %v93_v42 }
  0x9b   :  { %v101_v44 = vmul.f32 0.044715, %v94_v43  ;;  %v99_v57 = vmul.f32 0.5, %v94_v43 }
  0x9d   :  { %v103_v45 = vmul.f32 %v101_v44, %v94_v43 }
  0x9e   :  { %v96_v46 = vpop.f32.mrf.mxu3 }
  0x9f   :  { %v105_v47 = vmul.f32 %v103_v45, %v94_v43  ;;  %v97_v48 = vadd.f32 %v278_v41, %v96_v46 }
  0xa1   :  { %v107_v49 = vadd.f32 %v105_v47, %v94_v43  ;;  %v102_v50 = vmul.f32 0.044715, %v97_v48  ;;  %v100_v62 = vmul.f32 0.5, %v97_v48 }
  0xa3   :  { %v109_v51 = vmul.f32 0.7978846, %v107_v49  ;;  %v104_v52 = vmul.f32 %v102_v50, %v97_v48 }
  0xa5   :  { %285 = vtanh.f32 %v109_v51  ;;  %v106_v53 = vmul.f32 %v104_v52, %v97_v48 }
  0xa7   :  { %v108_v54 = vadd.f32 %v106_v53, %v97_v48 }
  0xa9   :  { %v110_v55 = vmul.f32 0.7978846, %v108_v54 }
  0xab   :  { %v286_v56 = vpop.eup %285  ;;  %287 = vtanh.f32 %v110_v55 }
  0xac   :  { %v113_v58 = vadd.f32 1.0, %v286_v56 }
  0xae   :  { %v115_v59 = vmul.f32 %v113_v58, %v99_v57 }
  0xb0   :  { %261 = vmatmul.msk.f32.vlgmr.msra.gmra.mxu1 %vm129_vm2, %v115_v59 }
  0xb1   :  { %v288_v60 = vpop.eup %287 }
  0xb2   :  { %v114_v61 = vadd.f32 1.0, %v288_v60 }
  0xb4   :  { %v116_v63 = vmul.f32 %v114_v61, %v100_v62 }
  0xb8   :  { %262 = vmatmul.msk.f32.gmra.mxu1 %vm129_vm2, %v116_v63 }
 0x12d   :  { %v153_v3 = vpop.f32.mrf.mxu1 }
 0x12e   :  { %v154_v5 = vadd.f32 %v279_v2, %v153_v3 }
 0x130   :  { %v161_v6 = vmul.f32 0.044715, %v154_v5  ;;  %v159_v19 = vmul.f32 0.5, %v154_v5 }
 0x132   :  { %v163_v7 = vmul.f32 %v161_v6, %v154_v5 }
 0x134   :  { %v165_v8 = vmul.f32 %v163_v7, %v154_v5 }
 0x135   :  { %v156_v9 = vpop.f32.mrf.mxu1 }
 0x136   :  { %v157_v10 = vadd.f32 %v279_v2, %v156_v9  ;;  %v167_v11 = vadd.f32 %v165_v8, %v154_v5 }
 0x138   :  { %v162_v12 = vmul.f32 0.044715, %v157_v10  ;;  %v169_v13 = vmul.f32 0.7978846, %v167_v11  ;;  %v160_v23 = vmul.f32 0.5, %v157_v10 }
 0x13a   :  { %289 = vtanh.f32 %v169_v13  ;;  %v164_v14 = vmul.f32 %v162_v12, %v157_v10 }
 0x13c   :  { %v166_v15 = vmul.f32 %v164_v14, %v157_v10 }
 0x13e   :  { %v168_v16 = vadd.f32 %v166_v15, %v157_v10 }
 0x140   :  { %v290_v17 = vpop.eup %289  ;;  %v170_v18 = vmul.f32 0.7978846, %v168_v16 }
 0x141   :  { %v173_v20 = vadd.f32 1.0, %v290_v17 }
 0x142   :  { %291 = vtanh.f32 %v170_v18 }
 0x143   :  { %v175_v21 = vmul.f32 %v173_v20, %v159_v19 }
 0x145   :  { %263 = vmatmul.msk.f32.vlgmr.msra.gmra.mxu2 %vm183_vm3, %v175_v21 }
 0x148   :  { %v292_v22 = vpop.eup %291 }
 0x149   :  { %v174_v24 = vadd.f32 1.0, %v292_v22 }
 0x14b   :  { %v176_v25 = vmul.f32 %v174_v24, %v160_v23 }
 0x14d   :  { %264 = vmatmul.msk.f32.gmra.mxu2 %vm183_vm3, %v176_v25 }
 0x1c8   :  { %v207_v27 = vpop.f32.mrf.mxu2 }
 0x1c9   :  { %v208_v28 = vadd.f32 %v280_v26, %v207_v27 }
 0x1cb   :  { %v213_v29 = vsub.f32 0.0, %v208_v28 }
 0x1cd   :  { %v215_v30 = vmul.f32 1.442695, %v213_v29 }
 0x1cf   :  { %293 = vpow2.f32 %v215_v30 }
 0x1d0   :  { %v210_v31 = vpop.f32.mrf.mxu2 }
 0x1d1   :  { %v211_v32 = vadd.f32 %v280_v26, %v210_v31 }
 0x1d3   :  { %v214_v33 = vsub.f32 0.0, %v211_v32 }
 0x1d5   :  { %v294_v34 = vpop.eup %293  ;;  %v217_v35 = vmul.f32 1.442695, %v214_v33 }
 0x1d6   :  { %v219_v36 = vadd.f32 1.0, %v294_v34 }
 0x1d7   :  { %295 = vpow2.f32 %v217_v35 }
 0x1d8   :  { %297 = vrcp.f32 %v219_v36  ;;  %v232_v42 = vand.u32 2147483648, %v219_v36  ;;  %v230_v44 = vand.u32 2147483647, %v219_v36  ;;  %vm226_vm5 = vweird.f32 %v219_v36 }
 0x1da   :  { %v233_v47 = vor.u32 1.1754944e-38, %v232_v42  ;;  %vm231_vm8 = vcmp.eq.f32.partialorder %v230_v44, 8.507059e+37 }
 0x1dd   :  { %v296_v37 = vpop.eup %295 }
 0x1de   :  { %v298_v38 = vpop.eup %297  ;;  %v220_v39 = vadd.f32 1.0, %v296_v37 }
 0x1df   :  { %v222_v40 = vmul.f32 %v298_v38, %v219_v36  ;;  %vm227_vm4 = vweird.f32 %v298_v38 }
 0x1e0   :  { %299 = vrcp.f32 %v220_v39  ;;  %vm228_vm6 = vmor %vm226_vm5, %vm227_vm4  ;;  %v247_v52 = vand.u32 2147483648, %v220_v39  ;;  %v245_v54 = vand.u32 2147483647, %v220_v39  ;;  %vm241_vm10 = vweird.f32 %v220_v39 }
 0x1e1   :  { %v223_v41 = vsub.f32 1.0, %v222_v40 }
 0x1e2   :  { %v248_v56 = vor.u32 1.1754944e-38, %v247_v52  ;;  %vm246_vm12 = vcmp.eq.f32.partialorder %v245_v54, 8.507059e+37 }
 0x1e3   :  { %v224_v43 = vmul.f32 %v298_v38, %v223_v41 }
 0x1e5   :  { %v225_v45 = vadd.f32 %v298_v38, %v224_v43 }
 0x1e6   :  { %v300_v46 = vpop.eup %299 }
 0x1e7   :  { %v229_v48 = vsel %vm228_vm6, %v298_v38, %v225_v45  ;;  %v237_v49 = vmul.f32 %v300_v46, %v220_v39  ;;  %vm242_vm9 = vweird.f32 %v300_v46 }
 0x1e8   :  { %v234_v50 = vsel %vm231_vm8, %v233_v47, %v229_v48  ;;  %vm243_vm11 = vmor %vm241_vm10, %vm242_vm9 }
 0x1e9   :  { %252 = vst.msk [vmem:[%s440_s7] sm:$0xff] %vm251_vm7, %v234_v50  ;;  %v238_v51 = vsub.f32 1.0, %v237_v49 }
 0x1eb   :  { %v239_v53 = vmul.f32 %v300_v46, %v238_v51 }
 0x1ed   :  { %v240_v55 = vadd.f32 %v300_v46, %v239_v53 }
 0x1ef   :  { %v244_v57 = vsel %vm243_vm11, %v300_v46, %v240_v55 }
 0x1f0   :  { %v249_v58 = vsel %vm246_vm12, %v248_v56, %v244_v57 }
 0x1f1   :  { %253 = vst.msk [vmem:[%s440_s7 + $0x8] sm:$0xff] %vm251_vm7, %v249_v58 }

</bundles_post_ra>
